<compile_context>
chip_gen: v7x
topology: tpu7x:2x2x1
jax: 0.10.0
libtpu: 0.0.40
codegen_flags: <defaults>
</compile_context>

<pallas_src>
import functools

import jax
import jax.numpy as jnp
from jax import lax
from jax.experimental import pallas as pl
from jax.experimental.pallas import tpu as pltpu

# 48 MiB scoped VMEM: leaves headroom on v7x (64 MiB physical per TC) while
# comfortably above the default scoped limit; v5e/v6e (128 MiB) could raise
# this (and the weight-tile sizes) further.
VMEM_LIMIT = 48 * 1024 * 1024


def _tile_size(dim, pref):
    t = min(pref, dim)
    assert dim % t == 0, f"dim {dim} must be divisible by tile {t}"
    return t


# ---------------- fused RMSNorm (+optional residual add) -> matmul ----------
def _rms_matmul_kernel(x_ref, lnw_ref, w_ref, o_ref, normed_ref, *, eps):
    # Compute the normalization once per T tile (j == 0) and reuse it across
    # all N tiles of the projection.
    @pl.when(pl.program_id(1) == 0)
    def _():
        x = x_ref[...].astype(jnp.float32)
        var = jnp.mean(x * x, axis=-1, keepdims=True)
        normed_ref[...] = (x * lax.rsqrt(var + eps)
                           * lnw_ref[...].astype(jnp.float32)
                           ).astype(normed_ref.dtype)

    o_ref[...] = jnp.dot(normed_ref[...], w_ref[...],
                         preferred_element_type=jnp.float32).astype(o_ref.dtype)


def _add_rms_matmul_kernel(x_ref, r_ref, lnw_ref, w_ref, o_ref, res_ref,
                           normed_ref, *, eps):
    @pl.when(pl.program_id(1) == 0)
    def _():
        s = x_ref[...].astype(jnp.float32) + r_ref[...].astype(jnp.float32)
        res_ref[...] = s.astype(res_ref.dtype)
        var = jnp.mean(s * s, axis=-1, keepdims=True)
        normed_ref[...] = (s * lax.rsqrt(var + eps)
                           * lnw_ref[...].astype(jnp.float32)
                           ).astype(normed_ref.dtype)

    o_ref[...] = jnp.dot(normed_ref[...], w_ref[...],
                         preferred_element_type=jnp.float32).astype(o_ref.dtype)


def rms_matmul(x, ln_w, w, eps, residual=None, tm=256, tn=512):
    T, H = x.shape
    N = w.shape[1]
    tm = _tile_size(T, tm)
    tn = _tile_size(N, tn)
    grid = (T // tm, N // tn)
    x_spec = pl.BlockSpec((tm, H), lambda i, j: (i, 0))
    lnw_spec = pl.BlockSpec((1, H), lambda i, j: (0, 0))
    w_spec = pl.BlockSpec((H, tn), lambda i, j: (0, j))
    o_spec = pl.BlockSpec((tm, tn), lambda i, j: (i, j))
    scratch = [pltpu.VMEM((tm, H), x.dtype)]
    # j must stay "arbitrary": the normed scratch (and residual output) are
    # only written at j == 0.
    params = pltpu.CompilerParams(
        dimension_semantics=("parallel", "arbitrary"),
        vmem_limit_bytes=VMEM_LIMIT)

    if residual is None:
        return pl.pallas_call(
            functools.partial(_rms_matmul_kernel, eps=eps),
            grid=grid,
            in_specs=[x_spec, lnw_spec, w_spec],
            out_specs=o_spec,
            out_shape=jax.ShapeDtypeStruct((T, N), x.dtype),
            scratch_shapes=scratch,
            compiler_params=params,
        )(x, ln_w, w)

    out, new_res = pl.pallas_call(
        functools.partial(_add_rms_matmul_kernel, eps=eps),
        grid=grid,
        in_specs=[x_spec, x_spec, lnw_spec, w_spec],
        out_specs=(o_spec, pl.BlockSpec((tm, H), lambda i, j: (i, 0))),
        out_shape=(jax.ShapeDtypeStruct((T, N), x.dtype),
                   jax.ShapeDtypeStruct((T, H), x.dtype)),
        scratch_shapes=scratch,
        compiler_params=params,
    )(x, residual, ln_w, w)
    return out, new_res


# ---------------- one-shot NeoX RoPE over the Q+K columns of the QKV slab ---
def _rope_kernel(qk_ref, cos_ref, sin_ref, o_ref, *, n_heads, head_dim):
    half = head_dim // 2
    cos = cos_ref[...]              # (tm, half) f32
    sin = sin_ref[...]              # (tm, half) f32
    for h in range(n_heads):        # static unroll over q+k heads
        c0 = h * head_dim
        x = qk_ref[:, c0:c0 + head_dim].astype(jnp.float32)
        x1 = x[:, :half]
        x2 = x[:, half:]
        o1 = x1 * cos - x2 * sin
        o2 = x2 * cos + x1 * sin
        o_ref[:, c0:c0 + head_dim] = jnp.concatenate(
            [o1, o2], axis=1).astype(o_ref.dtype)


def apply_rope(qkv, cos, sin, num_heads, num_kv_heads, head_dim, tm=256):
    T = qkv.shape[0]
    n_qk = num_heads + num_kv_heads
    qk_w = n_qk * head_dim
    tm = _tile_size(T, tm)
    return pl.pallas_call(
        functools.partial(_rope_kernel, n_heads=n_qk, head_dim=head_dim),
        grid=(T // tm,),
        in_specs=[pl.BlockSpec((tm, qk_w), lambda i: (i, 0)),   # q+k cols only
                  pl.BlockSpec((tm, head_dim // 2), lambda i: (i, 0)),
                  pl.BlockSpec((tm, head_dim // 2), lambda i: (i, 0))],
        out_specs=pl.BlockSpec((tm, qk_w), lambda i: (i, 0)),
        out_shape=jax.ShapeDtypeStruct((T, qk_w), qkv.dtype),
        compiler_params=pltpu.CompilerParams(
            dimension_semantics=("parallel",),
            vmem_limit_bytes=VMEM_LIMIT),
    )(qkv, cos, sin)


# ---------------- flash attention (causal, GQA groups, pre-rotated Q/K) -----
def _flash_kernel(q_ref, k_ref, v_ref, o_ref, m_ref, l_ref, acc_ref,
                  *, scale, rep, head_dim, tq, tkv):
    qi = pl.program_id(1)
    ki = pl.program_id(2)
    D = head_dim

    @pl.when(ki == 0)
    def _():
        m_ref[...] = jnp.full_like(m_ref, -jnp.inf)
        l_ref[...] = jnp.zeros_like(l_ref)
        acc_ref[...] = jnp.zeros_like(acc_ref)

    q_start = qi * tq
    k_start = ki * tkv

    def update(masked):
        k = k_ref[...]
        v = v_ref[...]
        if masked:
            offs = ((q_start - k_start)
                    + lax.broadcasted_iota(jnp.int32, (tq, tkv), 0)
                    - lax.broadcasted_iota(jnp.int32, (tq, tkv), 1))
            keep = offs >= 0
        for r in range(rep):                     # static loop over GQA q-heads
            q = q_ref[:, r * D:(r + 1) * D]
            s = lax.dot_general(q, k, (((1,), (1,)), ((), ())),
                                preferred_element_type=jnp.float32) * scale
            if masked:
                s = jnp.where(keep, s, -1e30)
            m_prev = m_ref[r]
            m_new = jnp.maximum(m_prev, jnp.max(s, axis=-1, keepdims=True))
            alpha = jnp.exp(m_prev - m_new)
            p = jnp.exp(s - m_new)
            l_ref[r] = alpha * l_ref[r] + jnp.sum(p, axis=-1, keepdims=True)
            acc_ref[:, r * D:(r + 1) * D] = (
                alpha * acc_ref[:, r * D:(r + 1) * D]
                + jnp.dot(p.astype(v.dtype), v,
                          preferred_element_type=jnp.float32))
            m_ref[r] = m_new

    # Fully-below-diagonal tiles: no mask construction at all.
    @pl.when(k_start + tkv - 1 <= q_start)
    def _():
        update(masked=False)

    # Diagonal-straddling tiles: apply the causal mask.
    @pl.when(jnp.logical_and(k_start < q_start + tq,
                             k_start + tkv - 1 > q_start))
    def _():
        update(masked=True)

    # (tiles fully above the diagonal are skipped; their DMA is avoided by the
    #  clamped index_maps in the wrapper)

    @pl.when(ki == pl.num_programs(2) - 1)
    def _():
        for r in range(rep):
            inv = 1.0 / l_ref[r]
            o_ref[:, r * D:(r + 1) * D] = (
                acc_ref[:, r * D:(r + 1) * D] * inv).astype(o_ref.dtype)


def flash_attention_gqa(roped_qk, qkv, num_heads, num_kv_heads, head_dim,
                        tq=128, tkv=256):
    # roped_qk: (T, (nH + nKV) * D)  -- RoPE already applied to q and k.
    # qkv     : (T, (nH + 2*nKV) * D) -- v is read from here.
    T = qkv.shape[0]
    D = head_dim
    assert D % 128 == 0, "head_dim must be a multiple of the 128-lane width"
    rep = num_heads // num_kv_heads
    tq = _tile_size(T, tq)
    tkv = _tile_size(T, tkv)
    if tkv < tq:
        tq = tkv
    # tkv must be a multiple of tq so no processed tile ever contains a fully
    # masked row before that row's first real score (online-softmax safety).
    assert tkv % tq == 0
    scale = float(D) ** -0.5

    def kv_block(qi, ki):
        # Clamp ki so skipped upper-triangular steps re-use the resident k/v
        # block instead of paying DMA for data the kernel never touches.
        return jnp.minimum(ki, (qi * tq + tq - 1) // tkv)

    q_spec = pl.BlockSpec((tq, rep * D), lambda g, qi, ki: (qi, g))
    k_spec = pl.BlockSpec(
        (tkv, D), lambda g, qi, ki: (kv_block(qi, ki), num_heads + g))
    v_spec = pl.BlockSpec(
        (tkv, D),
        lambda g, qi, ki: (kv_block(qi, ki), num_heads + num_kv_heads + g))
    o_spec = pl.BlockSpec((tq, rep * D), lambda g, qi, ki: (qi, g))

    kernel = functools.partial(_flash_kernel, scale=scale, rep=rep,
                               head_dim=D, tq=tq, tkv=tkv)
    return pl.pallas_call(
        kernel,
        grid=(num_kv_heads, T // tq, T // tkv),
        in_specs=[q_spec, k_spec, v_spec],
        out_specs=o_spec,
        out_shape=jax.ShapeDtypeStruct((T, num_heads * D), qkv.dtype),
        scratch_shapes=[pltpu.VMEM((rep, tq, 1), jnp.float32),   # m
                        pltpu.VMEM((rep, tq, 1), jnp.float32),   # l
                        pltpu.VMEM((tq, rep * D), jnp.float32)], # acc
        compiler_params=pltpu.CompilerParams(
            dimension_semantics=("parallel", "parallel", "arbitrary"),
            vmem_limit_bytes=VMEM_LIMIT),
    )(roped_qk, roped_qk, qkv)


# ---------------- K-tiled matmul with fused residual-add epilogue -----------
def _matmul_add_kernel(x_ref, w_ref, b_ref, o_ref, acc_ref):
    k = pl.program_id(2)

    @pl.when(k == 0)
    def _():
        acc_ref[...] = jnp.zeros_like(acc_ref)

    acc_ref[...] += jnp.dot(x_ref[...], w_ref[...],
                            preferred_element_type=jnp.float32)

    @pl.when(k == pl.num_programs(2) - 1)
    def _():
        o_ref[...] = (acc_ref[...] +
                      b_ref[...].astype(jnp.float32)).astype(o_ref.dtype)


def matmul_add(x, w, b, tm=256, tn=512, tk=512):
    T, K = x.shape
    N = w.shape[1]
    tm = _tile_size(T, tm)
    tn = _tile_size(N, tn)
    tk = _tile_size(K, tk)
    return pl.pallas_call(
        _matmul_add_kernel,
        grid=(T // tm, N // tn, K // tk),
        in_specs=[pl.BlockSpec((tm, tk), lambda i, j, k: (i, k)),
                  pl.BlockSpec((tk, tn), lambda i, j, k: (k, j)),
                  pl.BlockSpec((tm, tn), lambda i, j, k: (i, j))],
        out_specs=pl.BlockSpec((tm, tn), lambda i, j, k: (i, j)),
        out_shape=jax.ShapeDtypeStruct((T, N), x.dtype),
        scratch_shapes=[pltpu.VMEM((tm, tn), jnp.float32)],
        compiler_params=pltpu.CompilerParams(
            dimension_semantics=("parallel", "parallel", "arbitrary"),
            vmem_limit_bytes=VMEM_LIMIT),
    )(x, w, b)


# ---------------- post-attention RMSNorm fused into ReLU^2 MLP --------------
def _rms_mlp_kernel(s_ref, lnw_ref, wu_ref, wd_ref, o_ref,
                    normed_ref, acc_ref, *, eps):
    t = pl.program_id(1)

    @pl.when(t == 0)
    def _():
        s = s_ref[...].astype(jnp.float32)
        var = jnp.mean(s * s, axis=-1, keepdims=True)
        normed_ref[...] = (s * lax.rsqrt(var + eps)
                           * lnw_ref[...].astype(jnp.float32)
                           ).astype(normed_ref.dtype)
        acc_ref[...] = jnp.zeros_like(acc_ref)

    h = jnp.dot(normed_ref[...], wu_ref[...],
                preferred_element_type=jnp.float32)
    h = jnp.maximum(h, 0.0)
    h = (h * h).astype(wd_ref.dtype)          # relu^2 in f32, cast for MXU
    acc_ref[...] += jnp.dot(h, wd_ref[...], preferred_element_type=jnp.float32)

    @pl.when(t == pl.num_programs(1) - 1)
    def _():
        o_ref[...] = acc_ref[...].astype(o_ref.dtype)


def rms_mlp(s, ln_w, w_up, w_down, eps, tm=256, ti=512):
    T, H = s.shape
    inter = w_up.shape[1]
    tm = _tile_size(T, tm)
    ti = _tile_size(inter, ti)
    return pl.pallas_call(
        functools.partial(_rms_mlp_kernel, eps=eps),
        grid=(T // tm, inter // ti),
        in_specs=[pl.BlockSpec((tm, H), lambda i, t: (i, 0)),
                  pl.BlockSpec((1, H), lambda i, t: (0, 0)),
                  pl.BlockSpec((H, ti), lambda i, t: (0, t)),
                  pl.BlockSpec((ti, H), lambda i, t: (t, 0))],
        out_specs=pl.BlockSpec((tm, H), lambda i, t: (i, 0)),
        out_shape=jax.ShapeDtypeStruct((T, H), s.dtype),
        scratch_shapes=[pltpu.VMEM((tm, H), s.dtype),
                        pltpu.VMEM((tm, H), jnp.float32)],
        compiler_params=pltpu.CompilerParams(
            dimension_semantics=("parallel", "arbitrary"),
            vmem_limit_bytes=VMEM_LIMIT),
    )(s, ln_w, w_up, w_down)


# ------------------------------------------------------------ decoder layer --
class ArceeDecoderLayerPallas:
    def __init__(self, hidden_size, intermediate_size, num_heads, num_kv_heads,
                 rms_norm_eps=1e-6, rope_theta=10000.0, seed=0,
                 dtype=jnp.bfloat16):
        self.hidden_size = hidden_size
        self.intermediate_size = intermediate_size
        self.num_heads = num_heads
        self.num_kv_heads = num_kv_heads
        self.head_dim = hidden_size // num_heads
        self.eps = rms_norm_eps
        self.rope_theta = rope_theta

        D = self.head_dim
        q_size = num_heads * D
        kv_size = num_kv_heads * D

        key = jax.random.PRNGKey(seed)
        ks = jax.random.split(key, 6)
        s = 0.02
        self.w_qkv = (s * jax.random.normal(
            ks[0], (hidden_size, q_size + 2 * kv_size))).astype(dtype)
        self.w_o = (s * jax.random.normal(
            ks[1], (q_size, hidden_size))).astype(dtype)
        self.w_up = (s * jax.random.normal(
            ks[2], (hidden_size, intermediate_size))).astype(dtype)
        self.w_down = (s * jax.random.normal(
            ks[3], (intermediate_size, hidden_size))).astype(dtype)
        self.w_ln_in = (1.0 + 0.01 * jax.random.normal(
            ks[4], (1, hidden_size))).astype(dtype)
        self.w_ln_post = (1.0 + 0.01 * jax.random.normal(
            ks[5], (1, hidden_size))).astype(dtype)

    def _rope_tables(self, positions):
        D = self.head_dim
        half = D // 2
        inv_freq = 1.0 / (self.rope_theta **
                          (jnp.arange(0, half, dtype=jnp.float32) * 2.0 / D))
        angles = positions.astype(jnp.float32)[:, None] * inv_freq[None, :]
        return jnp.cos(angles), jnp.sin(angles)          # (T, D/2) each

    def __call__(self, positions, hidden_states, residual=None):
        nH, nKV, D = self.num_heads, self.num_kv_heads, self.head_dim

        # input layernorm (+ optional residual add) fused into the QKV matmul
        if residual is None:
            residual = hidden_states
            qkv = rms_matmul(hidden_states, self.w_ln_in, self.w_qkv, self.eps)
        else:
            qkv, residual = rms_matmul(hidden_states, self.w_ln_in, self.w_qkv,
                                       self.eps, residual=residual)

        # one-shot RoPE over the q+k columns, then causal flash attention
        cos, sin = self._rope_tables(positions)
        roped_qk = apply_rope(qkv, cos, sin, nH, nKV, D)
        attn = flash_attention_gqa(roped_qk, qkv, nH, nKV, D)

        # o_proj with the residual add fused into the epilogue; `s` is the
        # new residual (= o_proj(attn) + residual)
        s = matmul_add(attn, self.w_o, residual)

        # post-attention RMSNorm fused into the ReLU^2 MLP (I-tiled reduction)
        out = rms_mlp(s, self.w_ln_post, self.w_up, self.w_down, self.eps)
        return out, s


# ------------------------------------------------------------------- main ----
if __name__ == "__main__":
    # Small but tile-friendly shapes (multiples of 128 on lane dims).
    T = 256      # num tokens
    H = 512      # hidden_size
    I = 1024     # intermediate_size
    nH = 4       # num_attention_heads  -> head_dim = 128
    nKV = 2      # num_key_value_heads  (GQA, rep = 2)

    layer = ArceeDecoderLayerPallas(
        hidden_size=H, intermediate_size=I,
        num_heads=nH, num_kv_heads=nKV,
        rms_norm_eps=1e-6, rope_theta=10000.0, seed=0)

    key = jax.random.PRNGKey(0)
    hidden_states = jax.random.normal(key, (T, H),
                                      dtype=jnp.float32).astype(jnp.bfloat16)
    positions = jnp.arange(T, dtype=jnp.int32)

    # residual=None entry path
    out, residual = layer(positions, hidden_states, residual=None)
    out, residual = jax.block_until_ready((out, residual))
    assert out.shape == (T, H) and residual.shape == (T, H)
    assert bool(jnp.isfinite(out.astype(jnp.float32)).all())
    assert bool(jnp.isfinite(residual.astype(jnp.float32)).all())

    # chained call exercises the fused residual-add + RMSNorm path
    out2, residual2 = layer(positions, out, residual=residual)
    out2, residual2 = jax.block_until_ready((out2, residual2))
    assert out2.shape == (T, H) and residual2.shape == (T, H)
    assert bool(jnp.isfinite(out2.astype(jnp.float32)).all())
    assert bool(jnp.isfinite(residual2.astype(jnp.float32)).all())

    print("KERNEL_OK")
</pallas_src>

<mosaic_0001>
module attributes {stable_mosaic.version = 11 : i64} {
  func.func @_rms_matmul_kernel(%arg0: i32, %arg1: i32, %arg2: memref<256x512xbf16, #tpu.memory_space<vmem>>, %arg3: memref<1x512xbf16, #tpu.memory_space<vmem>>, %arg4: memref<512x512xbf16, #tpu.memory_space<vmem>>, %arg5: memref<256x512xbf16, #tpu.memory_space<vmem>>, %arg6: memref<256x512xbf16, #tpu.memory_space<vmem>>) attributes {dimension_semantics = [#tpu.dimension_semantics<parallel>, #tpu.dimension_semantics<arbitrary>], iteration_bounds = array<i64: 1, 2>, scalar_prefetch = 0 : i64, scratch_operands = 1 : i64, tpu.core_type = #tpu.core_type<tc>, window_params = [{transform_indices = @transform_0, window_bounds = array<i64: 256, 512>}, {pipeline_mode = #tpu.pipeline_mode<synchronous>, transform_indices = @transform_1, window_bounds = array<i64: 1, 512>}, {transform_indices = @transform_2, window_bounds = array<i64: 512, 512>}, {transform_indices = @transform_3, window_bounds = array<i64: 256, 512>}]} {
    %c0_i32 = arith.constant 0 : i32
    %0 = arith.cmpi eq, %arg1, %c0_i32 : i32
    %1 = arith.extui %0 : i1 to i32
    %c0_i32_0 = arith.constant 0 : i32
    %2 = arith.cmpi ne, %1, %c0_i32_0 : i32
    scf.if %2 {
      %c0_6 = arith.constant 0 : index
      %c0_7 = arith.constant 0 : index
      %8 = vector.load %arg2[%c0_6, %c0_7] : memref<256x512xbf16, #tpu.memory_space<vmem>>, vector<256x512xbf16>
      %9 = arith.extf %8 : vector<256x512xbf16> to vector<256x512xf32>
      %10 = arith.mulf %9, %9 : vector<256x512xf32>
      %cst_8 = arith.constant dense<0.000000e+00> : vector<256xf32>
      %11 = vector.multi_reduction <add>, %10, %cst_8 [1] : vector<256x512xf32> to vector<256xf32>
      %12 = vector.shape_cast %11 : vector<256xf32> to vector<256x1xf32>
      %cst_9 = arith.constant 5.120000e+02 : f32
      %13 = vector.broadcast %cst_9 : f32 to vector<256x1xf32>
      %14 = arith.divf %12, %13 : vector<256x1xf32>
      %cst_10 = arith.constant 9.99999997E-7 : f32
      %15 = vector.broadcast %cst_10 : f32 to vector<256x1xf32>
      %16 = arith.addf %14, %15 : vector<256x1xf32>
      %17 = math.rsqrt %16 : vector<256x1xf32>
      %18 = vector.broadcast %17 : vector<256x1xf32> to vector<256x512xf32>
      %19 = arith.mulf %9, %18 : vector<256x512xf32>
      %c0_11 = arith.constant 0 : index
      %c0_12 = arith.constant 0 : index
      %20 = vector.load %arg3[%c0_11, %c0_12] : memref<1x512xbf16, #tpu.memory_space<vmem>>, vector<1x512xbf16>
      %21 = arith.extf %20 : vector<1x512xbf16> to vector<1x512xf32>
      %22 = vector.broadcast %21 : vector<1x512xf32> to vector<256x512xf32>
      %23 = arith.mulf %19, %22 : vector<256x512xf32>
      %24 = arith.truncf %23 : vector<256x512xf32> to vector<256x512xbf16>
      %c0_13 = arith.constant 0 : index
      %c0_14 = arith.constant 0 : index
      %25 = vector.load %arg6[%c0_13, %c0_14] : memref<256x512xbf16, #tpu.memory_space<vmem>>, vector<256x512xbf16>
      tpu.vector_store %arg6[%c0_13, %c0_14], %24 {strides = array<i32>} : memref<256x512xbf16, #tpu.memory_space<vmem>>, vector<256x512xbf16>,
    } else {
    }
    %c0 = arith.constant 0 : index
    %c0_1 = arith.constant 0 : index
    %3 = vector.load %arg6[%c0, %c0_1] : memref<256x512xbf16, #tpu.memory_space<vmem>>, vector<256x512xbf16>
    %c0_2 = arith.constant 0 : index
    %c0_3 = arith.constant 0 : index
    %4 = vector.load %arg4[%c0_2, %c0_3] : memref<512x512xbf16, #tpu.memory_space<vmem>>, vector<512x512xbf16>
    %cst = arith.constant dense<0.000000e+00> : vector<256x512xf32>
    %5 = tpu.matmul %3, %4, %cst {dimension_numbers = #tpu.dot_dimension_numbers<[1], [0], [0], [1], [0, 0, 1, 1], [], []>} : vector<256x512xbf16>, vector<512x512xbf16>, vector<256x512xf32> -> vector<256x512xf32>
    %6 = arith.truncf %5 : vector<256x512xf32> to vector<256x512xbf16>
    %c0_4 = arith.constant 0 : index
    %c0_5 = arith.constant 0 : index
    %7 = vector.load %arg5[%c0_4, %c0_5] : memref<256x512xbf16, #tpu.memory_space<vmem>>, vector<256x512xbf16>
    tpu.vector_store %arg5[%c0_4, %c0_5], %6 {strides = array<i32>} : memref<256x512xbf16, #tpu.memory_space<vmem>>, vector<256x512xbf16>,
    return
  }
  func.func @transform_0(%arg0: i32, %arg1: i32) -> (i32, i32) {
    %c0_i32 = arith.constant 0 : i32
    %c0_i32_0 = arith.constant 0 : i32
    return %arg0, %c0_i32 : i32, i32
  }
  func.func @transform_1(%arg0: i32, %arg1: i32) -> (i32, i32) {
    %c0_i32 = arith.constant 0 : i32
    %c0_i32_0 = arith.constant 0 : i32
    %c0_i32_1 = arith.constant 0 : i32
    return %c0_i32, %c0_i32_0 : i32, i32
  }
  func.func @transform_2(%arg0: i32, %arg1: i32) -> (i32, i32) {
    %c0_i32 = arith.constant 0 : i32
    %c0_i32_0 = arith.constant 0 : i32
    return %c0_i32, %arg1 : i32, i32
  }
  func.func @transform_3(%arg0: i32, %arg1: i32) -> (i32, i32) {
    %c0_i32 = arith.constant 0 : i32
    return %arg0, %arg1 : i32, i32
  }
}

</mosaic_0001>

<bundles_post_ra>
// kernel: tpu_custom_call.1
= control target key start
LH: loop header
LB: loop body
LE: loop exit
PB: predicated region body
PF: predicated region fallthrough
CT: control target
= control target key end

     0   :  { %8 = vsyncpa [#allocation4], 0  ;;  %s5660_s0 = inlined_call_operand.hbm [shape: bf16[256,512], index: 0, kind: input, shape index: {}]   ;;  %s5661_s1 = inlined_call_operand.hbm [shape: bf16[1,512], index: 1, kind: input, shape index: {}]   ;;  %s5662_s2 = inlined_call_operand.hbm [shape: bf16[512,1024], index: 2, kind: input, shape index: {}]   ;;  %s5663_s3 = inlined_call_operand.hbm [shape: bf16[256,1024], index: 3, kind: output, shape index: {}]  }
   0x1   :  { %9 = vsyncpa [#allocation7], 0 }
   0x2   :  { %10 = vsyncpa [#allocation5], 0 }
   0x3   :  { %12 = vsyncpa [#allocation5 + $0x1], 0  ;;  %s4378_s12 = smov 0   ;;  %s4380_s13 = smov 0  }
   0x4   :  { %s4382_s14 = smov 0   ;;  %s4384_s15 = smov 0  }
   0x5   :  { %s4386_s16 = smov 0   ;;  %s4388_s17 = smov 0  }
   0x6 LB: > { %s4409_s18 = sadd.s32 4294967295, %s4346_s17   ;;  %s3420_s19 = sadd.s32 4294967294, %s4346_s17   ;;  %s4346_s17 = sphi %s4388_s17, %s18_s17   ;;  %s4342_s16 = sphi %s4386_s16, %s5949_s16   ;;  %s4338_s15 = sphi %s4384_s15, %s5948_s15   ;;  %s4334_s14 = sphi %s4382_s14, %s5947_s14   ;;  %s4330_s13 = sphi %s4380_s13, %s5946_s13   ;;  %s4326_s12 = sphi %s4378_s12, %s5945_s12  }
   0x7   : > { %s84_s20 = sadd.s32 1, %s4334_s14  ;;  %p91_p0 = scmp.ne.s32.totalorder %s4334_s14, %s4330_s13 }
   0x8   : > { %p92_p1 = scmp.eq.s32.totalorder %s4346_s17, 0  ;;  %p97_p2 = scmp.ne.s32.totalorder %s4330_s13, %s4326_s12 }
   0x9   : > { %p5664_p3 = scmp.eq.s32.totalorder %s4409_s18, 0  ;;  %p123_p4 = scmp.eq.s32.totalorder %s4409_s18, 1 }
   0xa   : > { %p4420_p5 = por %p92_p1, %p91_p0  ;;  %p129_p6 = scmp.eq.s32.totalorder %s3420_s19, 1 }
   0xb   : > { %p4426_p7 = por %p5664_p3, %p97_p2  ;;  %p4430_p8 = por %p123_p4, %p91_p0 }
   0xc   : > { %p4434_p9 = por %p129_p6, %p97_p2  ;;  %p3421_p10 = scmp.ge.s32.totalorder %s4346_s17, 1 }
   0xd   : > { %s5756_s22 = scalar_select %p4426_p7, 1, 0 }
   0xe   : > { %s5757_s23 = scalar_select %p4430_p8, 1, 0 }
   0xf   : > { %s5758_s24 = scalar_select %p4434_p9, 1, 0 }
  0x10   : > { %p136_p11 = scmp.lt.s32.totalorder %s4346_s17, 3  ;;  %s4348_s26 = smov [#allocation3]  }
  0x11   : > { %s152_s27 = sshll.u32 %s4348_s26, 4  ;;  %p3854_p1 = scmp.lt.s32.totalorder %s4346_s17, 2  ;;  %s4444_s27 = int_to_ptr.vmem [resolvable:$true] %s152_s27 }
  0x12   : > { %p4440_p12 = pnand %p3421_p10, %p136_p11  ;;  %s4349_s29 = smov [#allocation6]  }
  0x13   : > { %s166_s30 = sshll.u32 %s4349_s29, 4  ;;  %p4458_p4 = pnand %p3854_p1, %p4420_p5  ;;  %s4462_s30 = int_to_ptr.vmem [resolvable:$true] %s166_s30 }
  0x14   : > { %p3837_p13 = pneg %p4440_p12  ;;  %s4170_s7 = scalar_lea.hbm %s5660_s0, 8192 }
  0x15   : > { %p4171_p6 = scmp.ne.s32.totalorder %s5660_s0, %s4170_s7  ;;  %p4177_p5 = scmp.lt.u32.totalorder %s4170_s7, %s5660_s0 }
  0x16   : > { %p4452_p2 = pnand %p3837_p13, %p5664_p3 }
  0x18   : > { %p4172_p10 = pneg %p4452_p2 }
  0x1a   : > { %p4173_p11 = pnand %p4172_p10, %p4171_p6 }
  0x1c   : > { %p4174_p13 = pneg %p4173_p11 }
  0x1e   : > { %p4179_p1 = pnand %p4177_p5, %p4174_p13 }
  0x20   : > { %4182 = shalt.err (!%p4179_p1)
}
  0x21   : > { %s4183_s19 = scalar_lea.vmem %s4444_s27, 8192  ;;  %p4191_p8 = scmp.lt.s32.totalorder %s4444_s27, %s4444_s27 }
  0x22   : > { %p4184_p0 = scmp.ne.s32.totalorder %s4444_s27, %s4183_s19  ;;  %p4192_p6 = scmp.lt.s32.totalorder %s4183_s19, %s4183_s19 }
  0x24   : > { %p4186_p3 = pnand %p4184_p0, %p4172_p10  ;;  %p4193_p11 = por %p4192_p6, %p4191_p8 }
  0x26   : > { %p4187_p9 = pneg %p4186_p3 }
  0x28   : > { %p4194_p7 = pnand %p4193_p11, %p4187_p9 }
  0x2a   : > { %4197 = shalt.err (!%p4194_p7)
}
  0x2b   : > { %s5667_s21 = smov 256   ;;  %s4351_s26 = smov 16  }
  0x2c   : > { %3840 = dma.hbm_to_vmem [thread:$0]  (!%p4452_p2), %s5660_s0, 8192, %s4444_s27, [#allocation4], %s5667_s21, %s5667_s21, %s4351_s26  }
  0x2d   : > { %s4198_s8 = scalar_lea.hbm %s5661_s1, 64 }
  0x2e   : > { %p4199_p3 = scmp.ne.s32.totalorder %s5661_s1, %s4198_s8  ;;  %p4205_p9 = scmp.lt.u32.totalorder %s4198_s8, %s5661_s1 }
  0x30   : > { %p4201_p7 = pnand %p4199_p3, %p4172_p10 }
  0x32   : > { %p4202_p8 = pneg %p4201_p7 }
  0x34   : > { %p4207_p0 = pnand %p4205_p9, %p4202_p8 }
  0x36   : > { %4210 = shalt.err (!%p4207_p0)
}
  0x37   : > { %s4211_s27 = scalar_lea.vmem %s4462_s30, 64  ;;  %p4219_p6 = scmp.lt.s32.totalorder %s4462_s30, %s4462_s30 }
  0x38   : > { %p4212_p13 = scmp.ne.s32.totalorder %s4462_s30, %s4211_s27  ;;  %p4220_p11 = scmp.lt.s32.totalorder %s4211_s27, %s4211_s27 }
  0x3a   : > { %p4214_p5 = pnand %p4212_p13, %p4172_p10  ;;  %p4221_p3 = por %p4220_p11, %p4219_p6 }
  0x3c   : > { %p4215_p1 = pneg %p4214_p5 }
  0x3e   : > { %p4222_p7 = pnand %p4221_p3, %p4215_p1 }
  0x40   : > { %4225 = shalt.err (!%p4222_p7)
}
  0x41   : > { %3843 = dma.hbm_to_vmem [thread:$0]  (!%p4452_p2), %s5661_s1, 64, %s4462_s30, [#allocation7]  }
  0x42   : > { %s27_s6 = sadd.s32 1, %s4342_s16  ;;  %s177_s7 = sand.u32 1, %s4346_s17  }
  0x43   : > { %p28_p10 = scmp.ge.s32.totalorder %s27_s6, 2  ;;  %s179_s8 = sand.u32 1, %s4334_s14  }
  0x44   : > { %s3631_s9 = sshll.u32 %s4342_s16, 8  ;;  %s3425_s28 = sshll.u32 %s179_s8, 10 }
  0x45   : > { %s5951_s6 = smov (%p28_p10, %s27_s6), 0  ;;  %s4528_s19 = scalar_lea.hbm %s5662_s2, %s3631_s9 }
  0x46   : > { %s81_s30 = ssub.s32 %s4342_s16, %s5951_s6  ;;  %s181_s27 = scalar_lea.vmem [#allocation8], %s3425_s28 }
  0x47   : > { %p82_p2 = scmp.eq.s32.totalorder %s81_s30, 0  ;;  %s188_s29 = sshll.u32 %s181_s27, 4  ;;  %s4532_s29 = int_to_ptr.vmem [resolvable:$true] %s188_s29 }
  0x48   : > { %s4539_s21 = scalar_lea.sflag [#allocation4], %s177_s7  ;;  %s4226_s8 = scalar_lea.hbm %s4528_s19, 16384 }
  0x49   : > { %s4537_s5 = scalar_select %p82_p2, %s4334_s14, %s84_s20  }
  0x4a   : > { %p4227_p8 = scmp.ne.s32.totalorder %s4528_s19, %s4226_s8  ;;  %p4228_p9 = pneg %p4458_p4 }
  0x4b   : > { %s4231_s28 = scalar_lea.hbm %s5662_s2, 32768  ;;  %p4232_p5 = scmp.lt.u32.totalorder %s4528_s19, %s5662_s2 }
  0x4c   : > { %p4229_p0 = pnand %p4228_p9, %p4227_p8  ;;  %p4233_p1 = scmp.lt.u32.totalorder %s4231_s28, %s4226_s8 }
  0x4d   : > { %p4235_p11 = scmp.lt.u32.totalorder %s4226_s8, %s4528_s19 }
  0x4e   : > { %p4230_p13 = pneg %p4229_p0  ;;  %p4234_p6 = por %p4233_p1, %p4232_p5 }
  0x50   : > { %p4236_p3 = por %p4235_p11, %p4234_p6 }
  0x52   : > { %p4237_p7 = pnand %p4236_p3, %p4230_p13 }
  0x54   : > { %4240 = shalt.err (!%p4237_p7)
}
  0x55   : > { %s4241_s20 = scalar_lea.vmem %s4532_s29, 16384  ;;  %s4352_s7 = smov [#allocation8]  }
  0x56   : > { %p4242_p10 = scmp.ne.s32.totalorder %s4532_s29, %s4241_s20  ;;  %s4246_s27 = sshll.u32 %s4352_s7, 4  ;;  %s4247_s27 = int_to_ptr.vmem [resolvable:$false] %s4246_s27 }
  0x57   : > { %s4248_s9 = scalar_lea.vmem %s4247_s27, 32768  ;;  %p4249_p0 = scmp.lt.s32.totalorder %s4532_s29, %s4247_s27 }
  0x58   : > { %p4244_p2 = pnand %p4242_p10, %p4228_p9  ;;  %p4250_p5 = scmp.lt.s32.totalorder %s4248_s9, %s4241_s20 }
  0x5a   : > { %p4245_p8 = pneg %p4244_p2  ;;  %p4251_p1 = por %p4250_p5, %p4249_p0 }
  0x5c   : > { %p4252_p6 = pnand %p4251_p1, %p4245_p8 }
  0x5e   : > { %4255 = shalt.err (!%p4252_p6)
}
  0x5f   : > { %s4353_s8 = smov 512   ;;  %s5762_s10 = smov 256  }
  0x60   : > { %3847 = dma.hbm_to_vmem [thread:$0]  (!%p4458_p4), %s4528_s19, 16384, %s4532_s29, %s4539_s21, %s4353_s8, %s5762_s10, %s4351_s26  }
  0x61   : > { %200 = sbr.rel (%p4440_p12) target bundleno = 951 (0x3b7), region = 32  ;;  %p5763_p9 = scmp.eq.s32.totalorder (!%p4440_p12), %s4409_s18, 0 }
  0x68   : > { %4309 = dma.done.wait (%p5763_p9), [#allocation4], 8192   ;;  %p5764_p13 = pmov %p5763_p9 }
  0x69   : > { %p5765_p11 = pmov %p5763_p9 }
  0x6a   : > { %4311 = vsyncadd (%p5764_p13), [#allocation4], 4294959104 }
  0x6b   : > { %4313 = dma.done.wait (%p5765_p11), [#allocation7], 64   ;;  %p5766_p3 = pmov %p5763_p9 }
  0x6c   : > { %s210_s4 = sand.u32 1, %s4409_s18   ;;  %s4581_s21 = sand.u32 1, %s4330_s13  }
  0x6d   : > { %4315 = vsyncadd (%p5766_p3), [#allocation7], 4294967232  ;;  %s3431_s25 = sshll.u32 %s4581_s21, 10  ;;  %s211_s26 = scalar_lea.sflag [#allocation4], %s210_s4 }
  0x6e   : > { %s4584_s19 = scalar_lea.vmem [#allocation8], %s3431_s25  ;;  %p5767_p12 = scmp.ne.s32.totalorder %s5756_s22, 0 }
  0x70   : > { %4317 = dma.done.wait (%p5767_p12), %s211_s26, 16384  }
  0x71   : > { %4319 = vsyncadd (%p5767_p12), %s211_s26, 4294950912  ;;  %s3432_s29 = sshll.u32 %s4581_s21, 9  ;;  %p3433_p4 = scmp.ne.s32.totalorder %s4338_s15, 0 }
  0x72   : > { %s4591_s28 = scalar_lea.vmem [#allocation9], %s3432_s29 }
  0x73   : > { %244 = sbr.rel (%p3433_p4) target bundleno = 405 (0x195), region = 48 }
  0x7a   : > { %v249_v0 = vld [vmem:[#allocation3 + $0x20] sm:$0xff]  ;;  %v250_v1 = vld [vmem:[#allocation3 + $0x28] sm:$0xff]  ;;  %v251_v12 = vld [vmem:[#allocation3 + $0x30] sm:$0xff] }
  0x7b   : > { %v245_v2 = vld [vmem:[#allocation3] sm:$0xff]  ;;  %v4594_v3 = vunpack.c.l.bf16 %v249_v0  ;;  %v4596_v4 = vunpack.c.h.bf16 %v249_v0  ;;  %v4598_v5 = vunpack.c.l.bf16 %v250_v1  ;;  %v4600_v6 = vunpack.c.h.bf16 %v250_v1  ;;  %v246_v7 = vld [vmem:[#allocation3 + $0x8] sm:$0xff]  ;;  %v252_v13 = vld [vmem:[#allocation3 + $0x38] sm:$0xff] }
  0x7c   : > { %v4602_v8 = vunpack.c.l.bf16 %v245_v2  ;;  %v4604_v9 = vunpack.c.h.bf16 %v245_v2  ;;  %v4606_v10 = vunpack.c.l.bf16 %v246_v7  ;;  %v4608_v11 = vunpack.c.h.bf16 %v246_v7  ;;  %v247_v18 = vld [vmem:[#allocation3 + $0x10] sm:$0xff]  ;;  %v248_v27 = vld [vmem:[#allocation3 + $0x18] sm:$0xff]  ;;  %v253_v46 = vld [vmem:[#allocation3 + $0x40] sm:$0xff] }
  0x7d   : > { %v445_v14 = vmul.f32 %v4594_v3, %v4594_v3  ;;  %v446_v15 = vmul.f32 %v4596_v4, %v4596_v4  ;;  %v447_v16 = vmul.f32 %v4598_v5, %v4598_v5  ;;  %v448_v17 = vmul.f32 %v4600_v6, %v4600_v6  ;;  %v255_v36 = vld [vmem:[#allocation3 + $0x50] sm:$0xff]  ;;  %v256_v41 = vld [vmem:[#allocation3 + $0x58] sm:$0xff]  ;;  %v254_v55 = vld [vmem:[#allocation3 + $0x48] sm:$0xff] }
  0x7e   : > { %v437_v19 = vmul.f32 %v4602_v8, %v4602_v8  ;;  %v438_v20 = vmul.f32 %v4604_v9, %v4604_v9  ;;  %v439_v21 = vmul.f32 %v4606_v10, %v4606_v10  ;;  %v440_v22 = vmul.f32 %v4608_v11, %v4608_v11  ;;  %v259_v60 = vld [vmem:[#allocation3 + $0x70] sm:$0xff]  ;;  %v260_v1 = vld [vmem:[#allocation3 + $0x78] sm:$0xff] }
  0x7f   : > { %v575_v23 = vadd.f32 %v446_v15, %v445_v14  ;;  %v4626_v24 = vunpack.c.l.bf16 %v251_v12  ;;  %v4628_v25 = vunpack.c.h.bf16 %v251_v12  ;;  %v4630_v26 = vunpack.c.l.bf16 %v252_v13 }
  0x80   : > { %v565_v28 = vadd.f32 %v438_v20, %v437_v19  ;;  %v4632_v29 = vunpack.c.h.bf16 %v252_v13  ;;  %v4634_v30 = vunpack.c.l.bf16 %v247_v18  ;;  %v4636_v31 = vunpack.c.h.bf16 %v247_v18  ;;  %v257_v18 = vld [vmem:[#allocation3 + $0x60] sm:$0xff] }
  0x81   : > { %v576_v32 = vadd.f32 %v575_v23, %v447_v16  ;;  %v449_v33 = vmul.f32 %v4626_v24, %v4626_v24  ;;  %v450_v34 = vmul.f32 %v4628_v25, %v4628_v25  ;;  %v451_v35 = vmul.f32 %v4630_v26, %v4630_v26  ;;  %v258_v23 = vld [vmem:[#allocation3 + $0x68] sm:$0xff] }
  0x82   : > { %v566_v37 = vadd.f32 %v565_v28, %v439_v21  ;;  %v452_v38 = vmul.f32 %v4632_v29, %v4632_v29  ;;  %v4646_v39 = vunpack.c.l.bf16 %v248_v27  ;;  %v4648_v40 = vunpack.c.h.bf16 %v248_v27 }
  0x83   : > { %v577_v42 = vadd.f32 %v576_v32, %v448_v17  ;;  %v580_v43 = vadd.f32 %v450_v34, %v449_v33  ;;  %v441_v44 = vmul.f32 %v4634_v30, %v4634_v30  ;;  %v442_v45 = vmul.f32 %v4636_v31, %v4636_v31 }
  0x84   : > { %v567_v47 = vadd.f32 %v566_v37, %v440_v22  ;;  %v443_v48 = vmul.f32 %v4646_v39, %v4646_v39  ;;  %v444_v49 = vmul.f32 %v4648_v40, %v4648_v40  ;;  %v4658_v50 = vunpack.c.l.bf16 %v255_v36 }
  0x85   : > { %578 = vadd.xlane.f32.xlu1 %v577_v42  ;;  %v581_v51 = vadd.f32 %v580_v43, %v451_v35  ;;  %v570_v52 = vadd.f32 %v442_v45, %v441_v44  ;;  %v4660_v53 = vunpack.c.h.bf16 %v255_v36  ;;  %v4662_v54 = vunpack.c.l.bf16 %v256_v41  ;;  %v264_v45 = vld [vmem:[#allocation3 + $0x98] sm:$0xff] }
  0x86   : > { %568 = vadd.xlane.f32.xlu0 %v567_v47  ;;  %v4664_v56 = vunpack.c.h.bf16 %v256_v41  ;;  %v457_v57 = vmul.f32 %v4658_v50, %v4658_v50  ;;  %v4668_v58 = vunpack.c.l.bf16 %v253_v46  ;;  %v4670_v59 = vunpack.c.h.bf16 %v253_v46 }
  0x87   : > { %v582_v61 = vadd.f32 %v581_v51, %v452_v38  ;;  %v571_v62 = vadd.f32 %v570_v52, %v443_v48  ;;  %v458_v63 = vmul.f32 %v4660_v53, %v4660_v53  ;;  %v459_v0 = vmul.f32 %v4662_v54, %v4662_v54  ;;  %v263_v38 = vld [vmem:[#allocation3 + $0x90] sm:$0xff]  ;;  %v261_v51 = vld [vmem:[#allocation3 + $0x80] sm:$0xff] }
  0x88   : > { %v460_v2 = vmul.f32 %v4664_v56, %v4664_v56  ;;  %v4678_v7 = vunpack.c.l.bf16 %v254_v55  ;;  %v4680_v12 = vunpack.c.h.bf16 %v254_v55  ;;  %v453_v13 = vmul.f32 %v4668_v58, %v4668_v58 }
  0x89   : > { %583 = vadd.xlane.f32.xlu1 %v582_v61  ;;  %v572_v14 = vadd.f32 %v571_v62, %v444_v49  ;;  %v590_v15 = vadd.f32 %v458_v63, %v457_v57  ;;  %v454_v16 = vmul.f32 %v4670_v59, %v4670_v59  ;;  %v4686_v17 = vunpack.c.l.bf16 %v259_v60 }
  0x8a   : > { %v455_v19 = vmul.f32 %v4678_v7, %v4678_v7  ;;  %v456_v20 = vmul.f32 %v4680_v12, %v4680_v12  ;;  %v4692_v21 = vunpack.c.h.bf16 %v259_v60  ;;  %v4694_v22 = vunpack.c.l.bf16 %v260_v1 }
  0x8b   : > { %573 = vadd.xlane.f32.xlu0 %v572_v14  ;;  %v591_v27 = vadd.f32 %v590_v15, %v459_v0  ;;  %v585_v28 = vadd.f32 %v454_v16, %v453_v13  ;;  %v4696_v32 = vunpack.c.h.bf16 %v260_v1  ;;  %v465_v33 = vmul.f32 %v4686_v17, %v4686_v17  ;;  %v262_v1 = vld [vmem:[#allocation3 + $0x88] sm:$0xff]  ;;  %v267_v16 = vld [vmem:[#allocation3 + $0xb0] sm:$0xff] }
  0x8c   : > { %v466_v34 = vmul.f32 %v4692_v21, %v4692_v21  ;;  %v467_v35 = vmul.f32 %v4694_v22, %v4694_v22  ;;  %v4704_v36 = vunpack.c.l.bf16 %v257_v18  ;;  %v4706_v37 = vunpack.c.h.bf16 %v257_v18 }
  0x8d   : > { %v592_v41 = vadd.f32 %v591_v27, %v460_v2  ;;  %v586_v42 = vadd.f32 %v585_v28, %v455_v19  ;;  %v468_v43 = vmul.f32 %v4696_v32, %v4696_v32  ;;  %v4710_v44 = vunpack.c.l.bf16 %v258_v23 }
  0x8e   : > { %v600_v46 = vadd.f32 %v466_v34, %v465_v33  ;;  %v4712_v47 = vunpack.c.h.bf16 %v258_v23  ;;  %v461_v48 = vmul.f32 %v4704_v36, %v4704_v36  ;;  %v462_v49 = vmul.f32 %v4706_v37, %v4706_v37 }
  0x8f   : > { %593 = vadd.xlane.f32.xlu1 %v592_v41  ;;  %v587_v52 = vadd.f32 %v586_v42, %v456_v20  ;;  %v463_v55 = vmul.f32 %v4710_v44, %v4710_v44  ;;  %v4720_v57 = vunpack.c.l.bf16 %v263_v38  ;;  %v4722_v60 = vunpack.c.h.bf16 %v263_v38 }
  0x90   : > { %v601_v61 = vadd.f32 %v600_v46, %v467_v35  ;;  %v464_v62 = vmul.f32 %v4712_v47, %v4712_v47  ;;  %v595_v63 = vadd.f32 %v462_v49, %v461_v48  ;;  %v4726_v0 = vunpack.c.l.bf16 %v264_v45  ;;  %v268_v35 = vld [vmem:[#allocation3 + $0xb8] sm:$0xff] }
  0x91   : > { %588 = vadd.xlane.f32.xlu0 %v587_v52  ;;  %v4728_v2 = vunpack.c.h.bf16 %v264_v45  ;;  %v473_v13 = vmul.f32 %v4720_v57, %v4720_v57  ;;  %v474_v14 = vmul.f32 %v4722_v60, %v4722_v60  ;;  %v4734_v15 = vunpack.c.l.bf16 %v261_v51  ;;  %v265_v45 = vld [vmem:[#allocation3 + $0xa0] sm:$0xff]  ;;  %v266_v52 = vld [vmem:[#allocation3 + $0xa8] sm:$0xff] }
  0x92   : > { %v602_v18 = vadd.f32 %v601_v61, %v468_v43  ;;  %v596_v19 = vadd.f32 %v595_v63, %v463_v55  ;;  %v475_v20 = vmul.f32 %v4726_v0, %v4726_v0  ;;  %v4738_v23 = vunpack.c.h.bf16 %v261_v51 }
  0x93   : > { %v476_v27 = vmul.f32 %v4728_v2, %v4728_v2  ;;  %v610_v28 = vadd.f32 %v474_v14, %v473_v13  ;;  %v4742_v33 = vunpack.c.l.bf16 %v262_v1  ;;  %v4744_v34 = vunpack.c.h.bf16 %v262_v1 }
  0x94   : > { %603 = vadd.xlane.f32.xlu1 %v602_v18  ;;  %v597_v38 = vadd.f32 %v596_v19, %v464_v62  ;;  %v469_v41 = vmul.f32 %v4734_v15, %v4734_v15  ;;  %v470_v42 = vmul.f32 %v4738_v23, %v4738_v23  ;;  %v4750_v43 = vunpack.c.l.bf16 %v267_v16 }
  0x95   : > { %v611_v46 = vadd.f32 %v610_v28, %v475_v20  ;;  %v471_v48 = vmul.f32 %v4742_v33, %v4742_v33  ;;  %v472_v49 = vmul.f32 %v4744_v34, %v4744_v34  ;;  %v4756_v51 = vunpack.c.h.bf16 %v267_v16  ;;  %v271_v16 = vld [vmem:[#allocation3 + $0xd0] sm:$0xff] }
  0x96   : > { %5768 = vst [vmem:[#allocation14_spill] sm:$0xff] %v4750_v43  ;;  %598 = vadd.xlane.f32.xlu0 %v597_v38  ;;  %v605_v55 = vadd.f32 %v470_v42, %v469_v41  ;;  %v4758_v61 = vunpack.c.l.bf16 %v268_v35  ;;  %v4760_v62 = vunpack.c.h.bf16 %v268_v35  ;;  %v481_v63 = vmul.f32 %v4750_v43, %v4750_v43  ;;  %v272_v38 = vld [vmem:[#allocation3 + $0xd8] sm:$0xff] }
  0x97   : > { %5769 = vst [vmem:[#allocation15_spill] sm:$0xff] %v4756_v51  ;;  %v612_v1 = vadd.f32 %v611_v46, %v476_v27  ;;  %v482_v13 = vmul.f32 %v4756_v51, %v4756_v51  ;;  %v4766_v14 = vunpack.c.l.bf16 %v265_v45  ;;  %v4768_v18 = vunpack.c.h.bf16 %v265_v45  ;;  %v269_v46 = vld [vmem:[#allocation3 + $0xc0] sm:$0xff] }
  0x98   : > { %5770 = vst [vmem:[#allocation16_spill] sm:$0xff] %v4758_v61  ;;  %5771 = vst [vmem:[#allocation17_spill] sm:$0xff] %v4760_v62  ;;  %v606_v19 = vadd.f32 %v605_v55, %v471_v48  ;;  %v483_v20 = vmul.f32 %v4758_v61, %v4758_v61  ;;  %v484_v28 = vmul.f32 %v4760_v62, %v4760_v62  ;;  %v4774_v35 = vunpack.c.l.bf16 %v266_v52 }
  0x99   : > { %5772 = vst [vmem:[#allocation18_spill] sm:$0xff] %v4766_v14  ;;  %5773 = vst [vmem:[#allocation19_spill] sm:$0xff] %v4768_v18  ;;  %613 = vadd.xlane.f32.xlu1 %v612_v1  ;;  %v620_v27 = vadd.f32 %v482_v13, %v481_v63  ;;  %v4776_v41 = vunpack.c.h.bf16 %v266_v52  ;;  %v477_v42 = vmul.f32 %v4766_v14, %v4766_v14  ;;  %v4784_v61 = vunpack.c.l.bf16 %v271_v16  ;;  %v270_v13 = vld [vmem:[#allocation3 + $0xc8] sm:$0xff] }
  0x9a   : > { %5774 = vst [vmem:[#allocation20_spill] sm:$0xff] %v4774_v35  ;;  %v478_v45 = vmul.f32 %v4768_v18, %v4768_v18  ;;  %v607_v48 = vadd.f32 %v606_v19, %v472_v49  ;;  %v479_v55 = vmul.f32 %v4774_v35, %v4774_v35  ;;  %v4786_v62 = vunpack.c.h.bf16 %v271_v16  ;;  %v275_v16 = vld [vmem:[#allocation3 + $0xf0] sm:$0xff]  ;;  %v276_v18 = vld [vmem:[#allocation3 + $0xf8] sm:$0xff] }
  0x9b   : > { %5775 = vst [vmem:[#allocation21_spill] sm:$0xff] %v4776_v41  ;;  %5776 = vst [vmem:[#allocation22_spill] sm:$0xff] %v4784_v61  ;;  %v621_v51 = vadd.f32 %v620_v27, %v483_v20  ;;  %v480_v52 = vmul.f32 %v4776_v41, %v4776_v41  ;;  %v4790_v1 = vunpack.c.l.bf16 %v272_v38  ;;  %v4792_v14 = vunpack.c.h.bf16 %v272_v38 }
  0x9c   : > { %5777 = vst [vmem:[#allocation23_spill] sm:$0xff] %v4786_v62  ;;  %v615_v63 = vadd.f32 %v478_v45, %v477_v42  ;;  %608 = vadd.xlane.f32.xlu0 %v607_v48  ;;  %v489_v49 = vmul.f32 %v4784_v61, %v4784_v61  ;;  %v490_v19 = vmul.f32 %v4786_v62, %v4786_v62  ;;  %v4798_v35 = vunpack.c.l.bf16 %v269_v46 }
  0x9d   : > { %5778 = vst [vmem:[#allocation24_spill] sm:$0xff] %v4790_v1  ;;  %5779 = vst [vmem:[#allocation25_spill] sm:$0xff] %v4792_v14  ;;  %v622_v20 = vadd.f32 %v621_v51, %v484_v28  ;;  %v491_v42 = vmul.f32 %v4790_v1, %v4790_v1  ;;  %v4802_v45 = vunpack.c.h.bf16 %v269_v46  ;;  %v492_v38 = vmul.f32 %v4792_v14, %v4792_v14  ;;  %v273_v46 = vld [vmem:[#allocation3 + $0xe0] sm:$0xff] }
  0x9e   : > { %5780 = vst [vmem:[#allocation26_spill] sm:$0xff] %v4798_v35  ;;  %v616_v27 = vadd.f32 %v615_v63, %v479_v55  ;;  %v630_v48 = vadd.f32 %v490_v19, %v489_v49  ;;  %v4806_v41 = vunpack.c.l.bf16 %v270_v13  ;;  %v4808_v61 = vunpack.c.h.bf16 %v270_v13 }
  0x9f   : > { %5781 = vst [vmem:[#allocation27_spill] sm:$0xff] %v4802_v45  ;;  %623 = vadd.xlane.f32.xlu1 %v622_v20  ;;  %v485_v51 = vmul.f32 %v4798_v35, %v4798_v35  ;;  %v486_v28 = vmul.f32 %v4802_v45, %v4802_v45  ;;  %v4814_v55 = vunpack.c.l.bf16 %v275_v16  ;;  %v4820_v19 = vunpack.c.h.bf16 %v275_v16  ;;  %v274_v20 = vld [vmem:[#allocation3 + $0xe8] sm:$0xff]  ;;  %v279_v16 = vld [vmem:[#allocation3 + $0x110] sm:$0xff] }
  0xa0   : > { %5782 = vst [vmem:[#allocation28_spill] sm:$0xff] %v4806_v41  ;;  %5783 = vst [vmem:[#allocation29_spill] sm:$0xff] %v4808_v61  ;;  %v617_v62 = vadd.f32 %v616_v27, %v480_v52  ;;  %v631_v63 = vadd.f32 %v630_v48, %v491_v42  ;;  %v487_v49 = vmul.f32 %v4806_v41, %v4806_v41  ;;  %v4822_v27 = vunpack.c.l.bf16 %v276_v18 }
  0xa1   : > { %5784 = vst [vmem:[#allocation30_spill] sm:$0xff] %v4814_v55  ;;  %v488_v13 = vmul.f32 %v4808_v61, %v4808_v61  ;;  %5785 = vst [vmem:[#allocation31_spill] sm:$0xff] %v4820_v19  ;;  %v625_v52 = vadd.f32 %v486_v28, %v485_v51  ;;  %v4824_v35 = vunpack.c.h.bf16 %v276_v18  ;;  %v497_v45 = vmul.f32 %v4814_v55, %v4814_v55  ;;  %v280_v28 = vld [vmem:[#allocation3 + $0x118] sm:$0xff] }
  0xa2   : > { %618 = vadd.xlane.f32.xlu0 %v617_v62  ;;  %5786 = vst [vmem:[#allocation32_spill] sm:$0xff] %v4822_v27  ;;  %v632_v14 = vadd.f32 %v631_v63, %v492_v38  ;;  %v498_v42 = vmul.f32 %v4820_v19, %v4820_v19  ;;  %v4830_v48 = vunpack.c.l.bf16 %v273_v46  ;;  %v4832_v41 = vunpack.c.h.bf16 %v273_v46 }
  0xa3   : > { %5787 = vst [vmem:[#allocation33_spill] sm:$0xff] %v4824_v35  ;;  %v626_v61 = vadd.f32 %v625_v52, %v487_v49  ;;  %v499_v62 = vmul.f32 %v4822_v27, %v4822_v27  ;;  %v500_v18 = vmul.f32 %v4824_v35, %v4824_v35  ;;  %v4838_v51 = vunpack.c.l.bf16 %v274_v20  ;;  %v277_v49 = vld [vmem:[#allocation3 + $0x100] sm:$0xff] }
  0xa4   : > { %5788 = vst [vmem:[#allocation34_spill] sm:$0xff] %v4830_v48  ;;  %5789 = vst [vmem:[#allocation35_spill] sm:$0xff] %v4832_v41  ;;  %633 = vadd.xlane.f32.xlu1 %v632_v14  ;;  %v640_v38 = vadd.f32 %v498_v42, %v497_v45  ;;  %v4840_v63 = vunpack.c.h.bf16 %v274_v20  ;;  %v493_v19 = vmul.f32 %v4830_v48, %v4830_v48  ;;  %v4848_v55 = vunpack.c.l.bf16 %v279_v16  ;;  %v278_v42 = vld [vmem:[#allocation3 + $0x108] sm:$0xff] }
  0xa5   : > { %5790 = vst [vmem:[#allocation36_spill] sm:$0xff] %v4838_v51  ;;  %v494_v46 = vmul.f32 %v4832_v41, %v4832_v41  ;;  %v627_v52 = vadd.f32 %v626_v61, %v488_v13  ;;  %v495_v27 = vmul.f32 %v4838_v51, %v4838_v51  ;;  %v4850_v35 = vunpack.c.h.bf16 %v279_v16  ;;  %v283_v16 = vld [vmem:[#allocation3 + $0x130] sm:$0xff]  ;;  %v284_v41 = vld [vmem:[#allocation3 + $0x138] sm:$0xff] }
  0xa6   : > { %5791 = vst [vmem:[#allocation37_spill] sm:$0xff] %v4840_v63  ;;  %5792 = vst [vmem:[#allocation38_spill] sm:$0xff] %v4848_v55  ;;  %v641_v1 = vadd.f32 %v640_v38, %v499_v62  ;;  %v496_v14 = vmul.f32 %v4840_v63, %v4840_v63  ;;  %v4854_v20 = vunpack.c.l.bf16 %v280_v28  ;;  %v4856_v48 = vunpack.c.h.bf16 %v280_v28 }
  0xa7   : > { %5793 = vst [vmem:[#allocation39_spill] sm:$0xff] %v4850_v35  ;;  %v635_v45 = vadd.f32 %v494_v46, %v493_v19  ;;  %628 = vadd.xlane.f32.xlu0 %v627_v52  ;;  %v505_v61 = vmul.f32 %v4848_v55, %v4848_v55  ;;  %v506_v13 = vmul.f32 %v4850_v35, %v4850_v35  ;;  %v4862_v51 = vunpack.c.l.bf16 %v277_v49 }
  0xa8   : > { %5794 = vst [vmem:[#allocation40_spill] sm:$0xff] %v4854_v20  ;;  %5795 = vst [vmem:[#allocation41_spill] sm:$0xff] %v4856_v48  ;;  %v642_v62 = vadd.f32 %v641_v1, %v500_v18  ;;  %v507_v19 = vmul.f32 %v4854_v20, %v4854_v20  ;;  %v4866_v46 = vunpack.c.h.bf16 %v277_v49  ;;  %v508_v28 = vmul.f32 %v4856_v48, %v4856_v48  ;;  %v281_v49 = vld [vmem:[#allocation3 + $0x120] sm:$0xff] }
  0xa9   : > { %5796 = vst [vmem:[#allocation42_spill] sm:$0xff] %v4862_v51  ;;  %v636_v38 = vadd.f32 %v635_v45, %v495_v27  ;;  %v650_v52 = vadd.f32 %v506_v13, %v505_v61  ;;  %v4870_v63 = vunpack.c.l.bf16 %v278_v42  ;;  %v4872_v55 = vunpack.c.h.bf16 %v278_v42 }
  0xaa   : > { %5797 = vst [vmem:[#allocation43_spill] sm:$0xff] %v4866_v46  ;;  %643 = vadd.xlane.f32.xlu1 %v642_v62  ;;  %v501_v1 = vmul.f32 %v4862_v51, %v4862_v51  ;;  %v502_v27 = vmul.f32 %v4866_v46, %v4866_v46  ;;  %v4878_v18 = vunpack.c.l.bf16 %v283_v16  ;;  %v4884_v13 = vunpack.c.h.bf16 %v283_v16  ;;  %v282_v62 = vld [vmem:[#allocation3 + $0x128] sm:$0xff]  ;;  %v287_v16 = vld [vmem:[#allocation3 + $0x150] sm:$0xff] }
  0xab   : > { %5798 = vst [vmem:[#allocation44_spill] sm:$0xff] %v4870_v63  ;;  %5799 = vst [vmem:[#allocation45_spill] sm:$0xff] %v4872_v55  ;;  %v637_v35 = vadd.f32 %v636_v38, %v496_v14  ;;  %v651_v45 = vadd.f32 %v650_v52, %v507_v19  ;;  %v503_v61 = vmul.f32 %v4870_v63, %v4870_v63  ;;  %v4886_v38 = vunpack.c.l.bf16 %v284_v41 }
  0xac   : > { %5800 = vst [vmem:[#allocation46_spill] sm:$0xff] %v4878_v18  ;;  %v504_v42 = vmul.f32 %v4872_v55, %v4872_v55  ;;  %5801 = vst [vmem:[#allocation47_spill] sm:$0xff] %v4884_v13  ;;  %v645_v14 = vadd.f32 %v502_v27, %v501_v1  ;;  %v4888_v51 = vunpack.c.h.bf16 %v284_v41  ;;  %v513_v46 = vmul.f32 %v4878_v18, %v4878_v18  ;;  %v288_v27 = vld [vmem:[#allocation3 + $0x158] sm:$0xff] }
  0xad   : > { %638 = vadd.xlane.f32.xlu0 %v637_v35  ;;  %5802 = vst [vmem:[#allocation48_spill] sm:$0xff] %v4886_v38  ;;  %v652_v48 = vadd.f32 %v651_v45, %v508_v28  ;;  %v514_v19 = vmul.f32 %v4884_v13, %v4884_v13  ;;  %v4894_v52 = vunpack.c.l.bf16 %v281_v49  ;;  %v4896_v63 = vunpack.c.h.bf16 %v281_v49 }
  0xae   : > { %5803 = vst [vmem:[#allocation49_spill] sm:$0xff] %v4888_v51  ;;  %v646_v55 = vadd.f32 %v645_v14, %v503_v61  ;;  %v515_v35 = vmul.f32 %v4886_v38, %v4886_v38  ;;  %v516_v41 = vmul.f32 %v4888_v51, %v4888_v51  ;;  %v4902_v1 = vunpack.c.l.bf16 %v282_v62  ;;  %v285_v61 = vld [vmem:[#allocation3 + $0x140] sm:$0xff] }
  0xaf   : > { %5804 = vst [vmem:[#allocation50_spill] sm:$0xff] %v4894_v52  ;;  %5805 = vst [vmem:[#allocation51_spill] sm:$0xff] %v4896_v63  ;;  %653 = vadd.xlane.f32.xlu1 %v652_v48  ;;  %v660_v28 = vadd.f32 %v514_v19, %v513_v46  ;;  %v4904_v45 = vunpack.c.h.bf16 %v282_v62  ;;  %v509_v13 = vmul.f32 %v4894_v52, %v4894_v52  ;;  %v4912_v18 = vunpack.c.l.bf16 %v287_v16  ;;  %v286_v19 = vld [vmem:[#allocation3 + $0x148] sm:$0xff] }
  0xb0   : > { %5806 = vst [vmem:[#allocation52_spill] sm:$0xff] %v4902_v1  ;;  %v510_v49 = vmul.f32 %v4896_v63, %v4896_v63  ;;  %v647_v14 = vadd.f32 %v646_v55, %v504_v42  ;;  %v511_v38 = vmul.f32 %v4902_v1, %v4902_v1  ;;  %v4914_v51 = vunpack.c.h.bf16 %v287_v16  ;;  %v291_v16 = vld [vmem:[#allocation3 + $0x170] sm:$0xff]  ;;  %v292_v63 = vld [vmem:[#allocation3 + $0x178] sm:$0xff] }
  0xb1   : > { %5807 = vst [vmem:[#allocation53_spill] sm:$0xff] %v4904_v45  ;;  %5808 = vst [vmem:[#allocation54_spill] sm:$0xff] %v4912_v18  ;;  %v661_v20 = vadd.f32 %v660_v28, %v515_v35  ;;  %v512_v48 = vmul.f32 %v4904_v45, %v4904_v45  ;;  %v4918_v62 = vunpack.c.l.bf16 %v288_v27  ;;  %v4920_v52 = vunpack.c.h.bf16 %v288_v27 }
  0xb2   : > { %5809 = vst [vmem:[#allocation55_spill] sm:$0xff] %v4914_v51  ;;  %v655_v46 = vadd.f32 %v510_v49, %v509_v13  ;;  %648 = vadd.xlane.f32.xlu0 %v647_v14  ;;  %v521_v55 = vmul.f32 %v4912_v18, %v4912_v18  ;;  %v522_v42 = vmul.f32 %v4914_v51, %v4914_v51  ;;  %v4926_v1 = vunpack.c.l.bf16 %v285_v61 }
  0xb3   : > { %5810 = vst [vmem:[#allocation56_spill] sm:$0xff] %v4918_v62  ;;  %5811 = vst [vmem:[#allocation57_spill] sm:$0xff] %v4920_v52  ;;  %v662_v35 = vadd.f32 %v661_v20, %v516_v41  ;;  %v523_v13 = vmul.f32 %v4918_v62, %v4918_v62  ;;  %v4930_v49 = vunpack.c.h.bf16 %v285_v61  ;;  %v524_v27 = vmul.f32 %v4920_v52, %v4920_v52  ;;  %v289_v61 = vld [vmem:[#allocation3 + $0x160] sm:$0xff] }
  0xb4   : > { %5812 = vst [vmem:[#allocation58_spill] sm:$0xff] %v4926_v1  ;;  %v656_v28 = vadd.f32 %v655_v46, %v511_v38  ;;  %v670_v14 = vadd.f32 %v522_v42, %v521_v55  ;;  %v4934_v45 = vunpack.c.l.bf16 %v286_v19  ;;  %v4936_v18 = vunpack.c.h.bf16 %v286_v19 }
  0xb5   : > { %5813 = vst [vmem:[#allocation59_spill] sm:$0xff] %v4930_v49  ;;  %663 = vadd.xlane.f32.xlu1 %v662_v35  ;;  %v517_v20 = vmul.f32 %v4926_v1, %v4926_v1  ;;  %v518_v38 = vmul.f32 %v4930_v49, %v4930_v49  ;;  %v4942_v41 = vunpack.c.l.bf16 %v291_v16  ;;  %v4948_v42 = vunpack.c.h.bf16 %v291_v16  ;;  %v290_v35 = vld [vmem:[#allocation3 + $0x168] sm:$0xff]  ;;  %v295_v16 = vld [vmem:[#allocation3 + $0x190] sm:$0xff] }
  0xb6   : > { %5814 = vst [vmem:[#allocation60_spill] sm:$0xff] %v4934_v45  ;;  %5815 = vst [vmem:[#allocation61_spill] sm:$0xff] %v4936_v18  ;;  %v657_v51 = vadd.f32 %v656_v28, %v512_v48  ;;  %v671_v46 = vadd.f32 %v670_v14, %v523_v13  ;;  %v519_v55 = vmul.f32 %v4934_v45, %v4934_v45  ;;  %v4950_v28 = vunpack.c.l.bf16 %v292_v63 }
  0xb7   : > { %5816 = vst [vmem:[#allocation62_spill] sm:$0xff] %v4942_v41  ;;  %v520_v19 = vmul.f32 %v4936_v18, %v4936_v18  ;;  %5817 = vst [vmem:[#allocation63_spill] sm:$0xff] %v4948_v42  ;;  %v665_v48 = vadd.f32 %v518_v38, %v517_v20  ;;  %v4952_v1 = vunpack.c.h.bf16 %v292_v63  ;;  %v529_v49 = vmul.f32 %v4942_v41, %v4942_v41  ;;  %v296_v38 = vld [vmem:[#allocation3 + $0x198] sm:$0xff] }
  0xb8   : > { %658 = vadd.xlane.f32.xlu0 %v657_v51  ;;  %5818 = vst [vmem:[#allocation64_spill] sm:$0xff] %v4950_v28  ;;  %v672_v52 = vadd.f32 %v671_v46, %v524_v27  ;;  %v530_v13 = vmul.f32 %v4948_v42, %v4948_v42  ;;  %v4958_v14 = vunpack.c.l.bf16 %v289_v61  ;;  %v4960_v45 = vunpack.c.h.bf16 %v289_v61 }
  0xb9   : > { %5819 = vst [vmem:[#allocation65_spill] sm:$0xff] %v4952_v1  ;;  %v666_v18 = vadd.f32 %v665_v48, %v519_v55  ;;  %v531_v51 = vmul.f32 %v4950_v28, %v4950_v28  ;;  %v532_v63 = vmul.f32 %v4952_v1, %v4952_v1  ;;  %v4966_v20 = vunpack.c.l.bf16 %v290_v35  ;;  %v293_v55 = vld [vmem:[#allocation3 + $0x180] sm:$0xff] }
  0xba   : > { %5820 = vst [vmem:[#allocation66_spill] sm:$0xff] %v4958_v14  ;;  %5821 = vst [vmem:[#allocation67_spill] sm:$0xff] %v4960_v45  ;;  %673 = vadd.xlane.f32.xlu1 %v672_v52  ;;  %v680_v27 = vadd.f32 %v530_v13, %v529_v49  ;;  %v4968_v46 = vunpack.c.h.bf16 %v290_v35  ;;  %v525_v42 = vmul.f32 %v4958_v14, %v4958_v14  ;;  %v4976_v41 = vunpack.c.l.bf16 %v295_v16  ;;  %v294_v13 = vld [vmem:[#allocation3 + $0x188] sm:$0xff] }
  0xbb   : > { %5822 = vst [vmem:[#allocation68_spill] sm:$0xff] %v4966_v20  ;;  %v526_v61 = vmul.f32 %v4960_v45, %v4960_v45  ;;  %v667_v48 = vadd.f32 %v666_v18, %v520_v19  ;;  %v527_v28 = vmul.f32 %v4966_v20, %v4966_v20  ;;  %v4978_v1 = vunpack.c.h.bf16 %v295_v16  ;;  %v299_v16 = vld [vmem:[#allocation3 + $0x1b0] sm:$0xff]  ;;  %v300_v45 = vld [vmem:[#allocation3 + $0x1b8] sm:$0xff] }
  0xbc   : > { %5823 = vst [vmem:[#allocation69_spill] sm:$0xff] %v4968_v46  ;;  %5824 = vst [vmem:[#allocation70_spill] sm:$0xff] %v4976_v41  ;;  %v681_v62 = vadd.f32 %v680_v27, %v531_v51  ;;  %v528_v52 = vmul.f32 %v4968_v46, %v4968_v46  ;;  %v4982_v35 = vunpack.c.l.bf16 %v296_v38  ;;  %v4984_v14 = vunpack.c.h.bf16 %v296_v38 }
  0xbd   : > { %5825 = vst [vmem:[#allocation71_spill] sm:$0xff] %v4978_v1  ;;  %v675_v49 = vadd.f32 %v526_v61, %v525_v42  ;;  %668 = vadd.xlane.f32.xlu0 %v667_v48  ;;  %v537_v18 = vmul.f32 %v4976_v41, %v4976_v41  ;;  %v538_v19 = vmul.f32 %v4978_v1, %v4978_v1  ;;  %v4990_v20 = vunpack.c.l.bf16 %v293_v55 }
  0xbe   : > { %5826 = vst [vmem:[#allocation72_spill] sm:$0xff] %v4982_v35  ;;  %5827 = vst [vmem:[#allocation73_spill] sm:$0xff] %v4984_v14  ;;  %v682_v51 = vadd.f32 %v681_v62, %v532_v63  ;;  %v539_v42 = vmul.f32 %v4982_v35, %v4982_v35  ;;  %v4994_v61 = vunpack.c.h.bf16 %v293_v55  ;;  %v540_v38 = vmul.f32 %v4984_v14, %v4984_v14  ;;  %v297_v55 = vld [vmem:[#allocation3 + $0x1a0] sm:$0xff] }
  0xbf   : > { %5828 = vst [vmem:[#allocation74_spill] sm:$0xff] %v4990_v20  ;;  %v676_v27 = vadd.f32 %v675_v49, %v527_v28  ;;  %v690_v48 = vadd.f32 %v538_v19, %v537_v18  ;;  %v4998_v46 = vunpack.c.l.bf16 %v294_v13  ;;  %v5000_v41 = vunpack.c.h.bf16 %v294_v13 }
  0xc0   : > { %5829 = vst [vmem:[#allocation75_spill] sm:$0xff] %v4994_v61  ;;  %683 = vadd.xlane.f32.xlu1 %v682_v51  ;;  %v533_v62 = vmul.f32 %v4990_v20, %v4990_v20  ;;  %v534_v28 = vmul.f32 %v4994_v61, %v4994_v61  ;;  %v5006_v63 = vunpack.c.l.bf16 %v299_v16  ;;  %v5012_v19 = vunpack.c.h.bf16 %v299_v16  ;;  %v298_v51 = vld [vmem:[#allocation3 + $0x1a8] sm:$0xff]  ;;  %v303_v16 = vld [vmem:[#allocation3 + $0x1d0] sm:$0xff] }
  0xc1   : > { %5830 = vst [vmem:[#allocation76_spill] sm:$0xff] %v4998_v46  ;;  %5831 = vst [vmem:[#allocation77_spill] sm:$0xff] %v5000_v41  ;;  %v677_v1 = vadd.f32 %v676_v27, %v528_v52  ;;  %v691_v49 = vadd.f32 %v690_v48, %v539_v42  ;;  %v535_v18 = vmul.f32 %v4998_v46, %v4998_v46  ;;  %v5014_v27 = vunpack.c.l.bf16 %v300_v45 }
  0xc2   : > { %5832 = vst [vmem:[#allocation78_spill] sm:$0xff] %v5006_v63  ;;  %v536_v13 = vmul.f32 %v5000_v41, %v5000_v41  ;;  %5833 = vst [vmem:[#allocation79_spill] sm:$0xff] %v5012_v19  ;;  %v685_v52 = vadd.f32 %v534_v28, %v533_v62  ;;  %v5016_v20 = vunpack.c.h.bf16 %v300_v45  ;;  %v545_v61 = vmul.f32 %v5006_v63, %v5006_v63  ;;  %v304_v28 = vld [vmem:[#allocation3 + $0x1d8] sm:$0xff] }
  0xc3   : > { %678 = vadd.xlane.f32.xlu0 %v677_v1  ;;  %5834 = vst [vmem:[#allocation80_spill] sm:$0xff] %v5014_v27  ;;  %v692_v14 = vadd.f32 %v691_v49, %v540_v38  ;;  %v546_v42 = vmul.f32 %v5012_v19, %v5012_v19  ;;  %v5022_v48 = vunpack.c.l.bf16 %v297_v55  ;;  %v5024_v46 = vunpack.c.h.bf16 %v297_v55 }
  0xc4   : > { %5835 = vst [vmem:[#allocation81_spill] sm:$0xff] %v5016_v20  ;;  %v686_v41 = vadd.f32 %v685_v52, %v535_v18  ;;  %v547_v1 = vmul.f32 %v5014_v27, %v5014_v27  ;;  %v548_v45 = vmul.f32 %v5016_v20, %v5016_v20  ;;  %v5030_v62 = vunpack.c.l.bf16 %v298_v51  ;;  %v301_v18 = vld [vmem:[#allocation3 + $0x1c0] sm:$0xff] }
  0xc5   : > { %5836 = vst [vmem:[#allocation82_spill] sm:$0xff] %v5022_v48  ;;  %5837 = vst [vmem:[#allocation83_spill] sm:$0xff] %v5024_v46  ;;  %693 = vadd.xlane.f32.xlu1 %v692_v14  ;;  %v700_v38 = vadd.f32 %v546_v42, %v545_v61  ;;  %v5032_v49 = vunpack.c.h.bf16 %v298_v51  ;;  %v541_v19 = vmul.f32 %v5022_v48, %v5022_v48  ;;  %v5040_v63 = vunpack.c.l.bf16 %v303_v16  ;;  %v302_v42 = vld [vmem:[#allocation3 + $0x1c8] sm:$0xff] }
  0xc6   : > { %5838 = vst [vmem:[#allocation84_spill] sm:$0xff] %v5030_v62  ;;  %v542_v55 = vmul.f32 %v5024_v46, %v5024_v46  ;;  %v687_v52 = vadd.f32 %v686_v41, %v536_v13  ;;  %v543_v27 = vmul.f32 %v5030_v62, %v5030_v62  ;;  %v5042_v20 = vunpack.c.h.bf16 %v303_v16  ;;  %v307_v16 = vld [vmem:[#allocation3 + $0x1f0] sm:$0xff]  ;;  %v308_v46 = vld [vmem:[#allocation3 + $0x1f8] sm:$0xff] }
  0xc7   : > { %5839 = vst [vmem:[#allocation85_spill] sm:$0xff] %v5032_v49  ;;  %5840 = vst [vmem:[#allocation86_spill] sm:$0xff] %v5040_v63  ;;  %v701_v35 = vadd.f32 %v700_v38, %v547_v1  ;;  %v544_v14 = vmul.f32 %v5032_v49, %v5032_v49  ;;  %v5046_v51 = vunpack.c.l.bf16 %v304_v28  ;;  %v5048_v48 = vunpack.c.h.bf16 %v304_v28 }
  0xc8   : > { %5841 = vst [vmem:[#allocation87_spill] sm:$0xff] %v5042_v20  ;;  %v695_v61 = vadd.f32 %v542_v55, %v541_v19  ;;  %688 = vadd.xlane.f32.xlu0 %v687_v52  ;;  %v553_v41 = vmul.f32 %v5040_v63, %v5040_v63  ;;  %v554_v13 = vmul.f32 %v5042_v20, %v5042_v20  ;;  %v5054_v62 = vunpack.c.l.bf16 %v301_v18 }
  0xc9   : > { %5842 = vst [vmem:[#allocation88_spill] sm:$0xff] %v5046_v51  ;;  %5843 = vst [vmem:[#allocation89_spill] sm:$0xff] %v5048_v48  ;;  %v702_v1 = vadd.f32 %v701_v35, %v548_v45  ;;  %v555_v19 = vmul.f32 %v5046_v51, %v5046_v51  ;;  %v5058_v55 = vunpack.c.h.bf16 %v301_v18  ;;  %v556_v28 = vmul.f32 %v5048_v48, %v5048_v48  ;;  %v305_v18 = vld [vmem:[#allocation3 + $0x1e0] sm:$0xff] }
  0xca   : > { %5844 = vst [vmem:[#allocation90_spill] sm:$0xff] %v5054_v62  ;;  %v696_v38 = vadd.f32 %v695_v61, %v543_v27  ;;  %v710_v52 = vadd.f32 %v554_v13, %v553_v41  ;;  %v5062_v49 = vunpack.c.l.bf16 %v302_v42  ;;  %v5064_v63 = vunpack.c.h.bf16 %v302_v42 }
  0xcb   : > { %5845 = vst [vmem:[#allocation91_spill] sm:$0xff] %v5058_v55  ;;  %703 = vadd.xlane.f32.xlu1 %v702_v1  ;;  %v549_v35 = vmul.f32 %v5054_v62, %v5054_v62  ;;  %v550_v27 = vmul.f32 %v5058_v55, %v5058_v55  ;;  %v5070_v45 = vunpack.c.l.bf16 %v307_v16  ;;  %v5076_v13 = vunpack.c.h.bf16 %v307_v16  ;;  %v306_v1 = vld [vmem:[#allocation3 + $0x1e8] sm:$0xff] }
  0xcc   : > { %5846 = vst [vmem:[#allocation92_spill] sm:$0xff] %v5062_v49  ;;  %5847 = vst [vmem:[#allocation93_spill] sm:$0xff] %v5064_v63  ;;  %v697_v20 = vadd.f32 %v696_v38, %v544_v14  ;;  %v711_v61 = vadd.f32 %v710_v52, %v555_v19  ;;  %v551_v41 = vmul.f32 %v5062_v49, %v5062_v49  ;;  %v5078_v38 = vunpack.c.l.bf16 %v308_v46 }
  0xcd   : > { %5848 = vst [vmem:[#allocation94_spill] sm:$0xff] %v5070_v45  ;;  %v552_v42 = vmul.f32 %v5064_v63, %v5064_v63  ;;  %5849 = vst [vmem:[#allocation95_spill] sm:$0xff] %v5076_v13  ;;  %v705_v14 = vadd.f32 %v550_v27, %v549_v35  ;;  %v5080_v62 = vunpack.c.h.bf16 %v308_v46  ;;  %v561_v55 = vmul.f32 %v5070_v45, %v5070_v45 }
  0xce   : > { %698 = vadd.xlane.f32.xlu0 %v697_v20  ;;  %5850 = vst [vmem:[#allocation96_spill] sm:$0xff] %v5078_v38  ;;  %v712_v48 = vadd.f32 %v711_v61, %v556_v28  ;;  %v562_v19 = vmul.f32 %v5076_v13, %v5076_v13  ;;  %v5086_v52 = vunpack.c.l.bf16 %v305_v18  ;;  %v5088_v49 = vunpack.c.h.bf16 %v305_v18 }
  0xcf   : > { %5851 = vst [vmem:[#allocation97_spill] sm:$0xff] %v5080_v62  ;;  %v706_v16 = vadd.f32 %v705_v14, %v551_v41  ;;  %v563_v20 = vmul.f32 %v5078_v38, %v5078_v38  ;;  %v564_v35 = vmul.f32 %v5080_v62, %v5080_v62  ;;  %v5094_v46 = vunpack.c.l.bf16 %v306_v1 }
  0xd0   : > { %5852 = vst [vmem:[#allocation98_spill] sm:$0xff] %v5086_v52  ;;  %5853 = vst [vmem:[#allocation99_spill] sm:$0xff] %v5088_v49  ;;  %713 = vadd.xlane.f32.xlu1 %v712_v48  ;;  %v720_v27 = vadd.f32 %v562_v19, %v561_v55  ;;  %v5096_v45 = vunpack.c.h.bf16 %v306_v1  ;;  %v557_v28 = vmul.f32 %v5086_v52, %v5086_v52  ;;  %v953_v19 = vlaneseq }
  0xd1   : > { %5854 = vst [vmem:[#allocation100_spill] sm:$0xff] %v5094_v46  ;;  %v558_v18 = vmul.f32 %v5088_v49, %v5088_v49  ;;  %v707_v61 = vadd.f32 %v706_v16, %v552_v42  ;;  %v559_v41 = vmul.f32 %v5094_v46, %v5094_v46  ;;  %v950_v42 = vld [vmem:[#allocation6] sm:$0xf] }
  0xd2   : > { %v721_v14 = vadd.f32 %v720_v27, %v563_v20  ;;  %v560_v62 = vmul.f32 %v5096_v45, %v5096_v45  ;;  %v954_v13 = vshrl.u32 %v953_v19, 7  ;;  %v951_v27 = vunpack.c.l.bf16 %v950_v42 }
  0xd3   : > { %v715_v38 = vadd.f32 %v558_v18, %v557_v28  ;;  %708 = vadd.xlane.f32.xlu0 %v707_v61 }
  0xd4   : > { %v722_v48 = vadd.f32 %v721_v14, %v564_v35  ;;  %v955_v43 = vsub.s32 0, %v954_v13  ;;  %v959_v18 = vsub.s32 2, %v954_v13  ;;  %v963_v35 = vsub.s32 4, %v954_v13 }
  0xd5   : > { %v716_v55 = vadd.f32 %v715_v38, %v559_v41  ;;  %v967_v38 = vsub.s32 6, %v954_v13 }
  0xd6   : > { %723 = vadd.xlane.f32.xlu1 %v722_v48  ;;  %v960_v48 = vrot.slane %v951_v27, %v959_v18 }
  0xd7   : > { %v717_v1 = vadd.f32 %v716_v55, %v560_v62  ;;  %v964_v55 = vrot.slane %v951_v27, %v963_v35 }
  0xd9   : > { %718 = vadd.xlane.f32.xlu0 %v717_v1  ;;  %v5110_v13 = vrot.slane %v964_v55, %v955_v43 }
 0x112   : > { %v579_v52 = vpop.xlane.xlu1 %578 }
 0x113   : > { %v728_v63 = vmul.f32 0.001953125, %v579_v52  ;;  %v569_v49 = vpop.xlane.xlu0 %568  ;;  %v956_v52 = vrot.slane %v951_v27, %v955_v43 }
 0x114   : > { %v726_v16 = vmul.f32 0.001953125, %v569_v49  ;;  %v968_v49 = vrot.slane %v951_v27, %v967_v38 }
 0x115   : > { %v760_v51 = vadd.f32 1e-06, %v728_v63 }
 0x116   : > { %v758_v46 = vadd.f32 1e-06, %v726_v16  ;;  %v584_v20 = vpop.xlane.xlu1 %583  ;;  %v5106_v16 = vrot.slane %v956_v52, %v955_v43 }
 0x117   : > { %3914 = vrsqrt.f32 %v760_v51  ;;  %v729_v28 = vmul.f32 0.001953125, %v584_v20  ;;  %v5108_v20 = vrot.slane %v960_v48, %v955_v43 }
 0x118   : > { %3916 = vrsqrt.f32 %v758_v46  ;;  %v574_v62 = vpop.xlane.xlu0 %573  ;;  %v5112_v46 = vrot.slane %v968_v49, %v955_v43 }
 0x119   : > { %v761_v61 = vadd.f32 1e-06, %v729_v28  ;;  %v727_v41 = vmul.f32 0.001953125, %v574_v62 }
 0x11b   : > { %3918 = vrsqrt.f32 %v761_v61  ;;  %v759_v14 = vadd.f32 1e-06, %v727_v41 }
 0x11c   : > { %v594_v63 = vpop.xlane.xlu1 %593 }
 0x11d   : > { %3920 = vrsqrt.f32 %v759_v14  ;;  %v731_v1 = vmul.f32 0.001953125, %v594_v63 }
 0x11e   : > { %v589_v19 = vpop.xlane.xlu0 %588 }
 0x11f   : > { %v763_v42 = vadd.f32 1e-06, %v731_v1  ;;  %v730_v51 = vmul.f32 0.001953125, %v589_v19 }
 0x121   : > { %v3915_v28 = vpop.eup %3914  ;;  %3922 = vrsqrt.f32 %v763_v42  ;;  %v762_v62 = vadd.f32 1e-06, %v730_v51  ;;  %v604_v18 = vpop.xlane.xlu1 %603 }
 0x122   : > { %v3917_v35 = vpop.eup %3916  ;;  %v830_v27 = vmul.f32 %v3915_v28, %v4594_v3  ;;  %v831_v38 = vmul.f32 %v3915_v28, %v4596_v4  ;;  %v832_v61 = vmul.f32 %v3915_v28, %v4598_v5  ;;  %v833_v41 = vmul.f32 %v3915_v28, %v4600_v6 }
 0x123   : > { %v822_v14 = vmul.f32 %v3917_v35, %v4602_v8  ;;  %v823_v52 = vmul.f32 %v3917_v35, %v4604_v9  ;;  %v824_v43 = vmul.f32 %v3917_v35, %v4606_v10  ;;  %v825_v48 = vmul.f32 %v3917_v35, %v4608_v11  ;;  %v599_v55 = vpop.xlane.xlu0 %598 }
 0x124   : > { %v997_v49 = vmul.f32 %v5106_v16, %v830_v27  ;;  %v998_v63 = vmul.f32 %v5108_v20, %v831_v38  ;;  %v999_v3 = vmul.f32 %v5110_v13, %v832_v61  ;;  %v1000_v4 = vmul.f32 %v5112_v46, %v833_v41 }
 0x125   : > { %v3919_v5 = vpop.eup %3918  ;;  %v989_v6 = vmul.f32 %v5106_v16, %v822_v14  ;;  %v990_v8 = vmul.f32 %v5108_v20, %v823_v52  ;;  %v991_v9 = vmul.f32 %v5110_v13, %v824_v43  ;;  %v992_v10 = vmul.f32 %v5112_v46, %v825_v48 }
 0x126   : > { %v834_v11 = vmul.f32 %v3919_v5, %v4626_v24  ;;  %v835_v1 = vmul.f32 %v3919_v5, %v4628_v25  ;;  %v836_v19 = vmul.f32 %v3919_v5, %v4630_v26  ;;  %v837_v42 = vmul.f32 %v3919_v5, %v4632_v29  ;;  %v614_v51 = vpop.xlane.xlu1 %613 }
 0x127   : > { %v3921_v28 = vpop.eup %3920  ;;  %3924 = vrsqrt.f32 %v762_v62  ;;  %v733_v35 = vmul.f32 0.001953125, %v604_v18  ;;  %v732_v27 = vmul.f32 0.001953125, %v599_v55  ;;  %v735_v38 = vmul.f32 0.001953125, %v614_v51 }
 0x128   : > { %v1001_v61 = vmul.f32 %v5106_v16, %v834_v11  ;;  %v1002_v41 = vmul.f32 %v5108_v20, %v835_v1  ;;  %v1003_v14 = vmul.f32 %v5110_v13, %v836_v19  ;;  %v1004_v24 = vmul.f32 %v5112_v46, %v837_v42 }
 0x129   : > { %v826_v25 = vmul.f32 %v3921_v28, %v4634_v30  ;;  %v827_v26 = vmul.f32 %v3921_v28, %v4636_v31  ;;  %v828_v29 = vmul.f32 %v3921_v28, %v4646_v39  ;;  %v829_v52 = vmul.f32 %v3921_v28, %v4648_v40  ;;  %v609_v62 = vpop.xlane.xlu0 %608 }
 0x12a   : > { %v1121_v18 = vpack.c.bf16 %v1001_v61, %v997_v49  ;;  %v1122_v43 = vpack.c.bf16 %v1002_v41, %v998_v63  ;;  %v1123_v48 = vpack.c.bf16 %v1003_v14, %v999_v3  ;;  %v1124_v55 = vpack.c.bf16 %v1004_v24, %v1000_v4 }
 0x12b   : > { %v3923_v5 = vpop.eup %3922  ;;  %v993_v11 = vmul.f32 %v5106_v16, %v826_v25  ;;  %v994_v1 = vmul.f32 %v5108_v20, %v827_v26  ;;  %v995_v19 = vmul.f32 %v5110_v13, %v828_v29  ;;  %v996_v30 = vmul.f32 %v5112_v46, %v829_v52 }
 0x12c   : > { %1185 = vst [vmem:[#allocation2 + $0x20] sm:$0xff] %v1121_v18  ;;  %1186 = vst [vmem:[#allocation2 + $0x28] sm:$0xff] %v1122_v43  ;;  %v842_v31 = vmul.f32 %v3923_v5, %v4658_v50  ;;  %v843_v39 = vmul.f32 %v3923_v5, %v4660_v53  ;;  %v844_v40 = vmul.f32 %v3923_v5, %v4662_v54  ;;  %v624_v63 = vpop.xlane.xlu1 %623  ;;  %v765_v41 = vadd.f32 1e-06, %v733_v35 }
 0x12d   : > { %1187 = vst [vmem:[#allocation2 + $0x30] sm:$0xff] %v1123_v48  ;;  %1188 = vst [vmem:[#allocation2 + $0x38] sm:$0xff] %v1124_v55  ;;  %v845_v49 = vmul.f32 %v3923_v5, %v4664_v56  ;;  %v1117_v3 = vpack.c.bf16 %v993_v11, %v989_v6  ;;  %v1118_v4 = vpack.c.bf16 %v994_v1, %v990_v8  ;;  %v764_v50 = vadd.f32 1e-06, %v732_v27 }
 0x12e   : > { %v1119_v42 = vpack.c.bf16 %v995_v19, %v991_v9  ;;  %v1120_v51 = vpack.c.bf16 %v996_v30, %v992_v10  ;;  %v1009_v61 = vmul.f32 %v5106_v16, %v842_v31  ;;  %v1010_v53 = vmul.f32 %v5108_v20, %v843_v39 }
 0x12f   : > { %v619_v28 = vpop.xlane.xlu0 %618  ;;  %1181 = vst [vmem:[#allocation2] sm:$0xff] %v1117_v3  ;;  %1182 = vst [vmem:[#allocation2 + $0x8] sm:$0xff] %v1118_v4  ;;  %v1011_v54 = vmul.f32 %v5110_v13, %v844_v40  ;;  %v734_v14 = vmul.f32 0.001953125, %v609_v62  ;;  %v737_v56 = vmul.f32 0.001953125, %v624_v63  ;;  %v1012_v6 = vmul.f32 %v5112_v46, %v845_v49 }
 0x130   : > { %1183 = vst [vmem:[#allocation2 + $0x10] sm:$0xff] %v1119_v42  ;;  %1184 = vst [vmem:[#allocation2 + $0x18] sm:$0xff] %v1120_v51  ;;  %3926 = vrsqrt.f32 %v765_v41  ;;  %v767_v8 = vadd.f32 1e-06, %v735_v38  ;;  %v736_v9 = vmul.f32 0.001953125, %v619_v28 }
 0x131   : > { %v3925_v24 = vpop.eup %3924  ;;  %v634_v10 = vpop.xlane.xlu1 %633  ;;  %3928 = vrsqrt.f32 %v764_v50  ;;  %v766_v29 = vadd.f32 1e-06, %v734_v14  ;;  %v769_v52 = vadd.f32 1e-06, %v737_v56 }
 0x132   : > { %v838_v25 = vmul.f32 %v3925_v24, %v4668_v58  ;;  %v839_v26 = vmul.f32 %v3925_v24, %v4670_v59  ;;  %v840_v35 = vmul.f32 %v3925_v24, %v4678_v7  ;;  %v841_v27 = vmul.f32 %v3925_v24, %v4680_v12 }
 0x133   : > { %3930 = vrsqrt.f32 %v767_v8  ;;  %v768_v58 = vadd.f32 1e-06, %v736_v9  ;;  %v739_v55 = vmul.f32 0.001953125, %v634_v10 }
 0x134   : > { %v1005_v62 = vmul.f32 %v5106_v16, %v838_v25  ;;  %v1006_v18 = vmul.f32 %v5108_v20, %v839_v26  ;;  %v1007_v43 = vmul.f32 %v5110_v13, %v840_v35  ;;  %v1008_v38 = vmul.f32 %v5112_v46, %v841_v27  ;;  %v629_v48 = vpop.xlane.xlu0 %628 }
 0x135   : > { %v738_v59 = vmul.f32 0.001953125, %v629_v48  ;;  %3932 = vrsqrt.f32 %v766_v29  ;;  %v771_v1 = vadd.f32 1e-06, %v739_v55 }
 0x136   : > { %v1125_v5 = vpack.c.bf16 %v1009_v61, %v1005_v62  ;;  %v1126_v7 = vpack.c.bf16 %v1010_v53, %v1006_v18  ;;  %v1127_v11 = vpack.c.bf16 %v1011_v54, %v1007_v43  ;;  %v1128_v12 = vpack.c.bf16 %v1012_v6, %v1008_v38 }
 0x137   : > { %v770_v19 = vadd.f32 1e-06, %v738_v59  ;;  %v644_v30 = vpop.xlane.xlu1 %643  ;;  %3934 = vrsqrt.f32 %v769_v52 }
 0x138   : > { %1189 = vst [vmem:[#allocation2 + $0x40] sm:$0xff] %v1125_v5  ;;  %1190 = vst [vmem:[#allocation2 + $0x48] sm:$0xff] %v1126_v7  ;;  %v741_v31 = vmul.f32 0.001953125, %v644_v30  ;;  %3936 = vrsqrt.f32 %v768_v58  ;;  %v5855_v5 = vld [vmem:[#allocation14_spill] sm:$0xff] }
 0x139   : > { %1191 = vst [vmem:[#allocation2 + $0x50] sm:$0xff] %v1127_v11  ;;  %1192 = vst [vmem:[#allocation2 + $0x58] sm:$0xff] %v1128_v12  ;;  %3938 = vrsqrt.f32 %v771_v1  ;;  %v5856_v11 = vld [vmem:[#allocation15_spill] sm:$0xff]  ;;  %v5857_v1 = vld [vmem:[#allocation16_spill] sm:$0xff] }
 0x13a   : > { %v639_v39 = vpop.xlane.xlu0 %638  ;;  %v773_v40 = vadd.f32 1e-06, %v741_v31  ;;  %v3927_v49 = vpop.eup %3926  ;;  %3940 = vrsqrt.f32 %v770_v19 }
 0x13b   : > { %v850_v63 = vmul.f32 %v3927_v49, %v4686_v17  ;;  %v851_v3 = vmul.f32 %v3927_v49, %v4692_v21  ;;  %v852_v4 = vmul.f32 %v3927_v49, %v4694_v22  ;;  %v853_v42 = vmul.f32 %v3927_v49, %v4696_v32  ;;  %v3929_v28 = vpop.eup %3928 }
 0x13c   : > { %v5166_v51 = vpop.xlane.xlu1 %653  ;;  %3942 = vrsqrt.f32 %v773_v40  ;;  %v5168_v61 = vmul.f32 0.001953125, %v639_v39  ;;  %v846_v21 = vmul.f32 %v3929_v28, %v4704_v36  ;;  %v847_v22 = vmul.f32 %v3929_v28, %v4706_v37 }
 0x13d   : > { %v1017_v41 = vmul.f32 %v5106_v16, %v850_v63  ;;  %v1018_v50 = vmul.f32 %v5108_v20, %v851_v3  ;;  %v1019_v53 = vmul.f32 %v5110_v13, %v852_v4  ;;  %v1020_v17 = vmul.f32 %v5112_v46, %v853_v42  ;;  %v3931_v54 = vpop.eup %3930 }
 0x13e   : > { %v848_v32 = vmul.f32 %v3929_v28, %v4710_v44  ;;  %v849_v14 = vmul.f32 %v3929_v28, %v4712_v47  ;;  %v858_v24 = vmul.f32 %v3931_v54, %v4720_v57  ;;  %v859_v6 = vmul.f32 %v3931_v54, %v4722_v60 }
 0x13f   : > { %v5178_v56 = vpop.xlane.xlu0 %648  ;;  %v860_v8 = vmul.f32 %v3931_v54, %v4726_v0  ;;  %v861_v9 = vmul.f32 %v3931_v54, %v4728_v2  ;;  %v3933_v10 = vpop.eup %3932  ;;  %v1013_v25 = vmul.f32 %v5106_v16, %v846_v21  ;;  %v1014_v36 = vmul.f32 %v5108_v20, %v847_v22  ;;  %v5860_v54 = vld [vmem:[#allocation19_spill] sm:$0xff]  ;;  %v5861_v22 = vld [vmem:[#allocation20_spill] sm:$0xff] }
 0x140   : > { %v1015_v37 = vmul.f32 %v5110_v13, %v848_v32  ;;  %v1016_v44 = vmul.f32 %v5112_v46, %v849_v14  ;;  %v1025_v26 = vmul.f32 %v5106_v16, %v858_v24  ;;  %v1026_v57 = vmul.f32 %v5108_v20, %v859_v6  ;;  %v5862_v14 = vld [vmem:[#allocation21_spill] sm:$0xff]  ;;  %v5863_v6 = vld [vmem:[#allocation22_spill] sm:$0xff] }
 0x141   : > { %v3935_v47 = vpop.eup %3934  ;;  %v1027_v60 = vmul.f32 %v5110_v13, %v860_v8  ;;  %v1028_v0 = vmul.f32 %v5112_v46, %v861_v9  ;;  %v1129_v27 = vpack.c.bf16 %v1017_v41, %v1013_v25  ;;  %v1130_v29 = vpack.c.bf16 %v1018_v50, %v1014_v36  ;;  %v5864_v9 = vld [vmem:[#allocation23_spill] sm:$0xff]  ;;  %v5865_v25 = vld [vmem:[#allocation24_spill] sm:$0xff] }
 0x142   : > { %v5192_v35 = vpop.xlane.xlu1 %663  ;;  %v3937_v2 = vpop.eup %3936  ;;  %v1131_v52 = vpack.c.bf16 %v1019_v53, %v1015_v37  ;;  %v1132_v62 = vpack.c.bf16 %v1020_v17, %v1016_v44  ;;  %v854_v43 = vmul.f32 %v3933_v10, %v4734_v15  ;;  %v855_v38 = vmul.f32 %v3933_v10, %v4738_v23  ;;  %v5858_v15 = vld [vmem:[#allocation17_spill] sm:$0xff]  ;;  %v5859_v53 = vld [vmem:[#allocation18_spill] sm:$0xff] }
 0x143   : > { %v3939_v18 = vpop.eup %3938  ;;  %v856_v48 = vmul.f32 %v3933_v10, %v4742_v33  ;;  %v857_v58 = vmul.f32 %v3933_v10, %v4744_v34  ;;  %1193 = vst [vmem:[#allocation2 + $0x60] sm:$0xff] %v1129_v27  ;;  %1194 = vst [vmem:[#allocation2 + $0x68] sm:$0xff] %v1130_v29  ;;  %v866_v7 = vmul.f32 %v3935_v47, %v5855_v5  ;;  %v5866_v37 = vld [vmem:[#allocation25_spill] sm:$0xff]  ;;  %v5868_v5 = vld [vmem:[#allocation27_spill] sm:$0xff] }
 0x144   : > { %v3941_v59 = vpop.eup %3940  ;;  %1195 = vst [vmem:[#allocation2 + $0x70] sm:$0xff] %v1131_v52  ;;  %1196 = vst [vmem:[#allocation2 + $0x78] sm:$0xff] %v1132_v62  ;;  %v867_v12 = vmul.f32 %v3935_v47, %v5856_v11  ;;  %v868_v19 = vmul.f32 %v3935_v47, %v5857_v1  ;;  %v869_v30 = vmul.f32 %v3935_v47, %v5858_v15  ;;  %v5869_v11 = vld [vmem:[#allocation28_spill] sm:$0xff]  ;;  %v5870_v1 = vld [vmem:[#allocation29_spill] sm:$0xff] }
 0x145   : > { %v5198_v55 = vpop.xlane.xlu0 %658  ;;  %v1021_v23 = vmul.f32 %v5106_v16, %v854_v43  ;;  %v1022_v33 = vmul.f32 %v5108_v20, %v855_v38  ;;  %v1023_v34 = vmul.f32 %v5110_v13, %v856_v48  ;;  %v1024_v31 = vmul.f32 %v5112_v46, %v857_v58  ;;  %v5867_v48 = vld [vmem:[#allocation26_spill] sm:$0xff] }
 0x146   : > { %v5208_v39 = vpop.eup %3942  ;;  %v1033_v40 = vmul.f32 %v5106_v16, %v866_v7  ;;  %v1034_v49 = vmul.f32 %v5108_v20, %v867_v12  ;;  %v1035_v63 = vmul.f32 %v5110_v13, %v868_v19  ;;  %v1036_v3 = vmul.f32 %v5112_v46, %v869_v30 }
 0x147   : > { %v1133_v4 = vpack.c.bf16 %v1025_v26, %v1021_v23  ;;  %v1134_v42 = vpack.c.bf16 %v1026_v57, %v1022_v33  ;;  %v1135_v28 = vpack.c.bf16 %v1027_v60, %v1023_v34  ;;  %v1136_v41 = vpack.c.bf16 %v1028_v0, %v1024_v31  ;;  %v674_v50 = vpop.xlane.xlu1 %673 }
 0x148   : > { %v862_v17 = vmul.f32 %v3937_v2, %v5859_v53  ;;  %v863_v21 = vmul.f32 %v3937_v2, %v5860_v54  ;;  %v864_v32 = vmul.f32 %v3937_v2, %v5861_v22  ;;  %v865_v24 = vmul.f32 %v3937_v2, %v5862_v14 }
 0x149   : > { %1197 = vst [vmem:[#allocation2 + $0x80] sm:$0xff] %v1133_v4  ;;  %1198 = vst [vmem:[#allocation2 + $0x88] sm:$0xff] %v1134_v42  ;;  %v874_v8 = vmul.f32 %v3939_v18, %v5863_v6  ;;  %v875_v10 = vmul.f32 %v3939_v18, %v5864_v9  ;;  %v876_v36 = vmul.f32 %v3939_v18, %v5865_v25  ;;  %v772_v30 = vadd.f32 1e-06, %v5168_v61  ;;  %v5873_v25 = vld [vmem:[#allocation32_spill] sm:$0xff] }
 0x14a   : > { %1199 = vst [vmem:[#allocation2 + $0x90] sm:$0xff] %v1135_v28  ;;  %1200 = vst [vmem:[#allocation2 + $0x98] sm:$0xff] %v1136_v41  ;;  %v877_v44 = vmul.f32 %v3939_v18, %v5866_v37  ;;  %v669_v47 = vpop.xlane.xlu0 %668  ;;  %v1029_v26 = vmul.f32 %v5106_v16, %v862_v17  ;;  %v1030_v57 = vmul.f32 %v5108_v20, %v863_v21  ;;  %v743_v23 = vmul.f32 0.001953125, %v5166_v51  ;;  %v5874_v37 = vld [vmem:[#allocation33_spill] sm:$0xff] }
 0x14b   : > { %v1031_v60 = vmul.f32 %v5110_v13, %v864_v32  ;;  %v1032_v0 = vmul.f32 %v5112_v46, %v865_v24  ;;  %v1041_v2 = vmul.f32 %v5106_v16, %v874_v8  ;;  %v1042_v27 = vmul.f32 %v5108_v20, %v875_v10  ;;  %v5871_v8 = vld [vmem:[#allocation30_spill] sm:$0xff]  ;;  %v5872_v10 = vld [vmem:[#allocation31_spill] sm:$0xff] }
 0x14c   : > { %v1043_v29 = vmul.f32 %v5110_v13, %v876_v36  ;;  %v1044_v52 = vmul.f32 %v5112_v46, %v877_v44  ;;  %v1137_v62 = vpack.c.bf16 %v1033_v40, %v1029_v26  ;;  %v1138_v43 = vpack.c.bf16 %v1034_v49, %v1030_v57 }
 0x14d   : > { %v1139_v18 = vpack.c.bf16 %v1035_v63, %v1031_v60  ;;  %v1140_v38 = vpack.c.bf16 %v1036_v3, %v1032_v0  ;;  %v870_v58 = vmul.f32 %v3941_v59, %v5867_v48  ;;  %v871_v7 = vmul.f32 %v3941_v59, %v5868_v5  ;;  %v684_v15 = vpop.xlane.xlu1 %683 }
 0x14e   : > { %v872_v12 = vmul.f32 %v3941_v59, %v5869_v11  ;;  %v873_v19 = vmul.f32 %v3941_v59, %v5870_v1  ;;  %1201 = vst [vmem:[#allocation2 + $0xa0] sm:$0xff] %v1137_v62  ;;  %1202 = vst [vmem:[#allocation2 + $0xa8] sm:$0xff] %v1138_v43  ;;  %3944 = vrsqrt.f32 %v772_v30  ;;  %v775_v42 = vadd.f32 1e-06, %v743_v23  ;;  %v5875_v62 = vld [vmem:[#allocation34_spill] sm:$0xff]  ;;  %v5876_v43 = vld [vmem:[#allocation35_spill] sm:$0xff] }
 0x14f   : > { %1203 = vst [vmem:[#allocation2 + $0xb0] sm:$0xff] %v1139_v18  ;;  %1204 = vst [vmem:[#allocation2 + $0xb8] sm:$0xff] %v1140_v38  ;;  %v1037_v33 = vmul.f32 %v5106_v16, %v870_v58  ;;  %v1038_v34 = vmul.f32 %v5108_v20, %v871_v7  ;;  %v742_v28 = vmul.f32 0.001953125, %v5178_v56  ;;  %v745_v61 = vmul.f32 0.001953125, %v5192_v35  ;;  %v5877_v38 = vld [vmem:[#allocation36_spill] sm:$0xff]  ;;  %v5878_v58 = vld [vmem:[#allocation37_spill] sm:$0xff] }
 0x150   : > { %v1039_v31 = vmul.f32 %v5110_v13, %v872_v12  ;;  %v1040_v40 = vmul.f32 %v5112_v46, %v873_v19  ;;  %v679_v49 = vpop.xlane.xlu0 %678  ;;  %v744_v51 = vmul.f32 0.001953125, %v5198_v55  ;;  %v747_v41 = vmul.f32 0.001953125, %v674_v50 }
 0x151   : > { %v1141_v63 = vpack.c.bf16 %v1041_v2, %v1037_v33  ;;  %v1142_v59 = vpack.c.bf16 %v1042_v27, %v1038_v34  ;;  %v746_v53 = vmul.f32 0.001953125, %v669_v47  ;;  %v749_v17 = vmul.f32 0.001953125, %v684_v15  ;;  %v5879_v34 = vld [vmem:[#allocation38_spill] sm:$0xff] }
 0x152   : > { %v1143_v3 = vpack.c.bf16 %v1043_v29, %v1039_v31  ;;  %v1144_v4 = vpack.c.bf16 %v1044_v52, %v1040_v40  ;;  %v694_v54 = vpop.xlane.xlu1 %693  ;;  %3946 = vrsqrt.f32 %v775_v42  ;;  %v774_v21 = vadd.f32 1e-06, %v742_v28  ;;  %v5880_v40 = vld [vmem:[#allocation39_spill] sm:$0xff] }
 0x153   : > { %1205 = vst [vmem:[#allocation2 + $0xc0] sm:$0xff] %v1141_v63  ;;  %1206 = vst [vmem:[#allocation2 + $0xc8] sm:$0xff] %v1142_v59  ;;  %v777_v22 = vadd.f32 1e-06, %v745_v61  ;;  %v748_v32 = vmul.f32 0.001953125, %v679_v49  ;;  %v751_v35 = vmul.f32 0.001953125, %v694_v54  ;;  %v882_v9 = vmul.f32 %v5208_v39, %v5871_v8 }
 0x154   : > { %1207 = vst [vmem:[#allocation2 + $0xd0] sm:$0xff] %v1143_v3  ;;  %1208 = vst [vmem:[#allocation2 + $0xd8] sm:$0xff] %v1144_v4  ;;  %v776_v14 = vadd.f32 1e-06, %v744_v51  ;;  %v779_v24 = vadd.f32 1e-06, %v747_v41  ;;  %3948 = vrsqrt.f32 %v774_v21  ;;  %v883_v55 = vmul.f32 %v5208_v39, %v5872_v10 }
 0x155   : > { %v689_v6 = vpop.xlane.xlu0 %688  ;;  %v778_v56 = vadd.f32 1e-06, %v746_v53  ;;  %3950 = vrsqrt.f32 %v777_v22  ;;  %v781_v50 = vadd.f32 1e-06, %v749_v17  ;;  %v884_v36 = vmul.f32 %v5208_v39, %v5873_v25  ;;  %v5881_v63 = vld [vmem:[#allocation40_spill] sm:$0xff]  ;;  %v5882_v3 = vld [vmem:[#allocation41_spill] sm:$0xff] }
 0x156   : > { %v885_v44 = vmul.f32 %v5208_v39, %v5874_v37  ;;  %3952 = vrsqrt.f32 %v776_v14  ;;  %v780_v47 = vadd.f32 1e-06, %v748_v32  ;;  %v783_v26 = vadd.f32 1e-06, %v751_v35  ;;  %v5883_v14 = vld [vmem:[#allocation42_spill] sm:$0xff]  ;;  %v5885_v35 = vld [vmem:[#allocation44_spill] sm:$0xff] }
 0x157   : > { %3954 = vrsqrt.f32 %v779_v24  ;;  %v1049_v57 = vmul.f32 %v5106_v16, %v882_v9  ;;  %v1050_v27 = vmul.f32 %v5108_v20, %v883_v55  ;;  %v1051_v29 = vmul.f32 %v5110_v13, %v884_v36  ;;  %v5886_v9 = vld [vmem:[#allocation45_spill] sm:$0xff]  ;;  %v5888_v36 = vld [vmem:[#allocation47_spill] sm:$0xff] }
 0x158   : > { %3956 = vrsqrt.f32 %v778_v56  ;;  %v704_v60 = vpop.xlane.xlu1 %703  ;;  %v3945_v2 = vpop.eup %3944  ;;  %v1052_v52 = vmul.f32 %v5112_v46, %v885_v44  ;;  %v5259_v11 = vmul.f32 0.001953125, %v689_v6  ;;  %v5884_v6 = vld [vmem:[#allocation43_spill] sm:$0xff]  ;;  %v5889_v44 = vld [vmem:[#allocation48_spill] sm:$0xff] }
 0x159   : > { %3958 = vrsqrt.f32 %v781_v50  ;;  %v878_v39 = vmul.f32 %v3945_v2, %v5875_v62  ;;  %v879_v18 = vmul.f32 %v3945_v2, %v5876_v43  ;;  %v880_v48 = vmul.f32 %v3945_v2, %v5877_v38  ;;  %v5887_v50 = vld [vmem:[#allocation46_spill] sm:$0xff] }
 0x15a   : > { %3960 = vrsqrt.f32 %v780_v47  ;;  %v881_v5 = vmul.f32 %v3945_v2, %v5878_v58  ;;  %v5261_v12 = vmul.f32 0.001953125, %v704_v60 }
 0x15b   : > { %v699_v0 = vpop.xlane.xlu0 %698  ;;  %3962 = vrsqrt.f32 %v783_v26  ;;  %v1045_v19 = vmul.f32 %v5106_v16, %v878_v39  ;;  %v1046_v15 = vmul.f32 %v5108_v20, %v879_v18  ;;  %v1047_v30 = vmul.f32 %v5110_v13, %v880_v48  ;;  %v5890_v26 = vld [vmem:[#allocation49_spill] sm:$0xff] }
 0x15c   : > { %v3947_v7 = vpop.eup %3946  ;;  %v5263_v1 = vmul.f32 0.001953125, %v699_v0  ;;  %v1048_v23 = vmul.f32 %v5112_v46, %v881_v5 }
 0x15d   : > { %v890_v31 = vmul.f32 %v3947_v7, %v5879_v34  ;;  %v891_v49 = vmul.f32 %v3947_v7, %v5880_v40  ;;  %v892_v59 = vmul.f32 %v3947_v7, %v5881_v63  ;;  %v893_v4 = vmul.f32 %v3947_v7, %v5882_v3 }
 0x15e   : > { %v3949_v33 = vpop.eup %3948  ;;  %v1145_v28 = vpack.c.bf16 %v1049_v57, %v1045_v19  ;;  %v1146_v61 = vpack.c.bf16 %v1050_v27, %v1046_v15  ;;  %v1147_v51 = vpack.c.bf16 %v1051_v29, %v1047_v30  ;;  %v1148_v41 = vpack.c.bf16 %v1052_v52, %v1048_v23  ;;  %v5891_v19 = vld [vmem:[#allocation50_spill] sm:$0xff]  ;;  %v5892_v30 = vld [vmem:[#allocation51_spill] sm:$0xff] }
 0x15f   : > { %v3951_v42 = vpop.eup %3950  ;;  %v1057_v17 = vmul.f32 %v5106_v16, %v890_v31  ;;  %v1058_v54 = vmul.f32 %v5108_v20, %v891_v49  ;;  %v1059_v21 = vmul.f32 %v5110_v13, %v892_v59  ;;  %v1060_v22 = vmul.f32 %v5112_v46, %v893_v4  ;;  %v5894_v31 = vld [vmem:[#allocation53_spill] sm:$0xff]  ;;  %v5895_v49 = vld [vmem:[#allocation54_spill] sm:$0xff]  ;;  %v5896_v59 = vld [vmem:[#allocation55_spill] sm:$0xff] }
 0x160   : > { %v3953_v53 = vpop.eup %3952  ;;  %1209 = vst [vmem:[#allocation2 + $0xe0] sm:$0xff] %v1145_v28  ;;  %1210 = vst [vmem:[#allocation2 + $0xe8] sm:$0xff] %v1146_v61  ;;  %v886_v24 = vmul.f32 %v3949_v33, %v5883_v14  ;;  %v887_v56 = vmul.f32 %v3949_v33, %v5884_v6  ;;  %v888_v8 = vmul.f32 %v3949_v33, %v5885_v35  ;;  %v5897_v4 = vld [vmem:[#allocation56_spill] sm:$0xff]  ;;  %v5898_v28 = vld [vmem:[#allocation57_spill] sm:$0xff] }
 0x161   : > { %v3955_v32 = vpop.eup %3954  ;;  %1211 = vst [vmem:[#allocation2 + $0xf0] sm:$0xff] %v1147_v51  ;;  %1212 = vst [vmem:[#allocation2 + $0xf8] sm:$0xff] %v1148_v41  ;;  %v889_v10 = vmul.f32 %v3949_v33, %v5886_v9  ;;  %v898_v25 = vmul.f32 %v3951_v42, %v5887_v50  ;;  %v899_v37 = vmul.f32 %v3951_v42, %v5888_v36  ;;  %v5893_v33 = vld [vmem:[#allocation52_spill] sm:$0xff]  ;;  %v5899_v35 = vld [vmem:[#allocation58_spill] sm:$0xff] }
 0x162   : > { %v3957_v55 = vpop.eup %3956  ;;  %v900_v47 = vmul.f32 %v3951_v42, %v5889_v44  ;;  %v901_v57 = vmul.f32 %v3951_v42, %v5890_v26  ;;  %v1053_v0 = vmul.f32 %v5106_v16, %v886_v24  ;;  %v1054_v2 = vmul.f32 %v5108_v20, %v887_v56  ;;  %v5900_v9 = vld [vmem:[#allocation59_spill] sm:$0xff]  ;;  %v5901_v50 = vld [vmem:[#allocation60_spill] sm:$0xff]  ;;  %v5902_v36 = vld [vmem:[#allocation61_spill] sm:$0xff] }
 0x163   : > { %v3959_v60 = vpop.eup %3958  ;;  %v1055_v27 = vmul.f32 %v5110_v13, %v888_v8  ;;  %v1056_v29 = vmul.f32 %v5112_v46, %v889_v10  ;;  %v1065_v62 = vmul.f32 %v5106_v16, %v898_v25  ;;  %v1066_v39 = vmul.f32 %v5108_v20, %v899_v37  ;;  %v5903_v44 = vld [vmem:[#allocation62_spill] sm:$0xff]  ;;  %v5904_v26 = vld [vmem:[#allocation63_spill] sm:$0xff] }
 0x164   : > { %v5289_v52 = vpop.eup %3960  ;;  %v1067_v43 = vmul.f32 %v5110_v13, %v900_v47  ;;  %v1068_v18 = vmul.f32 %v5112_v46, %v901_v57  ;;  %v1149_v38 = vpack.c.bf16 %v1057_v17, %v1053_v0  ;;  %v1150_v48 = vpack.c.bf16 %v1058_v54, %v1054_v2  ;;  %v5905_v0 = vld [vmem:[#allocation64_spill] sm:$0xff] }
 0x165   : > { %v1151_v58 = vpack.c.bf16 %v1059_v21, %v1055_v27  ;;  %v1152_v5 = vpack.c.bf16 %v1060_v22, %v1056_v29  ;;  %v5295_v7 = vpop.eup %3962  ;;  %v894_v15 = vmul.f32 %v3953_v53, %v5891_v19  ;;  %v895_v23 = vmul.f32 %v3953_v53, %v5892_v30  ;;  %v5906_v27 = vld [vmem:[#allocation65_spill] sm:$0xff]  ;;  %v709_v19 = vpop.xlane.xlu0 %708 }
 0x166   : > { %v896_v34 = vmul.f32 %v3953_v53, %v5893_v33  ;;  %v897_v40 = vmul.f32 %v3953_v53, %v5894_v31  ;;  %1213 = vst [vmem:[#allocation2 + $0x100] sm:$0xff] %v1149_v38  ;;  %1214 = vst [vmem:[#allocation2 + $0x108] sm:$0xff] %v1150_v48  ;;  %v906_v63 = vmul.f32 %v3955_v32, %v5895_v49  ;;  %v5907_v33 = vld [vmem:[#allocation66_spill] sm:$0xff]  ;;  %v5908_v31 = vld [vmem:[#allocation67_spill] sm:$0xff] }
 0x167   : > { %1215 = vst [vmem:[#allocation2 + $0x110] sm:$0xff] %v1151_v58  ;;  %1216 = vst [vmem:[#allocation2 + $0x118] sm:$0xff] %v1152_v5  ;;  %v907_v3 = vmul.f32 %v3955_v32, %v5896_v59  ;;  %v908_v42 = vmul.f32 %v3955_v32, %v5897_v4  ;;  %v909_v61 = vmul.f32 %v3955_v32, %v5898_v28  ;;  %v5909_v49 = vld [vmem:[#allocation68_spill] sm:$0xff]  ;;  %v5910_v59 = vld [vmem:[#allocation69_spill] sm:$0xff]  ;;  %v782_v4 = vadd.f32 1e-06, %v5259_v11 }
 0x168   : > { %v1061_v51 = vmul.f32 %v5106_v16, %v894_v15  ;;  %v1062_v41 = vmul.f32 %v5108_v20, %v895_v23  ;;  %v1063_v17 = vmul.f32 %v5110_v13, %v896_v34  ;;  %v1064_v53 = vmul.f32 %v5112_v46, %v897_v40 }
 0x169   : > { %v1073_v54 = vmul.f32 %v5106_v16, %v906_v63  ;;  %v1074_v21 = vmul.f32 %v5108_v20, %v907_v3  ;;  %v1075_v22 = vmul.f32 %v5110_v13, %v908_v42  ;;  %v1076_v14 = vmul.f32 %v5112_v46, %v909_v61 }
 0x16a   : > { %v1153_v24 = vpack.c.bf16 %v1065_v62, %v1061_v51  ;;  %v1154_v6 = vpack.c.bf16 %v1066_v39, %v1062_v41  ;;  %v1155_v56 = vpack.c.bf16 %v1067_v43, %v1063_v17  ;;  %v1156_v32 = vpack.c.bf16 %v1068_v18, %v1064_v53  ;;  %v714_v18 = vpop.xlane.xlu1 %713 }
 0x16b   : > { %v902_v8 = vmul.f32 %v3957_v55, %v5899_v35  ;;  %v903_v10 = vmul.f32 %v3957_v55, %v5900_v9  ;;  %v904_v25 = vmul.f32 %v3957_v55, %v5901_v50  ;;  %v905_v37 = vmul.f32 %v3957_v55, %v5902_v36  ;;  %v5912_v9 = vld [vmem:[#allocation71_spill] sm:$0xff]  ;;  %v5913_v50 = vld [vmem:[#allocation72_spill] sm:$0xff]  ;;  %v5914_v36 = vld [vmem:[#allocation73_spill] sm:$0xff] }
 0x16c   : > { %1217 = vst [vmem:[#allocation2 + $0x120] sm:$0xff] %v1153_v24  ;;  %1218 = vst [vmem:[#allocation2 + $0x128] sm:$0xff] %v1154_v6  ;;  %v914_v47 = vmul.f32 %v3959_v60, %v5903_v44  ;;  %v915_v57 = vmul.f32 %v3959_v60, %v5904_v26  ;;  %v916_v2 = vmul.f32 %v3959_v60, %v5905_v0  ;;  %v785_v42 = vadd.f32 1e-06, %v5261_v12  ;;  %v719_v24 = vpop.xlane.xlu0 %718 }
 0x16d   : > { %1219 = vst [vmem:[#allocation2 + $0x130] sm:$0xff] %v1155_v56  ;;  %1220 = vst [vmem:[#allocation2 + $0x138] sm:$0xff] %v1156_v32  ;;  %v917_v29 = vmul.f32 %v3959_v60, %v5906_v27  ;;  %v1069_v62 = vmul.f32 %v5106_v16, %v902_v8  ;;  %v1070_v39 = vmul.f32 %v5108_v20, %v903_v10  ;;  %v755_v28 = vmul.f32 0.001953125, %v714_v18  ;;  %v5918_v18 = vld [vmem:[#allocation77_spill] sm:$0xff] }
 0x16e   : > { %v1071_v43 = vmul.f32 %v5110_v13, %v904_v25  ;;  %v1072_v55 = vmul.f32 %v5112_v46, %v905_v37  ;;  %v1081_v38 = vmul.f32 %v5106_v16, %v914_v47  ;;  %v1082_v48 = vmul.f32 %v5108_v20, %v915_v57 }
 0x16f   : > { %v1083_v58 = vmul.f32 %v5110_v13, %v916_v2  ;;  %v1084_v5 = vmul.f32 %v5112_v46, %v917_v29  ;;  %v1157_v15 = vpack.c.bf16 %v1073_v54, %v1069_v62  ;;  %v1158_v60 = vpack.c.bf16 %v1074_v21, %v1070_v39  ;;  %v5915_v29 = vld [vmem:[#allocation74_spill] sm:$0xff]  ;;  %v5916_v39 = vld [vmem:[#allocation75_spill] sm:$0xff] }
 0x170   : > { %v1159_v30 = vpack.c.bf16 %v1075_v22, %v1071_v43  ;;  %v1160_v23 = vpack.c.bf16 %v1076_v14, %v1072_v55  ;;  %v910_v34 = vmul.f32 %v5289_v52, %v5907_v33  ;;  %v911_v40 = vmul.f32 %v5289_v52, %v5908_v31  ;;  %v5917_v55 = vld [vmem:[#allocation76_spill] sm:$0xff] }
 0x171   : > { %v912_v63 = vmul.f32 %v5289_v52, %v5909_v49  ;;  %v913_v3 = vmul.f32 %v5289_v52, %v5910_v59  ;;  %1221 = vst [vmem:[#allocation2 + $0x140] sm:$0xff] %v1157_v15  ;;  %1222 = vst [vmem:[#allocation2 + $0x148] sm:$0xff] %v1158_v60  ;;  %v784_v53 = vadd.f32 1e-06, %v5263_v1  ;;  %v724_v52 = vpop.xlane.xlu1 %723  ;;  %3964 = vrsqrt.f32 %v782_v4  ;;  %v5911_v1 = vld [vmem:[#allocation70_spill] sm:$0xff]  ;;  %v5921_v15 = vld [vmem:[#allocation80_spill] sm:$0xff] }
 0x172   : > { %1223 = vst [vmem:[#allocation2 + $0x150] sm:$0xff] %v1159_v30  ;;  %1224 = vst [vmem:[#allocation2 + $0x158] sm:$0xff] %v1160_v23  ;;  %v1077_v61 = vmul.f32 %v5106_v16, %v910_v34  ;;  %v1078_v51 = vmul.f32 %v5108_v20, %v911_v40  ;;  %v787_v11 = vadd.f32 1e-06, %v755_v28  ;;  %v754_v12 = vmul.f32 0.001953125, %v709_v19  ;;  %v5922_v30 = vld [vmem:[#allocation81_spill] sm:$0xff] }
 0x173   : > { %v1079_v41 = vmul.f32 %v5110_v13, %v912_v63  ;;  %v1080_v17 = vmul.f32 %v5112_v46, %v913_v3  ;;  %3966 = vrsqrt.f32 %v785_v42  ;;  %v757_v6 = vmul.f32 0.001953125, %v724_v52  ;;  %v5924_v52 = vld [vmem:[#allocation83_spill] sm:$0xff] }
 0x174   : > { %v1161_v54 = vpack.c.bf16 %v1081_v38, %v1077_v61  ;;  %v1162_v21 = vpack.c.bf16 %v1082_v48, %v1078_v51  ;;  %v756_v56 = vmul.f32 0.001953125, %v719_v24  ;;  %3968 = vrsqrt.f32 %v784_v53  ;;  %v5919_v48 = vld [vmem:[#allocation78_spill] sm:$0xff] }
 0x175   : > { %v1163_v22 = vpack.c.bf16 %v1083_v58, %v1079_v41  ;;  %v1164_v14 = vpack.c.bf16 %v1084_v5, %v1080_v17  ;;  %3970 = vrsqrt.f32 %v787_v11  ;;  %v786_v32 = vadd.f32 1e-06, %v754_v12  ;;  %v5920_v5 = vld [vmem:[#allocation79_spill] sm:$0xff]  ;;  %v5923_v17 = vld [vmem:[#allocation82_spill] sm:$0xff] }
 0x176   : > { %1225 = vst [vmem:[#allocation2 + $0x160] sm:$0xff] %v1161_v54  ;;  %1226 = vst [vmem:[#allocation2 + $0x168] sm:$0xff] %v1162_v21  ;;  %v922_v35 = vmul.f32 %v5295_v7, %v5911_v1  ;;  %v789_v8 = vadd.f32 1e-06, %v757_v6  ;;  %v923_v10 = vmul.f32 %v5295_v7, %v5912_v9  ;;  %v924_v25 = vmul.f32 %v5295_v7, %v5913_v50  ;;  %v5925_v21 = vld [vmem:[#allocation84_spill] sm:$0xff]  ;;  %v5927_v11 = vld [vmem:[#allocation86_spill] sm:$0xff] }
 0x177   : > { %1227 = vst [vmem:[#allocation2 + $0x170] sm:$0xff] %v1163_v22  ;;  %1228 = vst [vmem:[#allocation2 + $0x178] sm:$0xff] %v1164_v14  ;;  %v925_v37 = vmul.f32 %v5295_v7, %v5914_v36  ;;  %v788_v44 = vadd.f32 1e-06, %v756_v56  ;;  %3972 = vrsqrt.f32 %v786_v32  ;;  %v5926_v14 = vld [vmem:[#allocation85_spill] sm:$0xff]  ;;  %v5928_v6 = vld [vmem:[#allocation87_spill] sm:$0xff] }
 0x178   : > { %v1089_v47 = vmul.f32 %v5106_v16, %v922_v35  ;;  %3974 = vrsqrt.f32 %v789_v8  ;;  %v1090_v57 = vmul.f32 %v5108_v20, %v923_v10  ;;  %v1091_v0 = vmul.f32 %v5110_v13, %v924_v25  ;;  %v5929_v32 = vld [vmem:[#allocation88_spill] sm:$0xff]  ;;  %v5930_v35 = vld [vmem:[#allocation89_spill] sm:$0xff] }
 0x179   : > { %v1092_v2 = vmul.f32 %v5112_v46, %v925_v37  ;;  %3976 = vrsqrt.f32 %v788_v44 }
 0x17b   : > { %v3965_v26 = vpop.eup %3964 }
 0x17c   : > { %v918_v62 = vmul.f32 %v3965_v26, %v5915_v29  ;;  %v919_v43 = vmul.f32 %v3965_v26, %v5916_v39  ;;  %v920_v7 = vmul.f32 %v3965_v26, %v5917_v55  ;;  %v921_v38 = vmul.f32 %v3965_v26, %v5918_v18  ;;  %v5931_v39 = vld [vmem:[#allocation90_spill] sm:$0xff]  ;;  %v5932_v55 = vld [vmem:[#allocation91_spill] sm:$0xff]  ;;  %v5933_v18 = vld [vmem:[#allocation92_spill] sm:$0xff] }
 0x17d   : > { %v3967_v27 = vpop.eup %3966 }
 0x17e   : > { %v930_v58 = vmul.f32 %v3967_v27, %v5919_v48  ;;  %v931_v19 = vmul.f32 %v3967_v27, %v5920_v5  ;;  %v932_v60 = vmul.f32 %v3967_v27, %v5921_v15  ;;  %v933_v23 = vmul.f32 %v3967_v27, %v5922_v30  ;;  %v3969_v33 = vpop.eup %3968  ;;  %v5934_v48 = vld [vmem:[#allocation93_spill] sm:$0xff]  ;;  %v5935_v5 = vld [vmem:[#allocation94_spill] sm:$0xff]  ;;  %v5936_v15 = vld [vmem:[#allocation95_spill] sm:$0xff] }
 0x17f   : > { %v1085_v34 = vmul.f32 %v5106_v16, %v918_v62  ;;  %v1086_v31 = vmul.f32 %v5108_v20, %v919_v43  ;;  %v1087_v40 = vmul.f32 %v5110_v13, %v920_v7  ;;  %v1088_v49 = vmul.f32 %v5112_v46, %v921_v38  ;;  %v3971_v63 = vpop.eup %3970  ;;  %v5937_v30 = vld [vmem:[#allocation96_spill] sm:$0xff] }
 0x180   : > { %v1097_v59 = vmul.f32 %v5106_v16, %v930_v58  ;;  %v1098_v3 = vmul.f32 %v5108_v20, %v931_v19  ;;  %v1099_v4 = vmul.f32 %v5110_v13, %v932_v60  ;;  %v1100_v42 = vmul.f32 %v5112_v46, %v933_v23 }
 0x181   : > { %v1165_v28 = vpack.c.bf16 %v1089_v47, %v1085_v34  ;;  %v1166_v61 = vpack.c.bf16 %v1090_v57, %v1086_v31  ;;  %v1167_v51 = vpack.c.bf16 %v1091_v0, %v1087_v40  ;;  %v1168_v41 = vpack.c.bf16 %v1092_v2, %v1088_v49  ;;  %v3973_v9 = vpop.eup %3972 }
 0x182   : > { %v926_v53 = vmul.f32 %v3969_v33, %v5923_v17  ;;  %v927_v54 = vmul.f32 %v3969_v33, %v5924_v52  ;;  %v928_v22 = vmul.f32 %v3969_v33, %v5925_v21  ;;  %v929_v24 = vmul.f32 %v3969_v33, %v5926_v14  ;;  %v3975_v37 = vpop.eup %3974  ;;  %v5938_v33 = vld [vmem:[#allocation97_spill] sm:$0xff]  ;;  %v5939_v17 = vld [vmem:[#allocation98_spill] sm:$0xff]  ;;  %v5940_v52 = vld [vmem:[#allocation99_spill] sm:$0xff] }
 0x183   : > { %1229 = vst [vmem:[#allocation2 + $0x180] sm:$0xff] %v1165_v28  ;;  %1230 = vst [vmem:[#allocation2 + $0x188] sm:$0xff] %v1166_v61  ;;  %v938_v12 = vmul.f32 %v3971_v63, %v5927_v11  ;;  %v939_v56 = vmul.f32 %v3971_v63, %v5928_v6  ;;  %v940_v1 = vmul.f32 %v3971_v63, %v5929_v32  ;;  %v3977_v0 = vpop.eup %3976  ;;  %v5941_v21 = vld [vmem:[#allocation100_spill] sm:$0xff] }
 0x184   : > { %1231 = vst [vmem:[#allocation2 + $0x190] sm:$0xff] %v1167_v51  ;;  %1232 = vst [vmem:[#allocation2 + $0x198] sm:$0xff] %v1168_v41  ;;  %v941_v8 = vmul.f32 %v3971_v63, %v5930_v35  ;;  %v1093_v10 = vmul.f32 %v5106_v16, %v926_v53  ;;  %v1094_v50 = vmul.f32 %v5108_v20, %v927_v54 }
 0x185   : > { %v1095_v25 = vmul.f32 %v5110_v13, %v928_v22  ;;  %v1096_v36 = vmul.f32 %v5112_v46, %v929_v24  ;;  %v1105_v44 = vmul.f32 %v5106_v16, %v938_v12  ;;  %v1106_v47 = vmul.f32 %v5108_v20, %v939_v56 }
 0x186   : > { %v1107_v26 = vmul.f32 %v5110_v13, %v940_v1  ;;  %v1108_v57 = vmul.f32 %v5112_v46, %v941_v8  ;;  %v1169_v2 = vpack.c.bf16 %v1097_v59, %v1093_v10  ;;  %v1170_v27 = vpack.c.bf16 %v1098_v3, %v1094_v50 }
 0x187   : > { %v1171_v29 = vpack.c.bf16 %v1099_v4, %v1095_v25  ;;  %v1172_v62 = vpack.c.bf16 %v1100_v42, %v1096_v36  ;;  %v934_v43 = vmul.f32 %v3973_v9, %v5931_v39  ;;  %v935_v7 = vmul.f32 %v3973_v9, %v5932_v55 }
 0x188   : > { %v936_v38 = vmul.f32 %v3973_v9, %v5933_v18  ;;  %v937_v58 = vmul.f32 %v3973_v9, %v5934_v48  ;;  %1233 = vst [vmem:[#allocation2 + $0x1a0] sm:$0xff] %v1169_v2  ;;  %1234 = vst [vmem:[#allocation2 + $0x1a8] sm:$0xff] %v1170_v27  ;;  %v946_v19 = vmul.f32 %v3975_v37, %v5935_v5 }
 0x189   : > { %1235 = vst [vmem:[#allocation2 + $0x1b0] sm:$0xff] %v1171_v29  ;;  %1236 = vst [vmem:[#allocation2 + $0x1b8] sm:$0xff] %v1172_v62  ;;  %v947_v60 = vmul.f32 %v3975_v37, %v5936_v15  ;;  %v948_v23 = vmul.f32 %v3975_v37, %v5937_v30  ;;  %v949_v34 = vmul.f32 %v3975_v37, %v5938_v33 }
 0x18a   : > { %v1101_v31 = vmul.f32 %v5106_v16, %v934_v43  ;;  %v1102_v40 = vmul.f32 %v5108_v20, %v935_v7  ;;  %v1103_v49 = vmul.f32 %v5110_v13, %v936_v38  ;;  %v1104_v63 = vmul.f32 %v5112_v46, %v937_v58 }
 0x18b   : > { %v1113_v59 = vmul.f32 %v5106_v16, %v946_v19  ;;  %v1114_v3 = vmul.f32 %v5108_v20, %v947_v60  ;;  %v1115_v4 = vmul.f32 %v5110_v13, %v948_v23  ;;  %v1116_v42 = vmul.f32 %v5112_v46, %v949_v34 }
 0x18c   : > { %v1173_v28 = vpack.c.bf16 %v1105_v44, %v1101_v31  ;;  %v1174_v61 = vpack.c.bf16 %v1106_v47, %v1102_v40  ;;  %v1175_v51 = vpack.c.bf16 %v1107_v26, %v1103_v49  ;;  %v1176_v41 = vpack.c.bf16 %v1108_v57, %v1104_v63 }
 0x18d   : > { %v942_v53 = vmul.f32 %v3977_v0, %v5939_v17  ;;  %v943_v54 = vmul.f32 %v3977_v0, %v5940_v52  ;;  %v944_v22 = vmul.f32 %v3977_v0, %v5941_v21  ;;  %v945_v14 = vmul.f32 %v3977_v0, %v5096_v45 }
 0x18e   : > { %1237 = vst [vmem:[#allocation2 + $0x1c0] sm:$0xff] %v1173_v28  ;;  %1238 = vst [vmem:[#allocation2 + $0x1c8] sm:$0xff] %v1174_v61 }
 0x18f   : > { %1239 = vst [vmem:[#allocation2 + $0x1d0] sm:$0xff] %v1175_v51  ;;  %1240 = vst [vmem:[#allocation2 + $0x1d8] sm:$0xff] %v1176_v41  ;;  %v1109_v24 = vmul.f32 %v5106_v16, %v942_v53  ;;  %v1110_v11 = vmul.f32 %v5108_v20, %v943_v54  ;;  %v1111_v12 = vmul.f32 %v5110_v13, %v944_v22 }
 0x190   : > { %v1112_v6 = vmul.f32 %v5112_v46, %v945_v14 }
 0x191   : > { %v1177_v56 = vpack.c.bf16 %v1113_v59, %v1109_v24  ;;  %v1178_v32 = vpack.c.bf16 %v1114_v3, %v1110_v11  ;;  %v1179_v1 = vpack.c.bf16 %v1115_v4, %v1111_v12 }
 0x192   : > { %v1180_v35 = vpack.c.bf16 %v1116_v42, %v1112_v6 }
 0x193   : > { %1241 = vst [vmem:[#allocation2 + $0x1e0] sm:$0xff] %v1177_v56  ;;  %1242 = vst [vmem:[#allocation2 + $0x1e8] sm:$0xff] %v1178_v32 }
 0x194   : > { %1243 = vst [vmem:[#allocation2 + $0x1f0] sm:$0xff] %v1179_v1  ;;  %1244 = vst [vmem:[#allocation2 + $0x1f8] sm:$0xff] %v1180_v35 }
 0x195 PF: > { %v3978_v45 = vld [vmem:[%s4584_s19 + $0x4] ss:$16 sps:$4 sm:$0xff]   ;;  %v3980_v16 = vld [vmem:[%s4584_s19 + $0xc] ss:$16 sps:$4 sm:$0xff]   ;;  %v3982_v20 = vld [vmem:[%s4584_s19] ss:$16 sps:$4 sm:$0xff]  }
 0x196   : > { %2077 = vmatprep.subr.bf16.mxu0 %v3978_v45  ;;  %v3983_v13 = vld [vmem:[%s4584_s19 + $0x8] ss:$16 sps:$4 sm:$0xff]   ;;  %2463 = vmatprep.subr.bf16.mxu1 %v3980_v16  ;;  %v3984_v46 = vld [vmem:[%s4584_s19 + $0x24] ss:$16 sps:$4 sm:$0xff]   ;;  %v3986_v8 = vld [vmem:[%s4584_s19 + $0x2c] ss:$16 sps:$4 sm:$0xff]  }
 0x197   : > { %2078 = vmatpush1.bf16.msra.mxu0 %v3982_v20  ;;  %2464 = vmatpush1.bf16.msra.mxu1 %v3983_v13  ;;  %v3988_v9 = vld [vmem:[%s4584_s19 + $0x20] ss:$16 sps:$4 sm:$0xff]   ;;  %v3989_v10 = vld [vmem:[%s4584_s19 + $0x28] ss:$16 sps:$4 sm:$0xff]   ;;  %v3990_v50 = vld [vmem:[%s4584_s19 + $0x44] ss:$16 sps:$4 sm:$0xff]  }
 0x198   : > { %2079 = vmatprep.subr.bf16.mxu0 %v3984_v46  ;;  %2465 = vmatprep.subr.bf16.mxu1 %v3986_v8  ;;  %v3992_v25 = vld [vmem:[%s4584_s19 + $0x4c] ss:$16 sps:$4 sm:$0xff]   ;;  %v3994_v36 = vld [vmem:[%s4584_s19 + $0x40] ss:$16 sps:$4 sm:$0xff]   ;;  %v3995_v37 = vld [vmem:[%s4584_s19 + $0x48] ss:$16 sps:$4 sm:$0xff]  }
 0x199   : > { %v3996_v44 = vld [vmem:[%s4584_s19 + $0x64] ss:$16 sps:$4 sm:$0xff]   ;;  %v3998_v47 = vld [vmem:[%s4584_s19 + $0x6c] ss:$16 sps:$4 sm:$0xff]   ;;  %v4000_v26 = vld [vmem:[%s4584_s19 + $0x60] ss:$16 sps:$4 sm:$0xff]  }
 0x19a   : > { %v4001_v57 = vld [vmem:[%s4584_s19 + $0x68] ss:$16 sps:$4 sm:$0xff]   ;;  %v4002_v0 = vld [vmem:[%s4584_s19 + $0x84] ss:$16 sps:$4 sm:$0xff]   ;;  %v4004_v2 = vld [vmem:[%s4584_s19 + $0x8c] ss:$16 sps:$4 sm:$0xff]  }
 0x19b   : > { %2080 = vmatpush1.bf16.msra.mxu0 %v3988_v9  ;;  %2466 = vmatpush1.bf16.msra.mxu1 %v3989_v10  ;;  %v4006_v27 = vld [vmem:[%s4584_s19 + $0x80] ss:$16 sps:$4 sm:$0xff]   ;;  %v4007_v29 = vld [vmem:[%s4584_s19 + $0x88] ss:$16 sps:$4 sm:$0xff]   ;;  %v4008_v62 = vld [vmem:[%s4584_s19 + $0xa4] ss:$16 sps:$4 sm:$0xff]  }
 0x19c   : > { %2081 = vmatprep.subr.bf16.mxu0 %v3990_v50  ;;  %2467 = vmatprep.subr.bf16.mxu1 %v3992_v25  ;;  %v4010_v39 = vld [vmem:[%s4584_s19 + $0xac] ss:$16 sps:$4 sm:$0xff]   ;;  %v4012_v43 = vld [vmem:[%s4584_s19 + $0xa0] ss:$16 sps:$4 sm:$0xff]   ;;  %v4013_v55 = vld [vmem:[%s4584_s19 + $0xa8] ss:$16 sps:$4 sm:$0xff]  }
 0x19d   : > { %v4014_v7 = vld [vmem:[%s4584_s19 + $0xc4] ss:$16 sps:$4 sm:$0xff]   ;;  %v4016_v18 = vld [vmem:[%s4584_s19 + $0xcc] ss:$16 sps:$4 sm:$0xff]   ;;  %v4018_v38 = vld [vmem:[%s4584_s19 + $0xc0] ss:$16 sps:$4 sm:$0xff]  }
 0x19e   : > { %v4019_v48 = vld [vmem:[%s4584_s19 + $0xc8] ss:$16 sps:$4 sm:$0xff]   ;;  %v4020_v58 = vld [vmem:[%s4584_s19 + $0xe4] ss:$16 sps:$4 sm:$0xff]   ;;  %v4022_v5 = vld [vmem:[%s4584_s19 + $0xec] ss:$16 sps:$4 sm:$0xff]  }
 0x19f   : > { %2082 = vmatpush1.bf16.msra.mxu0 %v3994_v36  ;;  %2468 = vmatpush1.bf16.msra.mxu1 %v3995_v37  ;;  %v4024_v19 = vld [vmem:[%s4584_s19 + $0xe0] ss:$16 sps:$4 sm:$0xff]   ;;  %v4025_v15 = vld [vmem:[%s4584_s19 + $0xe8] ss:$16 sps:$4 sm:$0xff]   ;;  %v4026_v60 = vld [vmem:[%s4584_s19 + $0x104] ss:$16 sps:$4 sm:$0xff]  }
 0x1a0   : > { %2083 = vmatprep.subr.bf16.mxu0 %v3996_v44  ;;  %2469 = vmatprep.subr.bf16.mxu1 %v3998_v47  ;;  %v4028_v30 = vld [vmem:[%s4584_s19 + $0x10c] ss:$16 sps:$4 sm:$0xff]   ;;  %v4030_v23 = vld [vmem:[%s4584_s19 + $0x100] ss:$16 sps:$4 sm:$0xff]   ;;  %v4031_v33 = vld [vmem:[%s4584_s19 + $0x108] ss:$16 sps:$4 sm:$0xff]  }
 0x1a1   : > { %v4032_v34 = vld [vmem:[%s4584_s19 + $0x124] ss:$16 sps:$4 sm:$0xff]   ;;  %v4034_v31 = vld [vmem:[%s4584_s19 + $0x12c] ss:$16 sps:$4 sm:$0xff]   ;;  %v4036_v40 = vld [vmem:[%s4584_s19 + $0x120] ss:$16 sps:$4 sm:$0xff]  }
 0x1a2   : > { %v4037_v49 = vld [vmem:[%s4584_s19 + $0x128] ss:$16 sps:$4 sm:$0xff]   ;;  %v4038_v63 = vld [vmem:[%s4584_s19 + $0x144] ss:$16 sps:$4 sm:$0xff]   ;;  %v4040_v59 = vld [vmem:[%s4584_s19 + $0x14c] ss:$16 sps:$4 sm:$0xff]  }
 0x1a3   : > { %2084 = vmatpush1.bf16.msra.mxu0 %v4000_v26  ;;  %2470 = vmatpush1.bf16.msra.mxu1 %v4001_v57  ;;  %v4042_v3 = vld [vmem:[%s4584_s19 + $0x140] ss:$16 sps:$4 sm:$0xff]   ;;  %v4043_v4 = vld [vmem:[%s4584_s19 + $0x148] ss:$16 sps:$4 sm:$0xff]   ;;  %v4044_v42 = vld [vmem:[%s4584_s19 + $0x164] ss:$16 sps:$4 sm:$0xff]  }
 0x1a4   : > { %2085 = vmatprep.subr.bf16.mxu0 %v4002_v0  ;;  %2471 = vmatprep.subr.bf16.mxu1 %v4004_v2  ;;  %v4046_v28 = vld [vmem:[%s4584_s19 + $0x16c] ss:$16 sps:$4 sm:$0xff]   ;;  %v1246_v61 = vld [vmem:[#allocation2 + $0x8] sm:$0xff]  ;;  %v4048_v51 = vld [vmem:[%s4584_s19 + $0x160] ss:$16 sps:$4 sm:$0xff]   ;;  %s3696_s18 = sshll.u32 %s4338_s15, 8 }
 0x1a5   : > { %2109 = vmatprep.mubr.bf16.mxu0 %v1246_v61  ;;  %2495 = vmatprep.mubr.bf16.mxu1 %v1246_v61  ;;  %v4049_v41 = vld [vmem:[%s4584_s19 + $0x168] ss:$16 sps:$4 sm:$0xff]   ;;  %v4050_v17 = vld [vmem:[%s4584_s19 + $0x184] ss:$16 sps:$4 sm:$0xff]   ;;  %v4052_v53 = vld [vmem:[%s4584_s19 + $0x18c] ss:$16 sps:$4 sm:$0xff]   ;;  %s5605_s20 = scalar_lea.hbm %s5663_s3, %s3696_s18 }
 0x1a6   : > { %v4054_v52 = vld [vmem:[%s4584_s19 + $0x180] ss:$16 sps:$4 sm:$0xff]   ;;  %v4055_v54 = vld [vmem:[%s4584_s19 + $0x188] ss:$16 sps:$4 sm:$0xff]   ;;  %v4056_v21 = vld [vmem:[%s4584_s19 + $0x1a4] ss:$16 sps:$4 sm:$0xff]  }
 0x1a7   : > { %2086 = vmatpush1.bf16.msra.mxu0 %v4006_v27  ;;  %2472 = vmatpush1.bf16.msra.mxu1 %v4007_v29  ;;  %v4058_v22 = vld [vmem:[%s4584_s19 + $0x1ac] ss:$16 sps:$4 sm:$0xff]   ;;  %v4060_v14 = vld [vmem:[%s4584_s19 + $0x1a0] ss:$16 sps:$4 sm:$0xff]   ;;  %v4061_v24 = vld [vmem:[%s4584_s19 + $0x1a8] ss:$16 sps:$4 sm:$0xff]  }
 0x1a8   : > { %2087 = vmatprep.subr.bf16.mxu0 %v4008_v62  ;;  %2473 = vmatprep.subr.bf16.mxu1 %v4010_v39  ;;  %v4062_v11 = vld [vmem:[%s4584_s19 + $0x1c4] ss:$16 sps:$4 sm:$0xff]   ;;  %v4064_v12 = vld [vmem:[%s4584_s19 + $0x1cc] ss:$16 sps:$4 sm:$0xff]   ;;  %v4066_v6 = vld [vmem:[%s4584_s19 + $0x1c0] ss:$16 sps:$4 sm:$0xff]  }
 0x1a9   : > { %v4067_v56 = vld [vmem:[%s4584_s19 + $0x1c8] ss:$16 sps:$4 sm:$0xff]   ;;  %v4068_v32 = vld [vmem:[%s4584_s19 + $0x1e4] ss:$16 sps:$4 sm:$0xff]   ;;  %v4070_v1 = vld [vmem:[%s4584_s19 + $0x1ec] ss:$16 sps:$4 sm:$0xff]  }
 0x1aa   : > { %v4072_v35 = vld [vmem:[%s4584_s19 + $0x1e0] ss:$16 sps:$4 sm:$0xff]   ;;  %v4073_v45 = vld [vmem:[%s4584_s19 + $0x1e8] ss:$16 sps:$4 sm:$0xff]   ;;  %v4076_v16 = vld [vmem:[%s4584_s19 + $0x204] ss:$16 sps:$4 sm:$0xff]  }
 0x1ab   : > { %2088 = vmatpush1.bf16.msra.mxu0 %v4012_v43  ;;  %2474 = vmatpush1.bf16.msra.mxu1 %v4013_v55  ;;  %v4079_v20 = vld [vmem:[%s4584_s19 + $0x20c] ss:$16 sps:$4 sm:$0xff]   ;;  %v4074_v46 = vld [vmem:[%s4584_s19 + $0x200] ss:$16 sps:$4 sm:$0xff]   ;;  %v4077_v8 = vld [vmem:[%s4584_s19 + $0x208] ss:$16 sps:$4 sm:$0xff]  }
 0x1ac   : > { %2089 = vmatprep.subr.bf16.mxu0 %v4014_v7  ;;  %2475 = vmatprep.subr.bf16.mxu1 %v4016_v18  ;;  %v1245_v13 = vld [vmem:[#allocation2] sm:$0xff]  ;;  %v1250_v9 = vld [vmem:[#allocation2 + $0x28] sm:$0xff]  ;;  %s3314_s22 = sshll.u32 %s4591_s28, 4  ;;  %s3298_s15 = scalar_lea.sflag [#allocation5], %s4581_s21  ;;  %s5607_s22 = int_to_ptr.vmem [resolvable:$true] %s3314_s22 }
 0x1ad   : > { %v4082_v10 = vld [vmem:[%s4584_s19 + $0x224] ss:$16 sps:$4 sm:$0xff]   ;;  %v4085_v50 = vld [vmem:[%s4584_s19 + $0x22c] ss:$16 sps:$4 sm:$0xff]   ;;  %v4080_v25 = vld [vmem:[%s4584_s19 + $0x220] ss:$16 sps:$4 sm:$0xff]  }
 0x1ae   : > { %v4083_v36 = vld [vmem:[%s4584_s19 + $0x228] ss:$16 sps:$4 sm:$0xff]   ;;  %v4088_v37 = vld [vmem:[%s4584_s19 + $0x244] ss:$16 sps:$4 sm:$0xff]   ;;  %v4091_v44 = vld [vmem:[%s4584_s19 + $0x24c] ss:$16 sps:$4 sm:$0xff]  }
 0x1af   : > { %2090 = vmatpush1.bf16.msra.mxu0 %v4018_v38  ;;  %2476 = vmatpush1.bf16.msra.mxu1 %v4019_v48  ;;  %v1249_v47 = vld [vmem:[#allocation2 + $0x20] sm:$0xff]  ;;  %v1254_v26 = vld [vmem:[#allocation2 + $0x48] sm:$0xff]  ;;  %s4256_s7 = scalar_lea.vmem %s5607_s22, 8192  ;;  %p5942_p10 = scmp.ne.s32.totalorder %s5757_s23, 0 }
 0x1b0   : > { %2091 = vmatprep.subr.bf16.mxu0 %v4020_v58  ;;  %2477 = vmatprep.subr.bf16.mxu1 %v4022_v5  ;;  %v4086_v57 = vld [vmem:[%s4584_s19 + $0x240] ss:$16 sps:$4 sm:$0xff]   ;;  %v4089_v0 = vld [vmem:[%s4584_s19 + $0x248] ss:$16 sps:$4 sm:$0xff]   ;;  %v4094_v2 = vld [vmem:[%s4584_s19 + $0x264] ss:$16 sps:$4 sm:$0xff]   ;;  %p4257_p7 = scmp.ne.s32.totalorder %s5607_s22, %s4256_s7 }
 0x1b1   : > { %v4097_v27 = vld [vmem:[%s4584_s19 + $0x26c] ss:$16 sps:$4 sm:$0xff]   ;;  %v4092_v29 = vld [vmem:[%s4584_s19 + $0x260] ss:$16 sps:$4 sm:$0xff]   ;;  %v4095_v62 = vld [vmem:[%s4584_s19 + $0x268] ss:$16 sps:$4 sm:$0xff]  }
 0x1b2   : > { %v4100_v39 = vld [vmem:[%s4584_s19 + $0x284] ss:$16 sps:$4 sm:$0xff]   ;;  %v4103_v43 = vld [vmem:[%s4584_s19 + $0x28c] ss:$16 sps:$4 sm:$0xff]   ;;  %v4098_v18 = vld [vmem:[%s4584_s19 + $0x280] ss:$16 sps:$4 sm:$0xff]   ;;  %p4258_p2 = pnand %p4257_p7, %p5942_p10 }
 0x1b3   : > { %2092 = vmatpush1.bf16.msra.mxu0 %v4024_v19  ;;  %2478 = vmatpush1.bf16.msra.mxu1 %v4025_v15  ;;  %v1253_v55 = vld [vmem:[#allocation2 + $0x40] sm:$0xff]  ;;  %v1258_v7 = vld [vmem:[#allocation2 + $0x68] sm:$0xff]  ;;  %s4354_s27 = smov [#allocation9]  }
 0x1b4   : > { %2093 = vmatprep.subr.bf16.mxu0 %v4026_v60  ;;  %2479 = vmatprep.subr.bf16.mxu1 %v4028_v30  ;;  %v4101_v38 = vld [vmem:[%s4584_s19 + $0x288] ss:$16 sps:$4 sm:$0xff]   ;;  %v4106_v48 = vld [vmem:[%s4584_s19 + $0x2a4] ss:$16 sps:$4 sm:$0xff]   ;;  %v4109_v58 = vld [vmem:[%s4584_s19 + $0x2ac] ss:$16 sps:$4 sm:$0xff]   ;;  %p4259_p8 = pneg %p4258_p2 }
 0x1b5   : > { %v4104_v5 = vld [vmem:[%s4584_s19 + $0x2a0] ss:$16 sps:$4 sm:$0xff]   ;;  %v4107_v19 = vld [vmem:[%s4584_s19 + $0x2a8] ss:$16 sps:$4 sm:$0xff]   ;;  %v4112_v15 = vld [vmem:[%s4584_s19 + $0x2c4] ss:$16 sps:$4 sm:$0xff]  }
 0x1b6   : > { %v4115_v60 = vld [vmem:[%s4584_s19 + $0x2cc] ss:$16 sps:$4 sm:$0xff]   ;;  %v4125_v61 = vld [vmem:[%s4584_s19 + $0x308] ss:$16 sps:$4 sm:$0xff]   ;;  %s4260_s9 = sshll.u32 %s4354_s27, 4  ;;  %s4261_s9 = int_to_ptr.vmem [resolvable:$false] %s4260_s9 }
 0x1b7   : > { %2094 = vmatpush1.bf16.msra.mxu0 %v4030_v23  ;;  %2480 = vmatpush1.bf16.msra.mxu1 %v4031_v33  ;;  %v1257_v30 = vld [vmem:[#allocation2 + $0x60] sm:$0xff]  ;;  %v1262_v23 = vld [vmem:[#allocation2 + $0x88] sm:$0xff]  ;;  %s4262_s8 = scalar_lea.vmem %s4261_s9, 16384  ;;  %p4263_p0 = scmp.lt.s32.totalorder %s5607_s22, %s4261_s9 }
 0x1b8   : > { %2095 = vmatprep.subr.bf16.mxu0 %v4032_v34  ;;  %2481 = vmatprep.subr.bf16.mxu1 %v4034_v31  ;;  %v4110_v33 = vld [vmem:[%s4584_s19 + $0x2c0] ss:$16 sps:$4 sm:$0xff]   ;;  %v4113_v34 = vld [vmem:[%s4584_s19 + $0x2c8] ss:$16 sps:$4 sm:$0xff]   ;;  %v4118_v31 = vld [vmem:[%s4584_s19 + $0x2e4] ss:$16 sps:$4 sm:$0xff]   ;;  %p4264_p5 = scmp.lt.s32.totalorder %s4262_s8, %s4256_s7 }
 0x1ba   : > { %p4265_p1 = por %p4264_p5, %p4263_p0 }
 0x1bb   : > { %2096 = vmatpush1.bf16.msra.mxu0 %v4036_v40  ;;  %2482 = vmatpush1.bf16.msra.mxu1 %v4037_v49  ;;  %v4121_v40 = vld [vmem:[%s4584_s19 + $0x2ec] ss:$16 sps:$4 sm:$0xff]   ;;  %v4116_v49 = vld [vmem:[%s4584_s19 + $0x2e0] ss:$16 sps:$4 sm:$0xff]  }
 0x1bc   : > { %2097 = vmatprep.subr.bf16.mxu0 %v4038_v63  ;;  %2483 = vmatprep.subr.bf16.mxu1 %v4040_v59  ;;  %v4119_v63 = vld [vmem:[%s4584_s19 + $0x2e8] ss:$16 sps:$4 sm:$0xff]   ;;  %v4124_v59 = vld [vmem:[%s4584_s19 + $0x304] ss:$16 sps:$4 sm:$0xff]   ;;  %p4266_p6 = pnand %p4265_p1, %p4259_p8 }
 0x1bf   : > { %2098 = vmatpush1.bf16.msra.mxu0 %v4042_v3  ;;  %2484 = vmatpush1.bf16.msra.mxu1 %v4043_v4  ;;  %v4127_v3 = vld [vmem:[%s4584_s19 + $0x30c] ss:$16 sps:$4 sm:$0xff]  }
 0x1c0   : > { %2099 = vmatprep.subr.bf16.mxu0 %v4044_v42  ;;  %2485 = vmatprep.subr.bf16.mxu1 %v4046_v28  ;;  %v1261_v4 = vld [vmem:[#allocation2 + $0x80] sm:$0xff]  ;;  %v1266_v42 = vld [vmem:[#allocation2 + $0xa8] sm:$0xff] }
 0x1c1   : > { %v4122_v28 = vld [vmem:[%s4584_s19 + $0x300] ss:$16 sps:$4 sm:$0xff]  }
 0x1c3   : > { %2100 = vmatpush1.bf16.msra.mxu0 %v4048_v51  ;;  %2486 = vmatpush1.bf16.msra.mxu1 %v4049_v41  ;;  %v4130_v51 = vld [vmem:[%s4584_s19 + $0x324] ss:$16 sps:$4 sm:$0xff]   ;;  %v4133_v41 = vld [vmem:[%s4584_s19 + $0x32c] ss:$16 sps:$4 sm:$0xff]  }
 0x1c4   : > { %2101 = vmatprep.subr.bf16.mxu0 %v4050_v17  ;;  %2487 = vmatprep.subr.bf16.mxu1 %v4052_v53  ;;  %v4128_v17 = vld [vmem:[%s4584_s19 + $0x320] ss:$16 sps:$4 sm:$0xff]   ;;  %v4131_v53 = vld [vmem:[%s4584_s19 + $0x328] ss:$16 sps:$4 sm:$0xff]  }
 0x1c7   : > { %2102 = vmatpush1.bf16.msra.mxu0 %v4054_v52  ;;  %2488 = vmatpush1.bf16.msra.mxu1 %v4055_v54  ;;  %v4136_v52 = vld [vmem:[%s4584_s19 + $0x344] ss:$16 sps:$4 sm:$0xff]   ;;  %v4139_v54 = vld [vmem:[%s4584_s19 + $0x34c] ss:$16 sps:$4 sm:$0xff]  }
 0x1c8   : > { %2103 = vmatprep.subr.bf16.mxu0 %v4056_v21  ;;  %2489 = vmatprep.subr.bf16.mxu1 %v4058_v22  ;;  %v1265_v21 = vld [vmem:[#allocation2 + $0xa0] sm:$0xff]  ;;  %v1270_v22 = vld [vmem:[#allocation2 + $0xc8] sm:$0xff] }
 0x1cb   : > { %2104 = vmatpush1.bf16.msra.mxu0 %v4060_v14  ;;  %2490 = vmatpush1.bf16.msra.mxu1 %v4061_v24  ;;  %v4134_v14 = vld [vmem:[%s4584_s19 + $0x340] ss:$16 sps:$4 sm:$0xff]   ;;  %v4137_v24 = vld [vmem:[%s4584_s19 + $0x348] ss:$16 sps:$4 sm:$0xff]  }
 0x1cc   : > { %2105 = vmatprep.subr.bf16.mxu0 %v4062_v11  ;;  %2491 = vmatprep.subr.bf16.mxu1 %v4064_v12  ;;  %v4142_v11 = vld [vmem:[%s4584_s19 + $0x364] ss:$16 sps:$4 sm:$0xff]   ;;  %v4145_v12 = vld [vmem:[%s4584_s19 + $0x36c] ss:$16 sps:$4 sm:$0xff]  }
 0x1cf   : > { %2106 = vmatpush1.bf16.msra.mxu0 %v4066_v6  ;;  %2492 = vmatpush1.bf16.msra.mxu1 %v4067_v56  ;;  %v4140_v6 = vld [vmem:[%s4584_s19 + $0x360] ss:$16 sps:$4 sm:$0xff]   ;;  %v4143_v56 = vld [vmem:[%s4584_s19 + $0x368] ss:$16 sps:$4 sm:$0xff]  }
 0x1d0   : > { %2107 = vmatprep.subr.bf16.mxu0 %v4068_v32  ;;  %2493 = vmatprep.subr.bf16.mxu1 %v4070_v1  ;;  %v4148_v32 = vld [vmem:[%s4584_s19 + $0x384] ss:$16 sps:$4 sm:$0xff]   ;;  %v4151_v1 = vld [vmem:[%s4584_s19 + $0x38c] ss:$16 sps:$4 sm:$0xff]  }
 0x1d3   : > { %2108 = vmatpush1.bf16.msra.mxu0 %v4072_v35  ;;  %2494 = vmatpush1.bf16.msra.mxu1 %v4073_v45  ;;  %v1269_v35 = vld [vmem:[#allocation2 + $0xc0] sm:$0xff]  ;;  %v1274_v45 = vld [vmem:[#allocation2 + $0xe8] sm:$0xff] }
 0x1d4   : > { %2270 = vmatprep.subr.bf16.mxu0 %v4076_v16  ;;  %2656 = vmatprep.subr.bf16.mxu1 %v4079_v20  ;;  %v4146_v16 = vld [vmem:[%s4584_s19 + $0x380] ss:$16 sps:$4 sm:$0xff]   ;;  %v4149_v20 = vld [vmem:[%s4584_s19 + $0x388] ss:$16 sps:$4 sm:$0xff]  }
 0x1d6   : > { %2110 = vmatmul.mubr.bf16.vlgmr.msra.gmra.mrb[0].mxu0 %v1245_v13  ;;  %2496 = vmatmul.mubr.bf16.vlgmr.msra.gmra.mrb[0].mxu1 %v1245_v13  ;;  %v4154_v13 = vld [vmem:[%s4584_s19 + $0x3a4] ss:$16 sps:$4 sm:$0xff]  }
 0x1d7   : > { %2271 = vmatpush1.bf16.msra.mxu0 %v4074_v46  ;;  %2657 = vmatpush1.bf16.msra.mxu1 %v4077_v8  ;;  %v4157_v46 = vld [vmem:[%s4584_s19 + $0x3ac] ss:$16 sps:$4 sm:$0xff]   ;;  %v4152_v8 = vld [vmem:[%s4584_s19 + $0x3a0] ss:$16 sps:$4 sm:$0xff]  }
 0x1d8   : > { %2119 = vmatprep.mubr.bf16.mxu0 %v1250_v9  ;;  %2505 = vmatprep.mubr.bf16.mxu1 %v1250_v9  ;;  %v4155_v9 = vld [vmem:[%s4584_s19 + $0x3a8] ss:$16 sps:$4 sm:$0xff]  }
 0x1d9   : > { %2272 = vmatprep.subr.bf16.mxu0 %v4082_v10  ;;  %2658 = vmatprep.subr.bf16.mxu1 %v4085_v50  ;;  %v4160_v10 = vld [vmem:[%s4584_s19 + $0x3c4] ss:$16 sps:$4 sm:$0xff]   ;;  %v4163_v50 = vld [vmem:[%s4584_s19 + $0x3cc] ss:$16 sps:$4 sm:$0xff]  }
 0x1db   : > { %2273 = vmatpush1.bf16.msra.mxu0 %v4080_v25  ;;  %2659 = vmatpush1.bf16.msra.mxu1 %v4083_v36  ;;  %v1273_v25 = vld [vmem:[#allocation2 + $0xe0] sm:$0xff]  ;;  %v1278_v36 = vld [vmem:[#allocation2 + $0x108] sm:$0xff] }
 0x1dc   : > { %2274 = vmatprep.subr.bf16.mxu0 %v4088_v37  ;;  %2660 = vmatprep.subr.bf16.mxu1 %v4091_v44  ;;  %v4158_v37 = vld [vmem:[%s4584_s19 + $0x3c0] ss:$16 sps:$4 sm:$0xff]   ;;  %v4161_v44 = vld [vmem:[%s4584_s19 + $0x3c8] ss:$16 sps:$4 sm:$0xff]  }
 0x1de   : > { %2120 = vmatmul.mubr.bf16.gmra.mrb[4].mxu0 %v1249_v47  ;;  %2506 = vmatmul.mubr.bf16.gmra.mrb[4].mxu1 %v1249_v47  ;;  %v4166_v47 = vld [vmem:[%s4584_s19 + $0x3e4] ss:$16 sps:$4 sm:$0xff]  }
 0x1df   : > { %2129 = vmatprep.mubr.bf16.mxu0 %v1254_v26  ;;  %2515 = vmatprep.mubr.bf16.mxu1 %v1254_v26  ;;  %v4169_v26 = vld [vmem:[%s4584_s19 + $0x3ec] ss:$16 sps:$4 sm:$0xff]  }
 0x1e0   : > { %2275 = vmatpush1.bf16.msra.mxu0 %v4086_v57  ;;  %2661 = vmatpush1.bf16.msra.mxu1 %v4089_v0  ;;  %v4164_v57 = vld [vmem:[%s4584_s19 + $0x3e0] ss:$16 sps:$4 sm:$0xff]   ;;  %v4167_v0 = vld [vmem:[%s4584_s19 + $0x3e8] ss:$16 sps:$4 sm:$0xff]  }
 0x1e1   : > { %2276 = vmatprep.subr.bf16.mxu0 %v4094_v2  ;;  %2662 = vmatprep.subr.bf16.mxu1 %v4097_v27  ;;  %v1277_v2 = vld [vmem:[#allocation2 + $0x100] sm:$0xff]  ;;  %v1282_v27 = vld [vmem:[#allocation2 + $0x128] sm:$0xff] }
 0x1e4   : > { %2277 = vmatpush1.bf16.msra.mxu0 %v4092_v29  ;;  %2663 = vmatpush1.bf16.msra.mxu1 %v4095_v62  ;;  %v1281_v29 = vld [vmem:[#allocation2 + $0x120] sm:$0xff]  ;;  %v1286_v62 = vld [vmem:[#allocation2 + $0x148] sm:$0xff] }
 0x1e5   : > { %2278 = vmatprep.subr.bf16.mxu0 %v4100_v39  ;;  %2664 = vmatprep.subr.bf16.mxu1 %v4103_v43  ;;  %v1285_v39 = vld [vmem:[#allocation2 + $0x140] sm:$0xff]  ;;  %v1290_v43 = vld [vmem:[#allocation2 + $0x168] sm:$0xff] }
 0x1e6   : > { %2130 = vmatmul.mubr.bf16.gmra.mrb[8].mxu0 %v1253_v55  ;;  %2516 = vmatmul.mubr.bf16.gmra.mrb[8].mxu1 %v1253_v55  ;;  %v1289_v55 = vld [vmem:[#allocation2 + $0x160] sm:$0xff] }
 0x1e7   : > { %2139 = vmatprep.mubr.bf16.mxu0 %v1258_v7  ;;  %2525 = vmatprep.mubr.bf16.mxu1 %v1258_v7  ;;  %v1294_v7 = vld [vmem:[#allocation2 + $0x188] sm:$0xff] }
 0x1e8   : > { %2279 = vmatpush1.bf16.msra.mxu0 %v4098_v18  ;;  %2665 = vmatpush1.bf16.msra.mxu1 %v4101_v38  ;;  %v1293_v18 = vld [vmem:[#allocation2 + $0x180] sm:$0xff]  ;;  %v1298_v38 = vld [vmem:[#allocation2 + $0x1a8] sm:$0xff] }
 0x1e9   : > { %2280 = vmatprep.subr.bf16.mxu0 %v4106_v48  ;;  %2666 = vmatprep.subr.bf16.mxu1 %v4109_v58  ;;  %v1297_v48 = vld [vmem:[#allocation2 + $0x1a0] sm:$0xff]  ;;  %v1302_v58 = vld [vmem:[#allocation2 + $0x1c8] sm:$0xff] }
 0x1ec   : > { %2281 = vmatpush1.bf16.msra.mxu0 %v4104_v5  ;;  %2667 = vmatpush1.bf16.msra.mxu1 %v4107_v19  ;;  %v1301_v5 = vld [vmem:[#allocation2 + $0x1c0] sm:$0xff]  ;;  %v1306_v19 = vld [vmem:[#allocation2 + $0x1e8] sm:$0xff] }
 0x1ed   : > { %2282 = vmatprep.subr.bf16.mxu0 %v4112_v15  ;;  %2668 = vmatprep.subr.bf16.mxu1 %v4115_v60  ;;  %v1305_v15 = vld [vmem:[#allocation2 + $0x1e0] sm:$0xff]  ;;  %v1248_v60 = vld [vmem:[#allocation2 + $0x18] sm:$0xff] }
 0x1ee   : > { %2140 = vmatmul.mubr.bf16.gmra.mrb[12].mxu0 %v1257_v30  ;;  %2526 = vmatmul.mubr.bf16.gmra.mrb[12].mxu1 %v1257_v30  ;;  %v1247_v30 = vld [vmem:[#allocation2 + $0x10] sm:$0xff] }
 0x1ef   : > { %2149 = vmatprep.mubr.bf16.mxu0 %v1262_v23  ;;  %2535 = vmatprep.mubr.bf16.mxu1 %v1262_v23  ;;  %v1252_v23 = vld [vmem:[#allocation2 + $0x38] sm:$0xff] }
 0x1f0   : > { %2283 = vmatpush1.bf16.msra.mxu0 %v4110_v33  ;;  %2669 = vmatpush1.bf16.msra.mxu1 %v4113_v34  ;;  %v1251_v33 = vld [vmem:[#allocation2 + $0x30] sm:$0xff]  ;;  %v1256_v34 = vld [vmem:[#allocation2 + $0x58] sm:$0xff] }
 0x1f1   : > { %2284 = vmatprep.subr.bf16.mxu0 %v4118_v31  ;;  %2670 = vmatprep.subr.bf16.mxu1 %v4121_v40  ;;  %v1255_v31 = vld [vmem:[#allocation2 + $0x50] sm:$0xff]  ;;  %v1260_v40 = vld [vmem:[#allocation2 + $0x78] sm:$0xff] }
 0x1f4   : > { %2285 = vmatpush1.bf16.msra.mxu0 %v4116_v49  ;;  %2671 = vmatpush1.bf16.msra.mxu1 %v4119_v63  ;;  %v1259_v49 = vld [vmem:[#allocation2 + $0x70] sm:$0xff]  ;;  %v1264_v63 = vld [vmem:[#allocation2 + $0x98] sm:$0xff] }
 0x1f5   : > { %2286 = vmatprep.subr.bf16.mxu0 %v4124_v59  ;;  %2672 = vmatprep.subr.bf16.mxu1 %v4127_v3  ;;  %v1263_v59 = vld [vmem:[#allocation2 + $0x90] sm:$0xff]  ;;  %v1268_v3 = vld [vmem:[#allocation2 + $0xb8] sm:$0xff] }
 0x1f6   : > { %2150 = vmatmul.mubr.bf16.gmra.mrb[16].mxu0 %v1261_v4  ;;  %2536 = vmatmul.mubr.bf16.gmra.mrb[16].mxu1 %v1261_v4  ;;  %v1267_v4 = vld [vmem:[#allocation2 + $0xb0] sm:$0xff] }
 0x1f7   : > { %2159 = vmatprep.mubr.bf16.mxu0 %v1266_v42  ;;  %2545 = vmatprep.mubr.bf16.mxu1 %v1266_v42  ;;  %v1272_v42 = vld [vmem:[#allocation2 + $0xd8] sm:$0xff] }
 0x1f8   : > { %2287 = vmatpush1.bf16.msra.mxu0 %v4122_v28  ;;  %2673 = vmatpush1.bf16.msra.mxu1 %v4125_v61  ;;  %v1271_v28 = vld [vmem:[#allocation2 + $0xd0] sm:$0xff]  ;;  %v1276_v61 = vld [vmem:[#allocation2 + $0xf8] sm:$0xff] }
 0x1f9   : > { %2288 = vmatprep.subr.bf16.mxu0 %v4130_v51  ;;  %2674 = vmatprep.subr.bf16.mxu1 %v4133_v41  ;;  %v1275_v51 = vld [vmem:[#allocation2 + $0xf0] sm:$0xff]  ;;  %v1280_v41 = vld [vmem:[#allocation2 + $0x118] sm:$0xff] }
 0x1fc   : > { %2289 = vmatpush1.bf16.msra.mxu0 %v4128_v17  ;;  %2675 = vmatpush1.bf16.msra.mxu1 %v4131_v53  ;;  %v1279_v17 = vld [vmem:[#allocation2 + $0x110] sm:$0xff]  ;;  %v1284_v53 = vld [vmem:[#allocation2 + $0x138] sm:$0xff] }
 0x1fd   : > { %2290 = vmatprep.subr.bf16.mxu0 %v4136_v52  ;;  %2676 = vmatprep.subr.bf16.mxu1 %v4139_v54  ;;  %v1283_v52 = vld [vmem:[#allocation2 + $0x130] sm:$0xff]  ;;  %v1288_v54 = vld [vmem:[#allocation2 + $0x158] sm:$0xff] }
 0x1fe   : > { %2160 = vmatmul.mubr.bf16.gmra.mrb[20].mxu0 %v1265_v21  ;;  %2546 = vmatmul.mubr.bf16.gmra.mrb[20].mxu1 %v1265_v21  ;;  %v1287_v21 = vld [vmem:[#allocation2 + $0x150] sm:$0xff] }
 0x1ff   : > { %2169 = vmatprep.mubr.bf16.mxu0 %v1270_v22  ;;  %2555 = vmatprep.mubr.bf16.mxu1 %v1270_v22  ;;  %v1292_v22 = vld [vmem:[#allocation2 + $0x178] sm:$0xff] }
 0x200   : > { %2291 = vmatpush1.bf16.msra.mxu0 %v4134_v14  ;;  %2677 = vmatpush1.bf16.msra.mxu1 %v4137_v24  ;;  %v1291_v14 = vld [vmem:[#allocation2 + $0x170] sm:$0xff]  ;;  %v1296_v24 = vld [vmem:[#allocation2 + $0x198] sm:$0xff] }
 0x201   : > { %2292 = vmatprep.subr.bf16.mxu0 %v4142_v11  ;;  %2678 = vmatprep.subr.bf16.mxu1 %v4145_v12  ;;  %v1295_v11 = vld [vmem:[#allocation2 + $0x190] sm:$0xff]  ;;  %v1300_v12 = vld [vmem:[#allocation2 + $0x1b8] sm:$0xff] }
 0x204   : > { %2293 = vmatpush1.bf16.msra.mxu0 %v4140_v6  ;;  %2679 = vmatpush1.bf16.msra.mxu1 %v4143_v56  ;;  %v1299_v6 = vld [vmem:[#allocation2 + $0x1b0] sm:$0xff]  ;;  %v1304_v56 = vld [vmem:[#allocation2 + $0x1d8] sm:$0xff] }
 0x205   : > { %2294 = vmatprep.subr.bf16.mxu0 %v4148_v32  ;;  %2680 = vmatprep.subr.bf16.mxu1 %v4151_v1  ;;  %v1303_v32 = vld [vmem:[#allocation2 + $0x1d0] sm:$0xff]  ;;  %v1308_v1 = vld [vmem:[#allocation2 + $0x1f8] sm:$0xff] }
 0x206   : > { %2170 = vmatmul.mubr.bf16.gmra.mrb[24].mxu0 %v1269_v35  ;;  %2556 = vmatmul.mubr.bf16.gmra.mrb[24].mxu1 %v1269_v35  ;;  %v1307_v35 = vld [vmem:[#allocation2 + $0x1f0] sm:$0xff] }
 0x207   : > { %2179 = vmatprep.mubr.bf16.mxu0 %v1274_v45  ;;  %2565 = vmatprep.mubr.bf16.mxu1 %v1274_v45 }
 0x208   : > { %2295 = vmatpush1.bf16.msra.mxu0 %v4146_v16  ;;  %2681 = vmatpush1.bf16.msra.mxu1 %v4149_v20 }
 0x209   : > { %2296 = vmatprep.subr.bf16.mxu0 %v4154_v13  ;;  %2682 = vmatprep.subr.bf16.mxu1 %v4157_v46 }
 0x20c   : > { %2297 = vmatpush1.bf16.msra.mxu0 %v4152_v8  ;;  %2683 = vmatpush1.bf16.msra.mxu1 %v4155_v9 }
 0x20d   : > { %2298 = vmatprep.subr.bf16.mxu0 %v4160_v10  ;;  %2684 = vmatprep.subr.bf16.mxu1 %v4163_v50 }
 0x20e   : > { %2180 = vmatmul.mubr.bf16.gmra.mrb[28].mxu0 %v1273_v25  ;;  %2566 = vmatmul.mubr.bf16.gmra.mrb[28].mxu1 %v1273_v25 }
 0x20f   : > { %2189 = vmatprep.mubr.bf16.mxu0 %v1278_v36  ;;  %2575 = vmatprep.mubr.bf16.mxu1 %v1278_v36 }
 0x210   : > { %2299 = vmatpush1.bf16.msra.mxu0 %v4158_v37  ;;  %2685 = vmatpush1.bf16.msra.mxu1 %v4161_v44 }
 0x211   : > { %2300 = vmatprep.subr.bf16.mxu0 %v4166_v47  ;;  %2686 = vmatprep.subr.bf16.mxu1 %v4169_v26 }
 0x214   : > { %2301 = vmatpush1.bf16.msra.mxu0 %v4164_v57  ;;  %2687 = vmatpush1.bf16.msra.mxu1 %v4167_v0 }
 0x216   : > { %2190 = vmatmul.mubr.bf16.gmra.mrb[32].mxu0 %v1277_v2  ;;  %2576 = vmatmul.mubr.bf16.gmra.mrb[32].mxu1 %v1277_v2 }
 0x217   : > { %2199 = vmatprep.mubr.bf16.mxu0 %v1282_v27  ;;  %2585 = vmatprep.mubr.bf16.mxu1 %v1282_v27 }
 0x21e   : > { %2200 = vmatmul.mubr.bf16.gmra.mrb[36].mxu0 %v1281_v29  ;;  %2586 = vmatmul.mubr.bf16.gmra.mrb[36].mxu1 %v1281_v29 }
 0x21f   : > { %2209 = vmatprep.mubr.bf16.mxu0 %v1286_v62  ;;  %2595 = vmatprep.mubr.bf16.mxu1 %v1286_v62 }
 0x226   : > { %2210 = vmatmul.mubr.bf16.gmra.mrb[40].mxu0 %v1285_v39  ;;  %2596 = vmatmul.mubr.bf16.gmra.mrb[40].mxu1 %v1285_v39 }
 0x227   : > { %2219 = vmatprep.mubr.bf16.mxu0 %v1290_v43  ;;  %2605 = vmatprep.mubr.bf16.mxu1 %v1290_v43 }
 0x22e   : > { %2220 = vmatmul.mubr.bf16.gmra.mrb[44].mxu0 %v1289_v55  ;;  %2606 = vmatmul.mubr.bf16.gmra.mrb[44].mxu1 %v1289_v55 }
 0x22f   : > { %2229 = vmatprep.mubr.bf16.mxu0 %v1294_v7  ;;  %2615 = vmatprep.mubr.bf16.mxu1 %v1294_v7 }
 0x236   : > { %2230 = vmatmul.mubr.bf16.gmra.mrb[48].mxu0 %v1293_v18  ;;  %2616 = vmatmul.mubr.bf16.gmra.mrb[48].mxu1 %v1293_v18 }
 0x237   : > { %2239 = vmatprep.mubr.bf16.mxu0 %v1298_v38  ;;  %2625 = vmatprep.mubr.bf16.mxu1 %v1298_v38 }
 0x23e   : > { %2240 = vmatmul.mubr.bf16.gmra.mrb[52].mxu0 %v1297_v48  ;;  %2626 = vmatmul.mubr.bf16.gmra.mrb[52].mxu1 %v1297_v48 }
 0x23f   : > { %2249 = vmatprep.mubr.bf16.mxu0 %v1302_v58  ;;  %2635 = vmatprep.mubr.bf16.mxu1 %v1302_v58 }
 0x246   : > { %2250 = vmatmul.mubr.bf16.gmra.mrb[56].mxu0 %v1301_v5  ;;  %2636 = vmatmul.mubr.bf16.gmra.mrb[56].mxu1 %v1301_v5 }
 0x247   : > { %2259 = vmatprep.mubr.bf16.mxu0 %v1306_v19  ;;  %2645 = vmatprep.mubr.bf16.mxu1 %v1306_v19 }
 0x24e   : > { %2260 = vmatmul.mubr.bf16.gmra.mrb[60].mxu0 %v1305_v15  ;;  %2646 = vmatmul.mubr.bf16.gmra.mrb[60].mxu1 %v1305_v15 }
 0x24f   : > { %2302 = vmatprep.mubr.bf16.mxu0 %v1248_v60  ;;  %2688 = vmatprep.mubr.bf16.mxu1 %v1248_v60 }
 0x256   : > { %2303 = vmatmul.mubr.bf16.vlgmr.msra.gmra.mrb[0].mxu0 %v1247_v30  ;;  %2689 = vmatmul.mubr.bf16.vlgmr.msra.gmra.mrb[0].mxu1 %v1247_v30 }
 0x257   : > { %2312 = vmatprep.mubr.bf16.mxu0 %v1252_v23  ;;  %2698 = vmatprep.mubr.bf16.mxu1 %v1252_v23 }
 0x25e   : > { %2313 = vmatmul.mubr.bf16.gmra.mrb[4].mxu0 %v1251_v33  ;;  %2699 = vmatmul.mubr.bf16.gmra.mrb[4].mxu1 %v1251_v33 }
 0x25f   : > { %2322 = vmatprep.mubr.bf16.mxu0 %v1256_v34  ;;  %2708 = vmatprep.mubr.bf16.mxu1 %v1256_v34 }
 0x266   : > { %2323 = vmatmul.mubr.bf16.gmra.mrb[8].mxu0 %v1255_v31  ;;  %2709 = vmatmul.mubr.bf16.gmra.mrb[8].mxu1 %v1255_v31 }
 0x267   : > { %2332 = vmatprep.mubr.bf16.mxu0 %v1260_v40  ;;  %2718 = vmatprep.mubr.bf16.mxu1 %v1260_v40 }
 0x26e   : > { %2333 = vmatmul.mubr.bf16.gmra.mrb[12].mxu0 %v1259_v49  ;;  %2719 = vmatmul.mubr.bf16.gmra.mrb[12].mxu1 %v1259_v49 }
 0x26f   : > { %2342 = vmatprep.mubr.bf16.mxu0 %v1264_v63  ;;  %2728 = vmatprep.mubr.bf16.mxu1 %v1264_v63 }
 0x276   : > { %2343 = vmatmul.mubr.bf16.gmra.mrb[16].mxu0 %v1263_v59  ;;  %2729 = vmatmul.mubr.bf16.gmra.mrb[16].mxu1 %v1263_v59 }
 0x277   : > { %2352 = vmatprep.mubr.bf16.mxu0 %v1268_v3  ;;  %2738 = vmatprep.mubr.bf16.mxu1 %v1268_v3 }
 0x27e   : > { %2353 = vmatmul.mubr.bf16.gmra.mrb[20].mxu0 %v1267_v4  ;;  %2739 = vmatmul.mubr.bf16.gmra.mrb[20].mxu1 %v1267_v4 }
 0x27f   : > { %2362 = vmatprep.mubr.bf16.mxu0 %v1272_v42  ;;  %2748 = vmatprep.mubr.bf16.mxu1 %v1272_v42 }
 0x286   : > { %2363 = vmatmul.mubr.bf16.gmra.mrb[24].mxu0 %v1271_v28  ;;  %2749 = vmatmul.mubr.bf16.gmra.mrb[24].mxu1 %v1271_v28 }
 0x287   : > { %2372 = vmatprep.mubr.bf16.mxu0 %v1276_v61  ;;  %2758 = vmatprep.mubr.bf16.mxu1 %v1276_v61 }
 0x28e   : > { %2373 = vmatmul.mubr.bf16.gmra.mrb[28].mxu0 %v1275_v51  ;;  %2759 = vmatmul.mubr.bf16.gmra.mrb[28].mxu1 %v1275_v51 }
 0x28f   : > { %2382 = vmatprep.mubr.bf16.mxu0 %v1280_v41  ;;  %2768 = vmatprep.mubr.bf16.mxu1 %v1280_v41 }
 0x296   : > { %2383 = vmatmul.mubr.bf16.gmra.mrb[32].mxu0 %v1279_v17  ;;  %2769 = vmatmul.mubr.bf16.gmra.mrb[32].mxu1 %v1279_v17 }
 0x297   : > { %2392 = vmatprep.mubr.bf16.mxu0 %v1284_v53  ;;  %2778 = vmatprep.mubr.bf16.mxu1 %v1284_v53 }
 0x29e   : > { %2393 = vmatmul.mubr.bf16.gmra.mrb[36].mxu0 %v1283_v52  ;;  %2779 = vmatmul.mubr.bf16.gmra.mrb[36].mxu1 %v1283_v52 }
 0x29f   : > { %2402 = vmatprep.mubr.bf16.mxu0 %v1288_v54  ;;  %2788 = vmatprep.mubr.bf16.mxu1 %v1288_v54 }
 0x2a6   : > { %2403 = vmatmul.mubr.bf16.gmra.mrb[40].mxu0 %v1287_v21  ;;  %2789 = vmatmul.mubr.bf16.gmra.mrb[40].mxu1 %v1287_v21 }
 0x2a7   : > { %2412 = vmatprep.mubr.bf16.mxu0 %v1292_v22  ;;  %2798 = vmatprep.mubr.bf16.mxu1 %v1292_v22 }
 0x2ae   : > { %2413 = vmatmul.mubr.bf16.gmra.mrb[44].mxu0 %v1291_v14  ;;  %2799 = vmatmul.mubr.bf16.gmra.mrb[44].mxu1 %v1291_v14 }
 0x2af   : > { %2422 = vmatprep.mubr.bf16.mxu0 %v1296_v24  ;;  %2808 = vmatprep.mubr.bf16.mxu1 %v1296_v24 }
 0x2b6   : > { %2423 = vmatmul.mubr.bf16.gmra.mrb[48].mxu0 %v1295_v11  ;;  %2809 = vmatmul.mubr.bf16.gmra.mrb[48].mxu1 %v1295_v11 }
 0x2b7   : > { %2432 = vmatprep.mubr.bf16.mxu0 %v1300_v12  ;;  %2818 = vmatprep.mubr.bf16.mxu1 %v1300_v12 }
 0x2be   : > { %2433 = vmatmul.mubr.bf16.gmra.mrb[52].mxu0 %v1299_v6  ;;  %2819 = vmatmul.mubr.bf16.gmra.mrb[52].mxu1 %v1299_v6 }
 0x2bf   : > { %2442 = vmatprep.mubr.bf16.mxu0 %v1304_v56  ;;  %2828 = vmatprep.mubr.bf16.mxu1 %v1304_v56 }
 0x2c6   : > { %2443 = vmatmul.mubr.bf16.gmra.mrb[56].mxu0 %v1303_v32  ;;  %2829 = vmatmul.mubr.bf16.gmra.mrb[56].mxu1 %v1303_v32 }
 0x2c7   : > { %2452 = vmatprep.mubr.bf16.mxu0 %v1308_v1  ;;  %2838 = vmatprep.mubr.bf16.mxu1 %v1308_v1 }
 0x2ce   : > { %2453 = vmatmul.mubr.bf16.gmra.mrb[60].mxu0 %v1307_v35  ;;  %2839 = vmatmul.mubr.bf16.gmra.mrb[60].mxu1 %v1307_v35 }
 0x329   : > { %v2304_v45 = vpop.f32.mrb[0].mxu0  ;;  %v2690_v16 = vpop.f32.mrb[0].mxu1 }
 0x32a   : > { %v2306_v20 = vpop.f32.mrb[1].mxu0  ;;  %v2692_v13 = vpop.f32.mrb[1].mxu1 }
 0x32b   : > { %v3632_v46 = vpack.c.bf16 %v2306_v20, %v2304_v45  ;;  %v3633_v8 = vpack.c.bf16 %v2692_v13, %v2690_v16  ;;  %v2308_v9 = vpop.f32.mrb[2].mxu0  ;;  %v2694_v10 = vpop.f32.mrb[2].mxu1 }
 0x32c   : > { %v2310_v50 = vpop.f32.mrb[3].mxu0  ;;  %v2696_v25 = vpop.f32.mrb[3].mxu1 }
 0x32d   : > { %3233 = vst [vmem:[%s4591_s28] sm:$0xff] %v3632_v46  ;;  %3234 = vst [vmem:[%s4591_s28 + $0x8] sm:$0xff] %v3633_v8  ;;  %v3634_v36 = vpack.c.bf16 %v2310_v50, %v2308_v9  ;;  %v3635_v37 = vpack.c.bf16 %v2696_v25, %v2694_v10 }
 0x32f   : > { %3235 = vst [vmem:[%s4591_s28 + $0x10] sm:$0xff] %v3634_v36  ;;  %3236 = vst [vmem:[%s4591_s28 + $0x18] sm:$0xff] %v3635_v37 }
 0x331   : > { %v2314_v44 = vpop.f32.mrb[4].mxu0  ;;  %v2700_v47 = vpop.f32.mrb[4].mxu1 }
 0x332   : > { %v2316_v26 = vpop.f32.mrb[5].mxu0  ;;  %v2702_v57 = vpop.f32.mrb[5].mxu1 }
 0x333   : > { %v3636_v0 = vpack.c.bf16 %v2316_v26, %v2314_v44  ;;  %v3637_v2 = vpack.c.bf16 %v2702_v57, %v2700_v47  ;;  %v2318_v27 = vpop.f32.mrb[6].mxu0  ;;  %v2704_v29 = vpop.f32.mrb[6].mxu1 }
 0x334   : > { %v2320_v62 = vpop.f32.mrb[7].mxu0  ;;  %v2706_v39 = vpop.f32.mrb[7].mxu1 }
 0x335   : > { %3237 = vst [vmem:[%s4591_s28 + $0x20] sm:$0xff] %v3636_v0  ;;  %3238 = vst [vmem:[%s4591_s28 + $0x28] sm:$0xff] %v3637_v2  ;;  %v3638_v43 = vpack.c.bf16 %v2320_v62, %v2318_v27  ;;  %v3639_v55 = vpack.c.bf16 %v2706_v39, %v2704_v29 }
 0x337   : > { %3239 = vst [vmem:[%s4591_s28 + $0x30] sm:$0xff] %v3638_v43  ;;  %3240 = vst [vmem:[%s4591_s28 + $0x38] sm:$0xff] %v3639_v55 }
 0x339   : > { %v2324_v7 = vpop.f32.mrb[8].mxu0  ;;  %v2710_v18 = vpop.f32.mrb[8].mxu1 }
 0x33a   : > { %v2326_v38 = vpop.f32.mrb[9].mxu0  ;;  %v2712_v48 = vpop.f32.mrb[9].mxu1 }
 0x33b   : > { %v3640_v58 = vpack.c.bf16 %v2326_v38, %v2324_v7  ;;  %v3641_v5 = vpack.c.bf16 %v2712_v48, %v2710_v18  ;;  %v2328_v19 = vpop.f32.mrb[10].mxu0  ;;  %v2714_v15 = vpop.f32.mrb[10].mxu1 }
 0x33c   : > { %v2330_v60 = vpop.f32.mrb[11].mxu0  ;;  %v2716_v30 = vpop.f32.mrb[11].mxu1 }
 0x33d   : > { %3241 = vst [vmem:[%s4591_s28 + $0x40] sm:$0xff] %v3640_v58  ;;  %3242 = vst [vmem:[%s4591_s28 + $0x48] sm:$0xff] %v3641_v5  ;;  %v3642_v23 = vpack.c.bf16 %v2330_v60, %v2328_v19  ;;  %v3643_v33 = vpack.c.bf16 %v2716_v30, %v2714_v15 }
 0x33f   : > { %3243 = vst [vmem:[%s4591_s28 + $0x50] sm:$0xff] %v3642_v23  ;;  %3244 = vst [vmem:[%s4591_s28 + $0x58] sm:$0xff] %v3643_v33 }
 0x341   : > { %v2334_v34 = vpop.f32.mrb[12].mxu0  ;;  %v2720_v31 = vpop.f32.mrb[12].mxu1 }
 0x342   : > { %v2336_v40 = vpop.f32.mrb[13].mxu0  ;;  %v2722_v49 = vpop.f32.mrb[13].mxu1 }
 0x343   : > { %v3644_v63 = vpack.c.bf16 %v2336_v40, %v2334_v34  ;;  %v3645_v59 = vpack.c.bf16 %v2722_v49, %v2720_v31  ;;  %v2338_v3 = vpop.f32.mrb[14].mxu0  ;;  %v2724_v4 = vpop.f32.mrb[14].mxu1 }
 0x344   : > { %v2340_v42 = vpop.f32.mrb[15].mxu0  ;;  %v2726_v28 = vpop.f32.mrb[15].mxu1 }
 0x345   : > { %3245 = vst [vmem:[%s4591_s28 + $0x60] sm:$0xff] %v3644_v63  ;;  %3246 = vst [vmem:[%s4591_s28 + $0x68] sm:$0xff] %v3645_v59  ;;  %v3646_v61 = vpack.c.bf16 %v2340_v42, %v2338_v3  ;;  %v3647_v51 = vpack.c.bf16 %v2726_v28, %v2724_v4 }
 0x347   : > { %3247 = vst [vmem:[%s4591_s28 + $0x70] sm:$0xff] %v3646_v61  ;;  %3248 = vst [vmem:[%s4591_s28 + $0x78] sm:$0xff] %v3647_v51 }
 0x349   : > { %v2344_v41 = vpop.f32.mrb[16].mxu0  ;;  %v2730_v17 = vpop.f32.mrb[16].mxu1 }
 0x34a   : > { %v2346_v53 = vpop.f32.mrb[17].mxu0  ;;  %v2732_v52 = vpop.f32.mrb[17].mxu1 }
 0x34b   : > { %v3648_v54 = vpack.c.bf16 %v2346_v53, %v2344_v41  ;;  %v3649_v21 = vpack.c.bf16 %v2732_v52, %v2730_v17  ;;  %v2348_v22 = vpop.f32.mrb[18].mxu0  ;;  %v2734_v14 = vpop.f32.mrb[18].mxu1 }
 0x34c   : > { %v2350_v24 = vpop.f32.mrb[19].mxu0  ;;  %v2736_v11 = vpop.f32.mrb[19].mxu1 }
 0x34d   : > { %3249 = vst [vmem:[%s4591_s28 + $0x80] sm:$0xff] %v3648_v54  ;;  %3250 = vst [vmem:[%s4591_s28 + $0x88] sm:$0xff] %v3649_v21  ;;  %v3650_v12 = vpack.c.bf16 %v2350_v24, %v2348_v22  ;;  %v3651_v6 = vpack.c.bf16 %v2736_v11, %v2734_v14 }
 0x34f   : > { %3251 = vst [vmem:[%s4591_s28 + $0x90] sm:$0xff] %v3650_v12  ;;  %3252 = vst [vmem:[%s4591_s28 + $0x98] sm:$0xff] %v3651_v6 }
 0x351   : > { %v2354_v56 = vpop.f32.mrb[20].mxu0  ;;  %v2740_v32 = vpop.f32.mrb[20].mxu1 }
 0x352   : > { %v2356_v1 = vpop.f32.mrb[21].mxu0  ;;  %v2742_v35 = vpop.f32.mrb[21].mxu1 }
 0x353   : > { %v3652_v45 = vpack.c.bf16 %v2356_v1, %v2354_v56  ;;  %v3653_v16 = vpack.c.bf16 %v2742_v35, %v2740_v32  ;;  %v2358_v20 = vpop.f32.mrb[22].mxu0  ;;  %v2744_v13 = vpop.f32.mrb[22].mxu1 }
 0x354   : > { %v2360_v46 = vpop.f32.mrb[23].mxu0  ;;  %v2746_v8 = vpop.f32.mrb[23].mxu1 }
 0x355   : > { %3253 = vst [vmem:[%s4591_s28 + $0xa0] sm:$0xff] %v3652_v45  ;;  %3254 = vst [vmem:[%s4591_s28 + $0xa8] sm:$0xff] %v3653_v16  ;;  %v3654_v9 = vpack.c.bf16 %v2360_v46, %v2358_v20  ;;  %v3655_v10 = vpack.c.bf16 %v2746_v8, %v2744_v13 }
 0x357   : > { %3255 = vst [vmem:[%s4591_s28 + $0xb0] sm:$0xff] %v3654_v9  ;;  %3256 = vst [vmem:[%s4591_s28 + $0xb8] sm:$0xff] %v3655_v10 }
 0x359   : > { %v2364_v50 = vpop.f32.mrb[24].mxu0  ;;  %v2750_v25 = vpop.f32.mrb[24].mxu1 }
 0x35a   : > { %v2366_v36 = vpop.f32.mrb[25].mxu0  ;;  %v2752_v37 = vpop.f32.mrb[25].mxu1 }
 0x35b   : > { %v3656_v44 = vpack.c.bf16 %v2366_v36, %v2364_v50  ;;  %v3657_v47 = vpack.c.bf16 %v2752_v37, %v2750_v25  ;;  %v2368_v26 = vpop.f32.mrb[26].mxu0  ;;  %v2754_v57 = vpop.f32.mrb[26].mxu1 }
 0x35c   : > { %v2370_v0 = vpop.f32.mrb[27].mxu0  ;;  %v2756_v2 = vpop.f32.mrb[27].mxu1 }
 0x35d   : > { %3257 = vst [vmem:[%s4591_s28 + $0xc0] sm:$0xff] %v3656_v44  ;;  %3258 = vst [vmem:[%s4591_s28 + $0xc8] sm:$0xff] %v3657_v47  ;;  %v3658_v27 = vpack.c.bf16 %v2370_v0, %v2368_v26  ;;  %v3659_v29 = vpack.c.bf16 %v2756_v2, %v2754_v57 }
 0x35f   : > { %3259 = vst [vmem:[%s4591_s28 + $0xd0] sm:$0xff] %v3658_v27  ;;  %3260 = vst [vmem:[%s4591_s28 + $0xd8] sm:$0xff] %v3659_v29 }
 0x361   : > { %v2374_v62 = vpop.f32.mrb[28].mxu0  ;;  %v2760_v39 = vpop.f32.mrb[28].mxu1 }
 0x362   : > { %v2376_v43 = vpop.f32.mrb[29].mxu0  ;;  %v2762_v55 = vpop.f32.mrb[29].mxu1 }
 0x363   : > { %v3660_v7 = vpack.c.bf16 %v2376_v43, %v2374_v62  ;;  %v3661_v18 = vpack.c.bf16 %v2762_v55, %v2760_v39  ;;  %v2378_v38 = vpop.f32.mrb[30].mxu0  ;;  %v2764_v48 = vpop.f32.mrb[30].mxu1 }
 0x364   : > { %v2380_v58 = vpop.f32.mrb[31].mxu0  ;;  %v2766_v5 = vpop.f32.mrb[31].mxu1 }
 0x365   : > { %3261 = vst [vmem:[%s4591_s28 + $0xe0] sm:$0xff] %v3660_v7  ;;  %3262 = vst [vmem:[%s4591_s28 + $0xe8] sm:$0xff] %v3661_v18  ;;  %v3662_v19 = vpack.c.bf16 %v2380_v58, %v2378_v38  ;;  %v3663_v15 = vpack.c.bf16 %v2766_v5, %v2764_v48 }
 0x367   : > { %3263 = vst [vmem:[%s4591_s28 + $0xf0] sm:$0xff] %v3662_v19  ;;  %3264 = vst [vmem:[%s4591_s28 + $0xf8] sm:$0xff] %v3663_v15 }
 0x369   : > { %v2384_v60 = vpop.f32.mrb[32].mxu0  ;;  %v2770_v30 = vpop.f32.mrb[32].mxu1 }
 0x36a   : > { %v2386_v23 = vpop.f32.mrb[33].mxu0  ;;  %v2772_v33 = vpop.f32.mrb[33].mxu1 }
 0x36b   : > { %v3664_v34 = vpack.c.bf16 %v2386_v23, %v2384_v60  ;;  %v3665_v31 = vpack.c.bf16 %v2772_v33, %v2770_v30  ;;  %v2388_v40 = vpop.f32.mrb[34].mxu0  ;;  %v2774_v49 = vpop.f32.mrb[34].mxu1 }
 0x36c   : > { %v2390_v63 = vpop.f32.mrb[35].mxu0  ;;  %v2776_v59 = vpop.f32.mrb[35].mxu1 }
 0x36d   : > { %3265 = vst [vmem:[%s4591_s28 + $0x100] sm:$0xff] %v3664_v34  ;;  %3266 = vst [vmem:[%s4591_s28 + $0x108] sm:$0xff] %v3665_v31  ;;  %v3666_v3 = vpack.c.bf16 %v2390_v63, %v2388_v40  ;;  %v3667_v4 = vpack.c.bf16 %v2776_v59, %v2774_v49 }
 0x36f   : > { %3267 = vst [vmem:[%s4591_s28 + $0x110] sm:$0xff] %v3666_v3  ;;  %3268 = vst [vmem:[%s4591_s28 + $0x118] sm:$0xff] %v3667_v4 }
 0x371   : > { %v2394_v42 = vpop.f32.mrb[36].mxu0  ;;  %v2780_v28 = vpop.f32.mrb[36].mxu1 }
 0x372   : > { %v2396_v61 = vpop.f32.mrb[37].mxu0  ;;  %v2782_v51 = vpop.f32.mrb[37].mxu1 }
 0x373   : > { %v3668_v41 = vpack.c.bf16 %v2396_v61, %v2394_v42  ;;  %v3669_v17 = vpack.c.bf16 %v2782_v51, %v2780_v28  ;;  %v2398_v53 = vpop.f32.mrb[38].mxu0  ;;  %v2784_v52 = vpop.f32.mrb[38].mxu1 }
 0x374   : > { %v2400_v54 = vpop.f32.mrb[39].mxu0  ;;  %v2786_v21 = vpop.f32.mrb[39].mxu1 }
 0x375   : > { %3269 = vst [vmem:[%s4591_s28 + $0x120] sm:$0xff] %v3668_v41  ;;  %3270 = vst [vmem:[%s4591_s28 + $0x128] sm:$0xff] %v3669_v17  ;;  %v3670_v22 = vpack.c.bf16 %v2400_v54, %v2398_v53  ;;  %v3671_v14 = vpack.c.bf16 %v2786_v21, %v2784_v52 }
 0x377   : > { %3271 = vst [vmem:[%s4591_s28 + $0x130] sm:$0xff] %v3670_v22  ;;  %3272 = vst [vmem:[%s4591_s28 + $0x138] sm:$0xff] %v3671_v14 }
 0x379   : > { %v2404_v24 = vpop.f32.mrb[40].mxu0  ;;  %v2790_v11 = vpop.f32.mrb[40].mxu1 }
 0x37a   : > { %v2406_v12 = vpop.f32.mrb[41].mxu0  ;;  %v2792_v6 = vpop.f32.mrb[41].mxu1 }
 0x37b   : > { %v3672_v56 = vpack.c.bf16 %v2406_v12, %v2404_v24  ;;  %v3673_v32 = vpack.c.bf16 %v2792_v6, %v2790_v11  ;;  %v2408_v1 = vpop.f32.mrb[42].mxu0  ;;  %v2794_v35 = vpop.f32.mrb[42].mxu1 }
 0x37c   : > { %v2410_v45 = vpop.f32.mrb[43].mxu0  ;;  %v2796_v16 = vpop.f32.mrb[43].mxu1 }
 0x37d   : > { %3273 = vst [vmem:[%s4591_s28 + $0x140] sm:$0xff] %v3672_v56  ;;  %3274 = vst [vmem:[%s4591_s28 + $0x148] sm:$0xff] %v3673_v32  ;;  %v3674_v20 = vpack.c.bf16 %v2410_v45, %v2408_v1  ;;  %v3675_v13 = vpack.c.bf16 %v2796_v16, %v2794_v35 }
 0x37f   : > { %3275 = vst [vmem:[%s4591_s28 + $0x150] sm:$0xff] %v3674_v20  ;;  %3276 = vst [vmem:[%s4591_s28 + $0x158] sm:$0xff] %v3675_v13 }
 0x381   : > { %v2414_v46 = vpop.f32.mrb[44].mxu0  ;;  %v2800_v8 = vpop.f32.mrb[44].mxu1 }
 0x382   : > { %v2416_v9 = vpop.f32.mrb[45].mxu0  ;;  %v2802_v10 = vpop.f32.mrb[45].mxu1 }
 0x383   : > { %v3676_v50 = vpack.c.bf16 %v2416_v9, %v2414_v46  ;;  %v3677_v25 = vpack.c.bf16 %v2802_v10, %v2800_v8  ;;  %v2418_v36 = vpop.f32.mrb[46].mxu0  ;;  %v2804_v37 = vpop.f32.mrb[46].mxu1 }
 0x384   : > { %v2420_v44 = vpop.f32.mrb[47].mxu0  ;;  %v2806_v47 = vpop.f32.mrb[47].mxu1 }
 0x385   : > { %3277 = vst [vmem:[%s4591_s28 + $0x160] sm:$0xff] %v3676_v50  ;;  %3278 = vst [vmem:[%s4591_s28 + $0x168] sm:$0xff] %v3677_v25  ;;  %v3678_v26 = vpack.c.bf16 %v2420_v44, %v2418_v36  ;;  %v3679_v57 = vpack.c.bf16 %v2806_v47, %v2804_v37 }
 0x387   : > { %3279 = vst [vmem:[%s4591_s28 + $0x170] sm:$0xff] %v3678_v26  ;;  %3280 = vst [vmem:[%s4591_s28 + $0x178] sm:$0xff] %v3679_v57 }
 0x389   : > { %v2424_v0 = vpop.f32.mrb[48].mxu0  ;;  %v2810_v2 = vpop.f32.mrb[48].mxu1 }
 0x38a   : > { %v2426_v27 = vpop.f32.mrb[49].mxu0  ;;  %v2812_v29 = vpop.f32.mrb[49].mxu1 }
 0x38b   : > { %v3680_v62 = vpack.c.bf16 %v2426_v27, %v2424_v0  ;;  %v3681_v39 = vpack.c.bf16 %v2812_v29, %v2810_v2  ;;  %v2428_v43 = vpop.f32.mrb[50].mxu0  ;;  %v2814_v55 = vpop.f32.mrb[50].mxu1 }
 0x38c   : > { %v2430_v7 = vpop.f32.mrb[51].mxu0  ;;  %v2816_v18 = vpop.f32.mrb[51].mxu1 }
 0x38d   : > { %3281 = vst [vmem:[%s4591_s28 + $0x180] sm:$0xff] %v3680_v62  ;;  %3282 = vst [vmem:[%s4591_s28 + $0x188] sm:$0xff] %v3681_v39  ;;  %v3682_v38 = vpack.c.bf16 %v2430_v7, %v2428_v43  ;;  %v3683_v48 = vpack.c.bf16 %v2816_v18, %v2814_v55 }
 0x38f   : > { %3283 = vst [vmem:[%s4591_s28 + $0x190] sm:$0xff] %v3682_v38  ;;  %3284 = vst [vmem:[%s4591_s28 + $0x198] sm:$0xff] %v3683_v48 }
 0x391   : > { %v2434_v58 = vpop.f32.mrb[52].mxu0  ;;  %v2820_v5 = vpop.f32.mrb[52].mxu1 }
 0x392   : > { %v2436_v19 = vpop.f32.mrb[53].mxu0  ;;  %v2822_v15 = vpop.f32.mrb[53].mxu1 }
 0x393   : > { %v3684_v60 = vpack.c.bf16 %v2436_v19, %v2434_v58  ;;  %v3685_v30 = vpack.c.bf16 %v2822_v15, %v2820_v5  ;;  %v2438_v23 = vpop.f32.mrb[54].mxu0  ;;  %v2824_v33 = vpop.f32.mrb[54].mxu1 }
 0x394   : > { %v2440_v34 = vpop.f32.mrb[55].mxu0  ;;  %v2826_v31 = vpop.f32.mrb[55].mxu1 }
 0x395   : > { %3285 = vst [vmem:[%s4591_s28 + $0x1a0] sm:$0xff] %v3684_v60  ;;  %3286 = vst [vmem:[%s4591_s28 + $0x1a8] sm:$0xff] %v3685_v30  ;;  %v3686_v40 = vpack.c.bf16 %v2440_v34, %v2438_v23  ;;  %v3687_v49 = vpack.c.bf16 %v2826_v31, %v2824_v33 }
 0x397   : > { %3287 = vst [vmem:[%s4591_s28 + $0x1b0] sm:$0xff] %v3686_v40  ;;  %3288 = vst [vmem:[%s4591_s28 + $0x1b8] sm:$0xff] %v3687_v49 }
 0x399   : > { %v2444_v63 = vpop.f32.mrb[56].mxu0  ;;  %v2830_v59 = vpop.f32.mrb[56].mxu1 }
 0x39a   : > { %v2446_v3 = vpop.f32.mrb[57].mxu0  ;;  %v2832_v4 = vpop.f32.mrb[57].mxu1 }
 0x39b   : > { %v3688_v42 = vpack.c.bf16 %v2446_v3, %v2444_v63  ;;  %v3689_v28 = vpack.c.bf16 %v2832_v4, %v2830_v59  ;;  %v2448_v61 = vpop.f32.mrb[58].mxu0  ;;  %v2834_v51 = vpop.f32.mrb[58].mxu1 }
 0x39c   : > { %v2450_v41 = vpop.f32.mrb[59].mxu0  ;;  %v2836_v17 = vpop.f32.mrb[59].mxu1 }
 0x39d   : > { %3289 = vst [vmem:[%s4591_s28 + $0x1c0] sm:$0xff] %v3688_v42  ;;  %3290 = vst [vmem:[%s4591_s28 + $0x1c8] sm:$0xff] %v3689_v28  ;;  %v3690_v53 = vpack.c.bf16 %v2450_v41, %v2448_v61  ;;  %v3691_v52 = vpack.c.bf16 %v2836_v17, %v2834_v51 }
 0x39f   : > { %3291 = vst [vmem:[%s4591_s28 + $0x1d0] sm:$0xff] %v3690_v53  ;;  %3292 = vst [vmem:[%s4591_s28 + $0x1d8] sm:$0xff] %v3691_v52 }
 0x3a1   : > { %v2454_v54 = vpop.f32.mrb[60].mxu0  ;;  %v2840_v21 = vpop.f32.mrb[60].mxu1 }
 0x3a2   : > { %v2456_v22 = vpop.f32.mrb[61].mxu0  ;;  %v2842_v14 = vpop.f32.mrb[61].mxu1 }
 0x3a3   : > { %v3692_v24 = vpack.c.bf16 %v2456_v22, %v2454_v54  ;;  %v3693_v11 = vpack.c.bf16 %v2842_v14, %v2840_v21  ;;  %v2458_v12 = vpop.f32.mrb[62].mxu0  ;;  %v2844_v6 = vpop.f32.mrb[62].mxu1 }
 0x3a4   : > { %v2460_v56 = vpop.f32.mrb[63].mxu0  ;;  %v2846_v32 = vpop.f32.mrb[63].mxu1 }
 0x3a5   : > { %3293 = vst [vmem:[%s4591_s28 + $0x1e0] sm:$0xff] %v3692_v24  ;;  %3294 = vst [vmem:[%s4591_s28 + $0x1e8] sm:$0xff] %v3693_v11  ;;  %v3694_v1 = vpack.c.bf16 %v2460_v56, %v2458_v12  ;;  %v3695_v35 = vpack.c.bf16 %v2846_v32, %v2844_v6 }
 0x3a7   : > { %3295 = vst [vmem:[%s4591_s28 + $0x1f0] sm:$0xff] %v3694_v1  ;;  %3296 = vst [vmem:[%s4591_s28 + $0x1f8] sm:$0xff] %v3695_v35 }
 0x3a8   : > { %4269 = shalt.err (!%p4266_p6)
}
 0x3a9   : > { %s4270_s10 = scalar_lea.hbm %s5605_s20, 8192  ;;  %s4274_s26 = scalar_lea.hbm %s5663_s3, 16384 }
 0x3aa   : > { %p4271_p9 = scmp.ne.s32.totalorder %s5605_s20, %s4270_s10  ;;  %p4275_p3 = scmp.lt.u32.totalorder %s5605_s20, %s5663_s3 }
 0x3ab   : > { %p4276_p12 = scmp.lt.u32.totalorder %s4274_s26, %s4270_s10  ;;  %p4278_p7 = scmp.lt.u32.totalorder %s4270_s10, %s5605_s20 }
 0x3ac   : > { %p4272_p13 = pnand %p4271_p9, %p5942_p10 }
 0x3ad   : > { %p4277_p4 = por %p4276_p12, %p4275_p3 }
 0x3ae   : > { %p4273_p11 = pneg %p4272_p13 }
 0x3af   : > { %p4279_p2 = por %p4278_p7, %p4277_p4 }
 0x3b1   : > { %p4280_p8 = pnand %p4279_p2, %p4273_p11 }
 0x3b3   : > { %4283 = shalt.err (!%p4280_p8)
}
 0x3b4   : > { %s4355_s28 = smov 256   ;;  %s4356_s18 = smov 512  }
 0x3b5   : > { %s4357_s11 = smov 16  }
 0x3b6   : > { %3835 = dma.vmem_to_hbm [thread:$0]  (%p5942_p10), %s5607_s22, 8192, %s5605_s20, %s3298_s15, %s4355_s28, %s4356_s18, %s4357_s11  }
 0x3b7 PF: > { %s3329_s30 = sand.u32 1, %s4326_s12   ;;  %p5943_p0 = scmp.ne.s32.totalorder %s5758_s24, 0 }
 0x3b8   : > { %p5944_p5 = scmp.ge.s32.totalorder %s4346_s17, 2  ;;  %s3330_s7 = scalar_lea.sflag [#allocation5], %s3329_s30 }
 0x3ba   : > { %p3849_p1 = pnand %p5944_p5, %p5943_p0 }
 0x3bc   : > { %4321 = dma.done.wait (!%p3849_p1), %s3330_s7, 8192  }
 0x3bd   : > { %4323 = vsyncadd (!%p3849_p1), %s3330_s7, 4294959104  ;;  %s18_s17 = sadd.s32 1, %s4346_s17   ;;  %s5945_s12 = smov %s4330_s13 }
 0x3be   : > { %p15_p6 = scmp.ge.s32.totalorder %s18_s17, 4   ;;  %s5946_s13 = smov %s4334_s14 }
 0x3bf   : > { %s5947_s14 = smov %s4537_s5  ;;  %s5948_s15 = smov %s4342_s16 }
 0x3c0   : > { %s5949_s16 = smov %s5951_s6  ;;  %17 = sbr.rel (!%p15_p6) target bundleno = 6 (0x6), region = 89 }
 0x3c7   :  { %3335 = vsyncpa [#allocation4], 1 }
 0x3c8   :  { %3337 = vsyncpa [#allocation4 + $0x1], 1 }
 0x3c9   :  { %3338 = vsyncpa [#allocation7], 1 }
 0x3ca   :  { %3339 = vsyncpa [#allocation5], 1 }
 0x3cb   :  { %3341 = vsyncpa [#allocation5 + $0x1], 1 }

</bundles_post_ra>
